<compile_context>
chip_gen: v7x
topology: tpu7x:2x2x1
jax: 0.10.0
libtpu: 0.0.40
codegen_flags: <defaults>
</compile_context>

<pallas_src>
import jax
import jax.numpy as jnp
from jax import lax
from jax.experimental import pallas as pl
from jax.experimental.pallas import tpu as pltpu

KH = KW = 3   # 3x3 convolution, stride=1, padding=1 (standard Conv2dBlock config)
LANE = 128    # TPU lane width


def _conv2d_relu_kernel(x_ref, w_ref, b_ref, o_ref):
    # x_ref: (1, H+2, Wp+2, Cin_pad)   zero-padded image (resident across h/co tiles)
    # w_ref: (KH*KW*Cin_pad, TCO)      flattened, lane-padded weight slab block
    # b_ref: (1, TCO)                  lane-padded bias block (f32)
    # o_ref: (1, TH, Wp, TCO)          lane-dense output tile
    TH, Wp, TCO = o_ref.shape[1], o_ref.shape[2], o_ref.shape[3]
    cin_pad = x_ref.shape[3]

    t = pl.program_id(1)
    row0 = pl.multiple_of(t * TH, TH)
    xs = x_ref[0, pl.ds(row0, TH + 2), :, :]               # (TH+2, Wp+2, Cin_pad)

    # K-chunked im2col: one chunk per kh row (3 lane-block taps -> K = 3*Cin_pad),
    # 3 MXU matmuls accumulated in f32.  Default Mosaic f32 matmul precision is the
    # multi-pass (~f32-accurate) algorithm; set precision=lax.Precision.HIGHEST on
    # the dot if bit-accurate f32 is required.
    acc = None
    for kh in range(KH):                                    # static unroll
        rows = xs[kh:kh + TH]                               # (TH, Wp+2, Cin_pad)
        patch = jnp.concatenate(
            [rows[:, kw:kw + Wp, :] for kw in range(KW)], axis=-1
        ).reshape(TH * Wp, KW * cin_pad)                    # lane-block placement
        w_chunk = w_ref[kh * KW * cin_pad:(kh + 1) * KW * cin_pad, :]
        part = jnp.dot(patch, w_chunk, preferred_element_type=jnp.float32)
        acc = part if acc is None else acc + part

    acc = jnp.maximum(acc + b_ref[...], 0.0)                # bias + ReLU, f32 epilogue
    o_ref[...] = acc.reshape(1, TH, Wp, TCO).astype(o_ref.dtype)


def _choose_tile_h(H, Wp, cin_pad, tco, itemsize):
    """Largest divisor of H whose per-kh im2col chunk / f32 accumulator fit budget."""
    best = 1
    for th in range(1, H + 1):
        if H % th:
            continue
        m = th * Wp
        patch_bytes = m * KW * cin_pad * itemsize           # one kh chunk of the patch
        acc_bytes = m * tco * 4                             # f32 accumulator
        if patch_bytes <= (2 << 20) and acc_bytes <= (4 << 20):
            best = th
    return best


def conv2d_block(x_nchw, weight, bias, *, compute_dtype=None, out_dtype=None):
    """Conv2d(3x3, stride=1, pad=1) + bias + ReLU (PyTorch Conv2dBlock forward).

    x_nchw : (N, Cin, H, W)
    weight : (Cout, Cin, KH, KW)  (PyTorch OIHW layout)
    bias   : (Cout,)
    returns: (N, Cout, H, W) in out_dtype (default: x dtype)
    """
    N, Cin, H, W = x_nchw.shape
    Cout = weight.shape[0]
    compute_dtype = jnp.dtype(compute_dtype or x_nchw.dtype)
    out_dtype = jnp.dtype(out_dtype or x_nchw.dtype)
    itemsize = compute_dtype.itemsize

    cin_pad = LANE * pl.cdiv(Cin, LANE)                     # lane-align every im2col tap
    cout_pad = LANE * pl.cdiv(Cout, LANE)                   # lane-dense output stores
    w_align = 8 if itemsize >= 4 else 16                    # sublane alignment f32 / bf16
    Wp = w_align * pl.cdiv(W, w_align)

    # --- wrapper glue (HBM passes; see TODOs at top for removing them) -------
    x_nhwc = jnp.transpose(x_nchw, (0, 2, 3, 1))
    x_pad = jnp.pad(
        x_nhwc, ((0, 0), (1, 1), (1, Wp - W + 1), (0, cin_pad - Cin))
    ).astype(compute_dtype)                                 # (N, H+2, Wp+2, Cin_pad)

    w4 = jnp.transpose(weight, (2, 3, 1, 0))                # (KH, KW, Cin, Cout)
    w4 = jnp.pad(w4, ((0, 0), (0, 0), (0, cin_pad - Cin), (0, cout_pad - Cout)))
    w2d = w4.reshape(KH * KW * cin_pad, cout_pad).astype(compute_dtype)
    b2d = jnp.pad(bias.astype(jnp.float32).reshape(1, Cout),
                  ((0, 0), (0, cout_pad - Cout)))           # bias stays f32 (f32 epilogue)

    # --- tiling ---------------------------------------------------------------
    if cout_pad <= 256:
        tco = cout_pad
    elif cout_pad % 256 == 0:
        tco = 256
    else:
        tco = LANE
    TH = _choose_tile_h(H, Wp, cin_pad, tco, itemsize)
    nT = H // TH
    if N * nT < 2 and cout_pad >= 2 * LANE:
        tco = LANE                                          # >=2 programs for v7x megacore
    nCo = cout_pad // tco
    kdim = KH * KW * cin_pad

    # --- VMEM budget -> vmem_limit_bytes (generation-aware) -------------------
    out_isz = out_dtype.itemsize
    need = ((H + 2) * (Wp + 2) * cin_pad * itemsize * 2     # image (worst case 2 buffers)
            + kdim * tco * itemsize * 2                     # weight slab
            + tco * 4 * 2                                   # bias
            + TH * Wp * tco * out_isz * 2                   # double-buffered output tile
            + TH * Wp * KW * cin_pad * itemsize             # live im2col chunk
            + TH * Wp * tco * 4)                            # f32 accumulator
    try:
        cap = int(pltpu.get_tpu_info().vmem_capacity_bytes)
    except Exception:
        cap = 64 * 1024 * 1024                              # conservative (v7x-sized)
    if cap <= 0:
        cap = 64 * 1024 * 1024
    vmem_limit = int(min(int(0.9 * cap),
                         max(32 * 1024 * 1024, int(need * 1.5) + (8 << 20))))

    def _call(single_buffer):
        def spec(shape, imap, const):
            if single_buffer and const:
                # Constant-index block: one VMEM buffer is enough (no prefetch needed).
                return pl.BlockSpec(shape, imap, pipeline_mode=pl.Buffered(1))
            return pl.BlockSpec(shape, imap)

        in_specs = [
            # Image: same block across (t, co) -> DMA'd once per image, stays resident.
            spec((1, H + 2, Wp + 2, cin_pad), lambda n, t, c: (n, 0, 0, 0), True),
            spec((kdim, tco), lambda n, t, c: (0, c), nCo == 1),
            spec((1, tco), lambda n, t, c: (0, c), nCo == 1),
        ]
        return pl.pallas_call(
            _conv2d_relu_kernel,
            out_shape=jax.ShapeDtypeStruct((N, H, Wp, cout_pad), out_dtype),
            grid_spec=pltpu.PrefetchScalarGridSpec(
                num_scalar_prefetch=0,
                grid=(N, nT, nCo),
                in_specs=in_specs,
                out_specs=pl.BlockSpec((1, TH, Wp, tco), lambda n, t, c: (n, t, 0, c)),
            ),
            compiler_params=pltpu.CompilerParams(
                dimension_semantics=("parallel", "parallel", "parallel"),
                vmem_limit_bytes=vmem_limit),
        )(x_pad, w2d, b2d)

    try:
        out_pad = _call(True)
    except Exception:
        # Older JAX without BlockSpec pipeline_mode / Buffered(1): default buffering.
        out_pad = _call(False)

    if Wp != W or cout_pad != Cout:
        out_pad = out_pad[:, :, :W, :Cout]                  # drop lane / sublane padding
    return jnp.transpose(out_pad, (0, 3, 1, 2))             # back to NCHW


if __name__ == "__main__":
    key = jax.random.PRNGKey(0)
    k_x, k_w, k_b = jax.random.split(key, 3)

    N, Cin, H, W = 2, 4, 16, 16
    Cout = 8

    x = jax.random.normal(k_x, (N, Cin, H, W), dtype=jnp.float32)
    weight = jax.random.normal(k_w, (Cout, Cin, KH, KW), dtype=jnp.float32) * 0.1
    bias = jax.random.normal(k_b, (Cout,), dtype=jnp.float32) * 0.1

    # f32 path
    out = jax.block_until_ready(conv2d_block(x, weight, bias))
    ref = lax.conv_general_dilated(
        x, weight, window_strides=(1, 1), padding=((1, 1), (1, 1)),
        dimension_numbers=("NCHW", "OIHW", "NCHW"),
        precision=lax.Precision.HIGHEST)
    ref = jnp.maximum(ref + bias[None, :, None, None], 0.0)
    assert out.shape == (N, Cout, H, W)
    assert jnp.allclose(out, ref, atol=1e-4, rtol=1e-4)

    # bf16 fast path (recommended on v6e/v7x): bf16 operands, f32 accumulate/epilogue.
    out_bf16 = jax.block_until_ready(
        conv2d_block(x, weight, bias,
                     compute_dtype=jnp.bfloat16, out_dtype=jnp.bfloat16))
    x_q = x.astype(jnp.bfloat16).astype(jnp.float32)
    w_q = weight.astype(jnp.bfloat16).astype(jnp.float32)
    ref_q = lax.conv_general_dilated(
        x_q, w_q, window_strides=(1, 1), padding=((1, 1), (1, 1)),
        dimension_numbers=("NCHW", "OIHW", "NCHW"),
        precision=lax.Precision.HIGHEST)
    ref_q = jnp.maximum(ref_q + bias[None, :, None, None], 0.0)
    assert jnp.allclose(out_bf16.astype(jnp.float32), ref_q, atol=3e-2, rtol=3e-2)

    print("KERNEL_OK")
</pallas_src>

<mosaic_0001>
module attributes {stable_mosaic.version = 11 : i64} {
  func.func @_conv2d_relu_kernel(%arg0: i32, %arg1: i32, %arg2: i32, %arg3: memref<1x18x18x128xf32, #tpu.memory_space<vmem>>, %arg4: memref<1152x128xf32, #tpu.memory_space<vmem>>, %arg5: memref<1x128xf32, #tpu.memory_space<vmem>>, %arg6: memref<1x16x16x128xf32, #tpu.memory_space<vmem>>) attributes {dimension_semantics = [#tpu.dimension_semantics<parallel>, #tpu.dimension_semantics<parallel>, #tpu.dimension_semantics<parallel>], iteration_bounds = array<i64: 2, 1, 1>, scalar_prefetch = 0 : i64, scratch_operands = 0 : i64, tpu.core_type = #tpu.core_type<tc>, window_params = [{pipeline_mode = #tpu.pipeline_mode<synchronous>, transform_indices = @transform_0, window_bounds = array<i64: 1, 18, 18, 128>}, {pipeline_mode = #tpu.pipeline_mode<synchronous>, transform_indices = @transform_1, window_bounds = array<i64: 1152, 128>}, {pipeline_mode = #tpu.pipeline_mode<synchronous>, transform_indices = @transform_2, window_bounds = array<i64: 1, 128>}, {transform_indices = @transform_3, window_bounds = array<i64: 1, 16, 16, 128>}]} {
    %c16_i32 = arith.constant 16 : i32
    %0 = arith.muli %arg1, %c16_i32 : i32
    %1 = tpu.assume_multiple %0, 16 : i32
    %c0 = arith.constant 0 : index
    %2 = arith.index_cast %1 : i32 to index
    %c0_0 = arith.constant 0 : index
    %c0_1 = arith.constant 0 : index
    %3 = vector.load %arg3[%c0, %2, %c0_0, %c0_1] : memref<1x18x18x128xf32, #tpu.memory_space<vmem>>, vector<1x18x18x128xf32>
    %4 = vector.shape_cast %3 : vector<1x18x18x128xf32> to vector<18x18x128xf32>
    %5 = vector.extract_strided_slice %4 {offsets = [0, 0, 0], sizes = [16, 18, 128], strides = [1, 1, 1]} : vector<18x18x128xf32> to vector<16x18x128xf32>
    %6 = vector.extract_strided_slice %5 {offsets = [0, 0, 0], sizes = [16, 16, 128], strides = [1, 1, 1]} : vector<16x18x128xf32> to vector<16x16x128xf32>
    %7 = vector.extract_strided_slice %5 {offsets = [0, 1, 0], sizes = [16, 16, 128], strides = [1, 1, 1]} : vector<16x18x128xf32> to vector<16x16x128xf32>
    %8 = vector.extract_strided_slice %5 {offsets = [0, 2, 0], sizes = [16, 16, 128], strides = [1, 1, 1]} : vector<16x18x128xf32> to vector<16x16x128xf32>
    %9 = tpu.concatenate %6, %7, %8 in 2 : vector<16x16x128xf32>, vector<16x16x128xf32>, vector<16x16x128xf32> -> vector<16x16x384xf32>
    %10 = vector.shape_cast %9 : vector<16x16x384xf32> to vector<256x384xf32>
    %c0_2 = arith.constant 0 : index
    %c0_3 = arith.constant 0 : index
    %11 = vector.load %arg4[%c0_2, %c0_3] : memref<1152x128xf32, #tpu.memory_space<vmem>>, vector<384x128xf32>
    %cst = arith.constant dense<0.000000e+00> : vector<256x128xf32>
    %12 = tpu.matmul %10, %11, %cst {dimension_numbers = #tpu.dot_dimension_numbers<[1], [0], [0], [1], [0, 0, 1, 1], [], []>} : vector<256x384xf32>, vector<384x128xf32>, vector<256x128xf32> -> vector<256x128xf32>
    %13 = vector.extract_strided_slice %4 {offsets = [1, 0, 0], sizes = [16, 18, 128], strides = [1, 1, 1]} : vector<18x18x128xf32> to vector<16x18x128xf32>
    %14 = vector.extract_strided_slice %13 {offsets = [0, 0, 0], sizes = [16, 16, 128], strides = [1, 1, 1]} : vector<16x18x128xf32> to vector<16x16x128xf32>
    %15 = vector.extract_strided_slice %13 {offsets = [0, 1, 0], sizes = [16, 16, 128], strides = [1, 1, 1]} : vector<16x18x128xf32> to vector<16x16x128xf32>
    %16 = vector.extract_strided_slice %13 {offsets = [0, 2, 0], sizes = [16, 16, 128], strides = [1, 1, 1]} : vector<16x18x128xf32> to vector<16x16x128xf32>
    %17 = tpu.concatenate %14, %15, %16 in 2 : vector<16x16x128xf32>, vector<16x16x128xf32>, vector<16x16x128xf32> -> vector<16x16x384xf32>
    %18 = vector.shape_cast %17 : vector<16x16x384xf32> to vector<256x384xf32>
    %c384 = arith.constant 384 : index
    %c0_4 = arith.constant 0 : index
    %19 = vector.load %arg4[%c384, %c0_4] : memref<1152x128xf32, #tpu.memory_space<vmem>>, vector<384x128xf32>
    %cst_5 = arith.constant dense<0.000000e+00> : vector<256x128xf32>
    %20 = tpu.matmul %18, %19, %cst_5 {dimension_numbers = #tpu.dot_dimension_numbers<[1], [0], [0], [1], [0, 0, 1, 1], [], []>} : vector<256x384xf32>, vector<384x128xf32>, vector<256x128xf32> -> vector<256x128xf32>
    %21 = arith.addf %12, %20 : vector<256x128xf32>
    %22 = vector.extract_strided_slice %4 {offsets = [2, 0, 0], sizes = [16, 18, 128], strides = [1, 1, 1]} : vector<18x18x128xf32> to vector<16x18x128xf32>
    %23 = vector.extract_strided_slice %22 {offsets = [0, 0, 0], sizes = [16, 16, 128], strides = [1, 1, 1]} : vector<16x18x128xf32> to vector<16x16x128xf32>
    %24 = vector.extract_strided_slice %22 {offsets = [0, 1, 0], sizes = [16, 16, 128], strides = [1, 1, 1]} : vector<16x18x128xf32> to vector<16x16x128xf32>
    %25 = vector.extract_strided_slice %22 {offsets = [0, 2, 0], sizes = [16, 16, 128], strides = [1, 1, 1]} : vector<16x18x128xf32> to vector<16x16x128xf32>
    %26 = tpu.concatenate %23, %24, %25 in 2 : vector<16x16x128xf32>, vector<16x16x128xf32>, vector<16x16x128xf32> -> vector<16x16x384xf32>
    %27 = vector.shape_cast %26 : vector<16x16x384xf32> to vector<256x384xf32>
    %c768 = arith.constant 768 : index
    %c0_6 = arith.constant 0 : index
    %28 = vector.load %arg4[%c768, %c0_6] : memref<1152x128xf32, #tpu.memory_space<vmem>>, vector<384x128xf32>
    %cst_7 = arith.constant dense<0.000000e+00> : vector<256x128xf32>
    %29 = tpu.matmul %27, %28, %cst_7 {dimension_numbers = #tpu.dot_dimension_numbers<[1], [0], [0], [1], [0, 0, 1, 1], [], []>} : vector<256x384xf32>, vector<384x128xf32>, vector<256x128xf32> -> vector<256x128xf32>
    %30 = arith.addf %21, %29 : vector<256x128xf32>
    %c0_8 = arith.constant 0 : index
    %c0_9 = arith.constant 0 : index
    %31 = vector.load %arg5[%c0_8, %c0_9] : memref<1x128xf32, #tpu.memory_space<vmem>>, vector<1x128xf32>
    %32 = vector.broadcast %31 : vector<1x128xf32> to vector<256x128xf32>
    %33 = arith.addf %30, %32 : vector<256x128xf32>
    %cst_10 = arith.constant 0.000000e+00 : f32
    %34 = vector.broadcast %cst_10 : f32 to vector<256x128xf32>
    %35 = arith.maximumf %33, %34 : vector<256x128xf32>
    %36 = vector.shape_cast %35 : vector<256x128xf32> to vector<1x16x16x128xf32>
    %c0_11 = arith.constant 0 : index
    %c0_12 = arith.constant 0 : index
    %c0_13 = arith.constant 0 : index
    %c0_14 = arith.constant 0 : index
    %37 = vector.load %arg6[%c0_11, %c0_12, %c0_13, %c0_14] : memref<1x16x16x128xf32, #tpu.memory_space<vmem>>, vector<1x16x16x128xf32>
    tpu.vector_store %arg6[%c0_11, %c0_12, %c0_13, %c0_14], %36 {strides = array<i32>} : memref<1x16x16x128xf32, #tpu.memory_space<vmem>>, vector<1x16x16x128xf32>,
    return
  }
  func.func @transform_0(%arg0: i32, %arg1: i32, %arg2: i32) -> (i32, i32, i32, i32) {
    %c0_i32 = arith.constant 0 : i32
    %c0_i32_0 = arith.constant 0 : i32
    %c0_i32_1 = arith.constant 0 : i32
    %c0_i32_2 = arith.constant 0 : i32
    return %arg0, %c0_i32, %c0_i32_0, %c0_i32_1 : i32, i32, i32, i32
  }
  func.func @transform_1(%arg0: i32, %arg1: i32, %arg2: i32) -> (i32, i32) {
    %c0_i32 = arith.constant 0 : i32
    %c0_i32_0 = arith.constant 0 : i32
    return %c0_i32, %arg2 : i32, i32
  }
  func.func @transform_2(%arg0: i32, %arg1: i32, %arg2: i32) -> (i32, i32) {
    %c0_i32 = arith.constant 0 : i32
    %c0_i32_0 = arith.constant 0 : i32
    return %c0_i32, %arg2 : i32, i32
  }
  func.func @transform_3(%arg0: i32, %arg1: i32, %arg2: i32) -> (i32, i32, i32, i32) {
    %c0_i32 = arith.constant 0 : i32
    %c0_i32_0 = arith.constant 0 : i32
    return %arg0, %arg1, %c0_i32, %arg2 : i32, i32, i32, i32
  }
}

module attributes {stable_mosaic.version = 11 : i64} {
  func.func @_conv2d_relu_kernel(%arg0: i32, %arg1: i32, %arg2: i32, %arg3: memref<1x18x18x128xf32, #tpu.memory_space<vmem>>, %arg4: memref<1152x128xf32, #tpu.memory_space<vmem>>, %arg5: memref<1x128xf32, #tpu.memory_space<vmem>>, %arg6: memref<1x16x16x128xf32, #tpu.memory_space<vmem>>) attributes {dimension_semantics = [#tpu.dimension_semantics<parallel>, #tpu.dimension_semantics<parallel>, #tpu.dimension_semantics<parallel>], iteration_bounds = array<i64: 2, 1, 1>, scalar_prefetch = 0 : i64, scratch_operands = 0 : i64, tpu.core_type = #tpu.core_type<tc>, window_params = [{transform_indices = @transform_0, window_bounds = array<i64: 1, 18, 18, 128>}, {transform_indices = @transform_1, window_bounds = array<i64: 1152, 128>}, {transform_indices = @transform_2, window_bounds = array<i64: 1, 128>}, {transform_indices = @transform_3, window_bounds = array<i64: 1, 16, 16, 128>}]} {
    %c16_i32 = arith.constant 16 : i32
    %0 = arith.muli %arg1, %c16_i32 : i32
    %1 = tpu.assume_multiple %0, 16 : i32
    %c0 = arith.constant 0 : index
    %2 = arith.index_cast %1 : i32 to index
    %c0_0 = arith.constant 0 : index
    %c0_1 = arith.constant 0 : index
    %3 = vector.load %arg3[%c0, %2, %c0_0, %c0_1] : memref<1x18x18x128xf32, #tpu.memory_space<vmem>>, vector<1x18x18x128xf32>
    %4 = vector.shape_cast %3 : vector<1x18x18x128xf32> to vector<18x18x128xf32>
    %5 = vector.extract_strided_slice %4 {offsets = [0, 0, 0], sizes = [16, 18, 128], strides = [1, 1, 1]} : vector<18x18x128xf32> to vector<16x18x128xf32>
    %6 = vector.extract_strided_slice %5 {offsets = [0, 0, 0], sizes = [16, 16, 128], strides = [1, 1, 1]} : vector<16x18x128xf32> to vector<16x16x128xf32>
    %7 = vector.extract_strided_slice %5 {offsets = [0, 1, 0], sizes = [16, 16, 128], strides = [1, 1, 1]} : vector<16x18x128xf32> to vector<16x16x128xf32>
    %8 = vector.extract_strided_slice %5 {offsets = [0, 2, 0], sizes = [16, 16, 128], strides = [1, 1, 1]} : vector<16x18x128xf32> to vector<16x16x128xf32>
    %9 = tpu.concatenate %6, %7, %8 in 2 : vector<16x16x128xf32>, vector<16x16x128xf32>, vector<16x16x128xf32> -> vector<16x16x384xf32>
    %10 = vector.shape_cast %9 : vector<16x16x384xf32> to vector<256x384xf32>
    %c0_2 = arith.constant 0 : index
    %c0_3 = arith.constant 0 : index
    %11 = vector.load %arg4[%c0_2, %c0_3] : memref<1152x128xf32, #tpu.memory_space<vmem>>, vector<384x128xf32>
    %cst = arith.constant dense<0.000000e+00> : vector<256x128xf32>
    %12 = tpu.matmul %10, %11, %cst {dimension_numbers = #tpu.dot_dimension_numbers<[1], [0], [0], [1], [0, 0, 1, 1], [], []>} : vector<256x384xf32>, vector<384x128xf32>, vector<256x128xf32> -> vector<256x128xf32>
    %13 = vector.extract_strided_slice %4 {offsets = [1, 0, 0], sizes = [16, 18, 128], strides = [1, 1, 1]} : vector<18x18x128xf32> to vector<16x18x128xf32>
    %14 = vector.extract_strided_slice %13 {offsets = [0, 0, 0], sizes = [16, 16, 128], strides = [1, 1, 1]} : vector<16x18x128xf32> to vector<16x16x128xf32>
    %15 = vector.extract_strided_slice %13 {offsets = [0, 1, 0], sizes = [16, 16, 128], strides = [1, 1, 1]} : vector<16x18x128xf32> to vector<16x16x128xf32>
    %16 = vector.extract_strided_slice %13 {offsets = [0, 2, 0], sizes = [16, 16, 128], strides = [1, 1, 1]} : vector<16x18x128xf32> to vector<16x16x128xf32>
    %17 = tpu.concatenate %14, %15, %16 in 2 : vector<16x16x128xf32>, vector<16x16x128xf32>, vector<16x16x128xf32> -> vector<16x16x384xf32>
    %18 = vector.shape_cast %17 : vector<16x16x384xf32> to vector<256x384xf32>
    %c384 = arith.constant 384 : index
    %c0_4 = arith.constant 0 : index
    %19 = vector.load %arg4[%c384, %c0_4] : memref<1152x128xf32, #tpu.memory_space<vmem>>, vector<384x128xf32>
    %cst_5 = arith.constant dense<0.000000e+00> : vector<256x128xf32>
    %20 = tpu.matmul %18, %19, %cst_5 {dimension_numbers = #tpu.dot_dimension_numbers<[1], [0], [0], [1], [0, 0, 1, 1], [], []>} : vector<256x384xf32>, vector<384x128xf32>, vector<256x128xf32> -> vector<256x128xf32>
    %21 = arith.addf %12, %20 : vector<256x128xf32>
    %22 = vector.extract_strided_slice %4 {offsets = [2, 0, 0], sizes = [16, 18, 128], strides = [1, 1, 1]} : vector<18x18x128xf32> to vector<16x18x128xf32>
    %23 = vector.extract_strided_slice %22 {offsets = [0, 0, 0], sizes = [16, 16, 128], strides = [1, 1, 1]} : vector<16x18x128xf32> to vector<16x16x128xf32>
    %24 = vector.extract_strided_slice %22 {offsets = [0, 1, 0], sizes = [16, 16, 128], strides = [1, 1, 1]} : vector<16x18x128xf32> to vector<16x16x128xf32>
    %25 = vector.extract_strided_slice %22 {offsets = [0, 2, 0], sizes = [16, 16, 128], strides = [1, 1, 1]} : vector<16x18x128xf32> to vector<16x16x128xf32>
    %26 = tpu.concatenate %23, %24, %25 in 2 : vector<16x16x128xf32>, vector<16x16x128xf32>, vector<16x16x128xf32> -> vector<16x16x384xf32>
    %27 = vector.shape_cast %26 : vector<16x16x384xf32> to vector<256x384xf32>
    %c768 = arith.constant 768 : index
    %c0_6 = arith.constant 0 : index
    %28 = vector.load %arg4[%c768, %c0_6] : memref<1152x128xf32, #tpu.memory_space<vmem>>, vector<384x128xf32>
    %cst_7 = arith.constant dense<0.000000e+00> : vector<256x128xf32>
    %29 = tpu.matmul %27, %28, %cst_7 {dimension_numbers = #tpu.dot_dimension_numbers<[1], [0], [0], [1], [0, 0, 1, 1], [], []>} : vector<256x384xf32>, vector<384x128xf32>, vector<256x128xf32> -> vector<256x128xf32>
    %30 = arith.addf %21, %29 : vector<256x128xf32>
    %c0_8 = arith.constant 0 : index
    %c0_9 = arith.constant 0 : index
    %31 = vector.load %arg5[%c0_8, %c0_9] : memref<1x128xf32, #tpu.memory_space<vmem>>, vector<1x128xf32>
    %32 = vector.broadcast %31 : vector<1x128xf32> to vector<256x128xf32>
    %33 = arith.addf %30, %32 : vector<256x128xf32>
    %cst_10 = arith.constant 0.000000e+00 : f32
    %34 = vector.broadcast %cst_10 : f32 to vector<256x128xf32>
    %35 = arith.maximumf %33, %34 : vector<256x128xf32>
    %36 = vector.shape_cast %35 : vector<256x128xf32> to vector<1x16x16x128xf32>
    %c0_11 = arith.constant 0 : index
    %c0_12 = arith.constant 0 : index
    %c0_13 = arith.constant 0 : index
    %c0_14 = arith.constant 0 : index
    %37 = vector.load %arg6[%c0_11, %c0_12, %c0_13, %c0_14] : memref<1x16x16x128xf32, #tpu.memory_space<vmem>>, vector<1x16x16x128xf32>
    tpu.vector_store %arg6[%c0_11, %c0_12, %c0_13, %c0_14], %36 {strides = array<i32>} : memref<1x16x16x128xf32, #tpu.memory_space<vmem>>, vector<1x16x16x128xf32>,
    return
  }
  func.func @transform_0(%arg0: i32, %arg1: i32, %arg2: i32) -> (i32, i32, i32, i32) {
    %c0_i32 = arith.constant 0 : i32
    %c0_i32_0 = arith.constant 0 : i32
    %c0_i32_1 = arith.constant 0 : i32
    %c0_i32_2 = arith.constant 0 : i32
    return %arg0, %c0_i32, %c0_i32_0, %c0_i32_1 : i32, i32, i32, i32
  }
  func.func @transform_1(%arg0: i32, %arg1: i32, %arg2: i32) -> (i32, i32) {
    %c0_i32 = arith.constant 0 : i32
    %c0_i32_0 = arith.constant 0 : i32
    return %c0_i32, %arg2 : i32, i32
  }
  func.func @transform_2(%arg0: i32, %arg1: i32, %arg2: i32) -> (i32, i32) {
    %c0_i32 = arith.constant 0 : i32
    %c0_i32_0 = arith.constant 0 : i32
    return %c0_i32, %arg2 : i32, i32
  }
  func.func @transform_3(%arg0: i32, %arg1: i32, %arg2: i32) -> (i32, i32, i32, i32) {
    %c0_i32 = arith.constant 0 : i32
    %c0_i32_0 = arith.constant 0 : i32
    return %arg0, %arg1, %c0_i32, %arg2 : i32, i32, i32, i32
  }
}

</mosaic_0001>

<bundles_post_ra>
// kernel: tpu_custom_call.1
= control target key start
LH: loop header
LB: loop body
LE: loop exit
PB: predicated region body
PF: predicated region fallthrough
CT: control target
= control target key end

     0   :  { %8 = vsyncpa [#allocation3], 0  ;;  %s4939_s0 = inlined_call_operand.vmem [shape: f32[2,18,18,128], index: 0, kind: input, shape index: {}]   ;;  %s4940_s1 = inlined_call_operand.vmem [shape: f32[1152,128], index: 1, kind: input, shape index: {}]   ;;  %s4941_s2 = inlined_call_operand.vmem [shape: f32[1,128], index: 2, kind: input, shape index: {}]   ;;  %s4942_s3 = inlined_call_operand.hbm [shape: f32[2,16,16,128], index: 3, kind: output, shape index: {}]  }
   0x1   :  { %10 = vsyncpa [#allocation3 + $0x1], 0  ;;  %s3177_s12 = smov 0   ;;  %s3179_s13 = smov 0  }
   0x2   :  { %s3181_s14 = smov 0   ;;  %s3183_s15 = smov 0  }
   0x3   :  { %s3185_s16 = smov 0   ;;  %s3187_s17 = smov 0  }
   0x4 LB: > { %s2345_s18 = sadd.s32 4294967295, %s3151_s17   ;;  %s2346_s19 = sadd.s32 4294967294, %s3151_s17   ;;  %s3151_s17 = sphi %s3187_s17, %s16_s17   ;;  %s3147_s16 = sphi %s3185_s16, %s5107_s16   ;;  %s3143_s15 = sphi %s3183_s15, %s5106_s15   ;;  %s3139_s14 = sphi %s3181_s14, %s5105_s14   ;;  %s3135_s13 = sphi %s3179_s13, %s5104_s13   ;;  %s3131_s12 = sphi %s3177_s12, %s5103_s12  }
   0x5   : > { %s35_s20 = sadd.s32 1, %s3147_s16  ;;  %s124_s21 = sadd.s32 1, %s3139_s14 }
   0x6   : > { %p37_p0 = scmp.ge.s32.totalorder %s35_s20, 2  ;;  %p134_p1 = scmp.ne.s32.totalorder %s3139_s14, %s3135_s13 }
   0x7   : > { %p135_p2 = scmp.eq.s32.totalorder %s2345_s18, 1  ;;  %p140_p3 = scmp.ne.s32.totalorder %s3135_s13, %s3131_s12 }
   0x8   : > { %s5109_s20 = smov (%p37_p0, %s35_s20), 0  ;;  %p141_p5 = scmp.eq.s32.totalorder %s2346_s19, 1 }
   0x9   : > { %p3217_p4 = por %p135_p2, %p134_p1  ;;  %s117_s23 = ssub.s32 %s3147_s16, %s5109_s20 }
   0xa   : > { %p2350_p6 = scmp.ge.s32.totalorder %s3151_s17, 1  ;;  %p122_p7 = scmp.eq.s32.totalorder %s117_s23, 0 }
   0xb   : > { %p3224_p8 = por %p141_p5, %p140_p3  ;;  %p180_p9 = scmp.lt.s32.totalorder %s3151_s17, 3 }
   0xc   : > { %s3230_s25 = scalar_select %p122_p7, %s3139_s14, %s124_s21  }
   0xd   : > { %p181_p10 = pnand %p2350_p6, %p180_p9 }
   0xf   : > { %184 = sbr.rel (%p181_p10) target bundleno = 609 (0x261), region = 32 }
  0x16   : > { %v620_v0 = vld [vmem:[%s4940_s1 + $0x180] sm:$0xff]  ;;  %v621_v1 = vld [vmem:[%s4940_s1 + $0x188] sm:$0xff]  ;;  %p211_p11 = scmp.lt.s32.totalorder %s3143_s15, 1  ;;  %v4945_v3 = vmov 0.0|0.0   ;;  %v622_v6 = vld [vmem:[%s4940_s1 + $0x190] sm:$0xff]  ;;  %vm442_vm0 = vcmask 1045504  }
  0x17   : > { %v652_v2 = vld [vmem:[%s4940_s1 + $0x280] sm:$0xff]  ;;  %2744 = vmatprep.subr.bf16.mxu0 %v4945_v3  ;;  %v2745_v4 = vpack.c.bf16 %v621_v1, %v620_v0  ;;  %v653_v5 = vld [vmem:[%s4940_s1 + $0x288] sm:$0xff]  ;;  %v623_v7 = vld [vmem:[%s4940_s1 + $0x198] sm:$0xff]  ;;  %vm329_vm1 = vcmask 1046528   ;;  %s2359_s6 = sshll.u32 %s3143_s15, 12  ;;  %s3154_s18 = smov [#allocation2]  }
  0x18   : > { %v2792_v8 = vpack.c.bf16 %v653_v5, %v652_v2  ;;  %v654_v9 = vld [vmem:[%s4940_s1 + $0x290] sm:$0xff]  ;;  %v655_v10 = vld [vmem:[%s4940_s1 + $0x298] sm:$0xff]  ;;  %s212_s23 = scalar_select %p211_p11, %s3143_s15, 1  ;;  %v2748_v11 = vpack.c.bf16 %v623_v7, %v622_v6  ;;  %v656_v13 = vld [vmem:[%s4940_s1 + $0x2a0] sm:$0xff] }
  0x19   : > { %2746 = vmatpush1.bf16.msra.mxu0 %v2745_v4  ;;  %v2796_v12 = vpack.c.bf16 %v655_v10, %v654_v9  ;;  %v657_v14 = vld [vmem:[%s4940_s1 + $0x2a8] sm:$0xff]  ;;  %v624_v15 = vld [vmem:[%s4940_s1 + $0x1a0] sm:$0xff]  ;;  %v658_v19 = vld [vmem:[%s4940_s1 + $0x2b0] sm:$0xff]  ;;  %s4886_s10 = scalar_lea.hbm %s4942_s3, %s2359_s6  ;;  %s3077_s19 = sshll.u32 %s3154_s18, 4  ;;  %s3078_s19 = int_to_ptr.vmem [resolvable:$false] %s3077_s19 }
  0x1a   : > { %2793 = vmatprep.subr.bf16.mxu1 %v2792_v8  ;;  %2747 = vmatprep.subr.bf16.mxu0 %v4945_v3  ;;  %v625_v16 = vld [vmem:[%s4940_s1 + $0x1a8] sm:$0xff]  ;;  %s2984_s7 = smul.u32 432, %s212_s23  ;;  %v2800_v17 = vpack.c.bf16 %v657_v14, %v656_v13  ;;  %v659_v20 = vld [vmem:[%s4940_s1 + $0x2b8] sm:$0xff]  ;;  %v626_v21 = vld [vmem:[%s4940_s1 + $0x1b0] sm:$0xff]  ;;  %s3079_s23 = scalar_lea.vmem %s3078_s19, 8192 }
  0x1b   : > { %2795 = vmatpush3.bf16.msra.mxu1 %v2792_v8  ;;  %v2751_v18 = vpack.c.bf16 %v625_v16, %v624_v15  ;;  %v627_v22 = vld [vmem:[%s4940_s1 + $0x1b8] sm:$0xff]  ;;  %v2804_v23 = vpack.c.bf16 %v659_v20, %v658_v19  ;;  %v660_v26 = vld [vmem:[%s4940_s1 + $0x2c0] sm:$0xff]  ;;  %v661_v27 = vld [vmem:[%s4940_s1 + $0x2c8] sm:$0xff] }
  0x1c   : > { %2797 = vmatprep.subr.bf16.mxu1 %v2796_v12  ;;  %s3281_s21 = scalar_lea.vmem %s4939_s0, %s2984_s7  ;;  %v2754_v25 = vpack.c.bf16 %v627_v22, %v626_v21  ;;  %v628_v31 = vld [vmem:[%s4940_s1 + $0x1c0] sm:$0xff]  ;;  %v629_v32 = vld [vmem:[%s4940_s1 + $0x1c8] sm:$0xff]  ;;  %v2808_v35 = vpack.c.bf16 %v661_v27, %v660_v26  ;;  %v662_v39 = vld [vmem:[%s4940_s1 + $0x2d0] sm:$0xff] }
  0x1d   : > { %2749 = vmatpush1.bf16.msra.mxu0 %v2748_v11  ;;  %v3291_v24 = vld [vmem:[%s3281_s21 + $0x18] sm:$0xff]  ;;  %v3300_v28 = vld [vmem:[%s3281_s21 + $0x20] sm:$0xff]  ;;  %v2757_v38 = vpack.c.bf16 %v629_v32, %v628_v31  ;;  %v630_v41 = vld [vmem:[%s4940_s1 + $0x1d0] sm:$0xff] }
  0x1e   : > { %2750 = vmatprep.subr.bf16.mxu0 %v4945_v3  ;;  %v448_v29 = vrot.slane %v3291_v24, 2  ;;  %v335_v30 = vrot.slane %v3291_v24, 1  ;;  %v449_v33 = vrot.slane %v3300_v28, 2  ;;  %v336_v34 = vrot.slane %v3300_v28, 1  ;;  %v663_v40 = vld [vmem:[%s4940_s1 + $0x2d8] sm:$0xff]  ;;  %v664_v45 = vld [vmem:[%s4940_s1 + $0x2e0] sm:$0xff] }
  0x1f   : > { %2799 = vmatpush3.bf16.msra.mxu1 %v2796_v12  ;;  %v631_v42 = vld [vmem:[%s4940_s1 + $0x1d8] sm:$0xff]  ;;  %v2812_v43 = vpack.c.bf16 %v663_v40, %v662_v39  ;;  %v665_v46 = vld [vmem:[%s4940_s1 + $0x2e8] sm:$0xff]  ;;  %v632_v47 = vld [vmem:[%s4940_s1 + $0x1e0] sm:$0xff] }
  0x20   : > { %2801 = vmatprep.subr.bf16.mxu1 %v2800_v17  ;;  %v3316_v36 = vsel %vm442_vm0, %v448_v29, %v449_v33  ;;  %v3321_v37 = vsel %vm329_vm1, %v335_v30, %v336_v34  ;;  %v2760_v44 = vpack.c.bf16 %v631_v42, %v630_v41  ;;  %v633_v48 = vld [vmem:[%s4940_s1 + $0x1e8] sm:$0xff]  ;;  %v2816_v49 = vpack.c.bf16 %v665_v46, %v664_v45  ;;  %v666_v51 = vld [vmem:[%s4940_s1 + $0x2f0] sm:$0xff]  ;;  %v667_v52 = vld [vmem:[%s4940_s1 + $0x2f8] sm:$0xff] }
  0x21   : > { %2752 = vmatpush1.bf16.msra.mxu0 %v2751_v18  ;;  %5020 = vst [vmem:[#allocation5_spill] sm:$0xff] %v3316_v36  ;;  %2536 = vmatprep.mubr.f32.mxu1 %v3316_v36  ;;  %v2763_v50 = vpack.c.bf16 %v633_v48, %v632_v47  ;;  %v634_v53 = vld [vmem:[%s4940_s1 + $0x1f0] sm:$0xff]  ;;  %v635_v54 = vld [vmem:[%s4940_s1 + $0x1f8] sm:$0xff]  ;;  %v2820_v55 = vpack.c.bf16 %v667_v52, %v666_v51  ;;  %v3365_v56 = vld [vmem:[%s3281_s21 + $0x28] sm:$0x3] }
  0x22   : > { %2753 = vmatprep.subr.bf16.mxu0 %v4945_v3  ;;  %732 = vmatprep.mubr.f32.mxu0 %v3321_v37  ;;  %v2766_v57 = vpack.c.bf16 %v635_v54, %v634_v53  ;;  %v3368_v58 = vld [vmem:[%s3281_s21 + $0x30] sm:$0xff]  ;;  %v3371_v59 = vld [vmem:[%s3281_s21 + $0x38] sm:$0xff]  ;;  %v636_v60 = vld [vmem:[%s4940_s1 + $0x200] sm:$0xff]  ;;  %v451_v62 = vrot.slane %v3365_v56, 2 }
  0x23   : > { %2803 = vmatpush3.bf16.msra.mxu1 %v2800_v17  ;;  %v637_v61 = vld [vmem:[%s4940_s1 + $0x208] sm:$0xff]  ;;  %v555_v63 = vld [vmem:[%s4940_s1] sm:$0xff]  ;;  %v453_v1 = vrot.slane %v3368_v58, 2  ;;  %v454_v2 = vrot.slane %v3371_v59, 2  ;;  %v3396_v7 = vld [vmem:[%s3281_s21 + $0x50] sm:$0xff] }
  0x24   : > { %2805 = vmatprep.subr.bf16.mxu1 %v2804_v23  ;;  %v556_v0 = vld [vmem:[%s4940_s1 + $0x8] sm:$0xff]  ;;  %v3390_v4 = vld [vmem:[%s3281_s21 + $0x40] sm:$0x3]  ;;  %v2769_v5 = vpack.c.bf16 %v637_v61, %v636_v60  ;;  %v638_v8 = vld [vmem:[%s4940_s1 + $0x210] sm:$0xff]  ;;  %v3408_v10 = vsel %vm442_vm0, %v449_v33, %v451_v62  ;;  %v459_v17 = vrot.slane %v3396_v7, 2 }
  0x25   : > { %2755 = vmatpush1.bf16.msra.mxu0 %v2754_v25  ;;  %v3393_v6 = vld [vmem:[%s3281_s21 + $0x48] sm:$0xff]  ;;  %v639_v9 = vld [vmem:[%s4940_s1 + $0x218] sm:$0xff]  ;;  %5021 = vst [vmem:[#allocation6_spill] sm:$0xff] %v3408_v10  ;;  %v2825_v11 = vpack.c.bf16 %v556_v0, %v555_v63  ;;  %v456_v12 = vrot.slane %v3390_v4, 2  ;;  %v3413_v13 = vsel %vm442_vm0, %v453_v1, %v454_v2  ;;  %v557_v14 = vld [vmem:[%s4940_s1 + $0x10] sm:$0xff] }
  0x26   : > { %2756 = vmatprep.subr.bf16.mxu0 %v4945_v3  ;;  %5022 = vst [vmem:[#allocation7_spill] sm:$0xff] %v3413_v13  ;;  %v558_v15 = vld [vmem:[%s4940_s1 + $0x18] sm:$0xff]  ;;  %v458_v16 = vrot.slane %v3393_v6, 2  ;;  %v2772_v19 = vpack.c.bf16 %v639_v9, %v638_v8  ;;  %v3427_v20 = vld [vmem:[%s3281_s21 + $0x60] sm:$0xff]  ;;  %v3430_v21 = vld [vmem:[%s3281_s21 + $0x68] sm:$0xff] }
  0x27   : > { %2807 = vmatpush3.bf16.msra.mxu1 %v2804_v23  ;;  %v3424_v18 = vld [vmem:[%s3281_s21 + $0x58] sm:$0x3]  ;;  %v640_v22 = vld [vmem:[%s4940_s1 + $0x220] sm:$0xff]  ;;  %v641_v23 = vld [vmem:[%s4940_s1 + $0x228] sm:$0xff]  ;;  %v3442_v25 = vsel %vm442_vm0, %v454_v2, %v456_v12  ;;  %v2828_v26 = vpack.c.bf16 %v558_v15, %v557_v14  ;;  %v463_v32 = vrot.slane %v3427_v20, 2  ;;  %v464_v33 = vrot.slane %v3430_v21, 2 }
  0x28   : > { %2809 = vmatprep.subr.bf16.mxu1 %v2808_v35  ;;  %5023 = vst [vmem:[#allocation8_spill] sm:$0xff] %v3442_v25  ;;  %v461_v27 = vrot.slane %v3424_v18, 2  ;;  %v3447_v29 = vsel %vm442_vm0, %v458_v16, %v459_v17  ;;  %v559_v30 = vld [vmem:[%s4940_s1 + $0x20] sm:$0xff]  ;;  %v560_v31 = vld [vmem:[%s4940_s1 + $0x28] sm:$0xff]  ;;  %v3461_v39 = vld [vmem:[%s3281_s21 + $0x78] sm:$0xff] }
  0x29   : > { %2758 = vmatpush1.bf16.msra.mxu0 %v2757_v38  ;;  %5024 = vst [vmem:[#allocation9_spill] sm:$0xff] %v3447_v29  ;;  %v2775_v38 = vpack.c.bf16 %v641_v23, %v640_v22  ;;  %v3464_v40 = vld [vmem:[%s3281_s21 + $0x80] sm:$0xff]  ;;  %v642_v41 = vld [vmem:[%s4940_s1 + $0x230] sm:$0xff]  ;;  %v643_v42 = vld [vmem:[%s4940_s1 + $0x238] sm:$0xff]  ;;  %v3481_v46 = vsel %vm442_vm0, %v463_v32, %v464_v33 }
  0x2a   : > { %2759 = vmatprep.subr.bf16.mxu0 %v4945_v3  ;;  %5026 = vst [vmem:[#allocation11_spill] sm:$0xff] %v3481_v46  ;;  %v561_v47 = vld [vmem:[%s4940_s1 + $0x30] sm:$0xff]  ;;  %v562_v48 = vld [vmem:[%s4940_s1 + $0x38] sm:$0xff]  ;;  %v3492_v51 = vld [vmem:[%s3281_s21 + $0x88] sm:$0x3]  ;;  %v2778_v52 = vpack.c.bf16 %v643_v42, %v642_v41 }
  0x2b   : > { %2811 = vmatpush3.bf16.msra.mxu1 %v2808_v35  ;;  %v3458_v35 = vld [vmem:[%s3281_s21 + $0x70] sm:$0x3]  ;;  %v3498_v54 = vld [vmem:[%s3281_s21 + $0x98] sm:$0xff]  ;;  %v2834_v61 = vpack.c.bf16 %v562_v48, %v561_v47  ;;  %v471_v62 = vrot.slane %v3492_v51, 2  ;;  %v563_v0 = vld [vmem:[%s4940_s1 + $0x40] sm:$0xff] }
  0x2c   : > { %2813 = vmatprep.subr.bf16.mxu1 %v2812_v43  ;;  %v466_v45 = vrot.slane %v3458_v35, 2  ;;  %v3495_v53 = vld [vmem:[%s3281_s21 + $0x90] sm:$0xff]  ;;  %v564_v1 = vld [vmem:[%s4940_s1 + $0x48] sm:$0xff]  ;;  %v3526_v8 = vld [vmem:[%s3281_s21 + $0xa0] sm:$0x3] }
  0x2d   : > { %2761 = vmatpush1.bf16.msra.mxu0 %v2760_v44  ;;  %v2831_v44 = vpack.c.bf16 %v560_v31, %v559_v30  ;;  %v473_v2 = vrot.slane %v3495_v53, 2  ;;  %v3532_v12 = vld [vmem:[%s3281_s21 + $0xb0] sm:$0xff]  ;;  %v647_v15 = vld [vmem:[%s4940_s1 + $0x258] sm:$0xff]  ;;  %v648_v41 = vld [vmem:[%s4940_s1 + $0x260] sm:$0xff] }
  0x2e   : > { %2762 = vmatprep.subr.bf16.mxu0 %v4945_v3  ;;  %v3510_v60 = vsel %vm442_vm0, %v464_v33, %v466_v45  ;;  %v646_v14 = vld [vmem:[%s4940_s1 + $0x250] sm:$0xff]  ;;  %v479_v30 = vrot.slane %v3532_v12, 2  ;;  %v3560_v31 = vld [vmem:[%s3281_s21 + $0xb8] sm:$0x3]  ;;  %v3563_v33 = vld [vmem:[%s3281_s21 + $0xc0] sm:$0xff] }
  0x2f   : > { %2815 = vmatpush3.bf16.msra.mxu1 %v2812_v43  ;;  %v3476_v43 = vsel %vm442_vm0, %v459_v17, %v461_v27  ;;  %5027 = vst [vmem:[#allocation12_spill] sm:$0xff] %v3510_v60  ;;  %v2837_v17 = vpack.c.bf16 %v564_v1, %v563_v0  ;;  %v565_v23 = vld [vmem:[%s4940_s1 + $0x50] sm:$0xff]  ;;  %v2784_v32 = vpack.c.bf16 %v647_v15, %v646_v14  ;;  %v649_v42 = vld [vmem:[%s4940_s1 + $0x268] sm:$0xff]  ;;  %v481_v47 = vrot.slane %v3560_v31, 2  ;;  %v3600_v0 = vld [vmem:[%s3281_s21 + $0xe0] sm:$0xff] }
  0x30   : > { %2817 = vmatprep.subr.bf16.mxu1 %v2816_v49  ;;  %5025 = vst [vmem:[#allocation10_spill] sm:$0xff] %v3476_v43  ;;  %v650_v1 = vld [vmem:[%s4940_s1 + $0x270] sm:$0xff]  ;;  %v587_v15 = vld [vmem:[%s4940_s1 + $0x100] sm:$0xff] }
  0x31   : > { %2764 = vmatpush1.bf16.msra.mxu0 %v2763_v50  ;;  %v469_v50 = vrot.slane %v3464_v40, 2 }
  0x32   : > { %2765 = vmatprep.subr.bf16.mxu0 %v4945_v3 }
  0x33   : > { %2819 = vmatpush3.bf16.msra.mxu1 %v2816_v49  ;;  %v468_v49 = vrot.slane %v3461_v39, 2  ;;  %v3544_v16 = vsel %vm442_vm0, %v469_v50, %v471_v62  ;;  %v3597_v62 = vld [vmem:[%s3281_s21 + $0xd8] sm:$0xff] }
  0x34   : > { %2821 = vmatprep.subr.bf16.mxu1 %v2820_v55  ;;  %5029 = vst [vmem:[#allocation14_spill] sm:$0xff] %v3544_v16 }
  0x35   : > { %2767 = vmatpush1.bf16.msra.mxu0 %v2766_v57  ;;  %v645_v57 = vld [vmem:[%s4940_s1 + $0x248] sm:$0xff]  ;;  %v3515_v63 = vsel %vm442_vm0, %v468_v49, %v469_v50  ;;  %v567_v49 = vld [vmem:[%s4940_s1 + $0x60] sm:$0xff] }
  0x36   : > { %2768 = vmatprep.subr.bf16.mxu0 %v4945_v3  ;;  %5028 = vst [vmem:[#allocation13_spill] sm:$0xff] %v3515_v63  ;;  %v568_v50 = vld [vmem:[%s4940_s1 + $0x68] sm:$0xff] }
  0x37   : > { %2823 = vmatpush3.bf16.msra.mxu1 %v2820_v55  ;;  %v644_v55 = vld [vmem:[%s4940_s1 + $0x240] sm:$0xff] }
  0x38   : > { %2824 = vmatprep.subr.bf16.mxu1 %v4945_v3  ;;  %v2781_v9 = vpack.c.bf16 %v645_v57, %v644_v55  ;;  %v3594_v57 = vld [vmem:[%s3281_s21 + $0xd0] sm:$0x3] }
  0x39   : > { %2770 = vmatpush1.bf16.msra.mxu0 %v2769_v5  ;;  %v474_v5 = vrot.slane %v3498_v54, 2  ;;  %v486_v14 = vrot.slane %v3594_v57, 2 }
  0x3a   : > { %2537 = vmatmul.mubr.f32.vlgmr.msra.gmra.mrb[0].mxu1 %v3408_v10  ;;  %2771 = vmatprep.subr.bf16.mxu0 %v4945_v3 }
  0x3b   : > { %2826 = vmatpush1.bf16.msra.mxu1 %v2825_v11  ;;  %2539 = vmatprep.mubr.f32.mxu1 %v3413_v13  ;;  %v3529_v11 = vld [vmem:[%s3281_s21 + $0xa8] sm:$0xff]  ;;  %v3549_v22 = vsel %vm442_vm0, %v473_v2, %v474_v5  ;;  %v651_v2 = vld [vmem:[%s4940_s1 + $0x278] sm:$0xff]  ;;  %v343_v13 = vrot.slane %v3390_v4, 1 }
  0x3c   : > { %2827 = vmatprep.subr.bf16.mxu1 %v4945_v3  ;;  %5030 = vst [vmem:[#allocation15_spill] sm:$0xff] %v3549_v22  ;;  %v478_v27 = vrot.slane %v3529_v11, 2  ;;  %v594_v4 = vld [vmem:[%s4940_s1 + $0x138] sm:$0xff] }
  0x3d   : > { %2773 = vmatpush1.bf16.msra.mxu0 %v2772_v19  ;;  %v476_v19 = vrot.slane %v3526_v8, 2 }
  0x3e   : > { %2540 = vmatmul.mubr.f32.gmra.mrb[2].mxu1 %v3442_v25  ;;  %2774 = vmatprep.subr.bf16.mxu0 %v4945_v3  ;;  %v3583_v48 = vsel %vm442_vm0, %v478_v27, %v479_v30  ;;  %v488_v27 = vrot.slane %v3597_v62, 2 }
  0x3f   : > { %2829 = vmatpush1.bf16.msra.mxu1 %v2828_v26  ;;  %2542 = vmatprep.mubr.f32.mxu1 %v3447_v29  ;;  %v566_v26 = vld [vmem:[%s4940_s1 + $0x58] sm:$0xff]  ;;  %5032 = vst [vmem:[#allocation17_spill] sm:$0xff] %v3583_v48 }
  0x40   : > { %2830 = vmatprep.subr.bf16.mxu1 %v4945_v3  ;;  %v2840_v45 = vpack.c.bf16 %v566_v26, %v565_v23  ;;  %v569_v23 = vld [vmem:[%s4940_s1 + $0x70] sm:$0xff]  ;;  %v570_v26 = vld [vmem:[%s4940_s1 + $0x78] sm:$0xff] }
  0x41   : > { %2776 = vmatpush1.bf16.msra.mxu0 %v2775_v38  ;;  %v3566_v38 = vld [vmem:[%s3281_s21 + $0xc8] sm:$0xff] }
  0x42   : > { %2543 = vmatmul.mubr.f32.gmra.mrb[4].mxu1 %v3476_v43  ;;  %2777 = vmatprep.subr.bf16.mxu0 %v4945_v3  ;;  %v484_v55 = vrot.slane %v3566_v38, 2 }
  0x43   : > { %2832 = vmatpush1.bf16.msra.mxu1 %v2831_v44  ;;  %2545 = vmatprep.mubr.f32.mxu1 %v3481_v46  ;;  %v3578_v44 = vsel %vm442_vm0, %v474_v5, %v476_v19  ;;  %v3612_v5 = vsel %vm442_vm0, %v479_v30, %v481_v47  ;;  %v489_v30 = vrot.slane %v3600_v0, 2  ;;  %v3641_v47 = vld [vmem:[%s3281_s21 + $0xf8] sm:$0xff]  ;;  %v3726_v46 = vld [vmem:[%s3281_s21 + $0x120] sm:$0xff] }
  0x44   : > { %2833 = vmatprep.subr.bf16.mxu1 %v4945_v3  ;;  %5031 = vst [vmem:[#allocation16_spill] sm:$0xff] %v3578_v44  ;;  %5033 = vst [vmem:[#allocation18_spill] sm:$0xff] %v3612_v5 }
  0x45   : > { %2779 = vmatpush1.bf16.msra.mxu0 %v2778_v52  ;;  %v483_v52 = vrot.slane %v3563_v33, 2  ;;  %5040 = vst [vmem:[#allocation24_spill] sm:$0xff] %v3726_v46 }
  0x46   : > { %2546 = vmatmul.mubr.f32.gmra.mrb[6].mxu1 %v3510_v60  ;;  %2780 = vmatprep.subr.bf16.mxu0 %v4945_v3  ;;  %v3722_v60 = vld [vmem:[%s3281_s21 + $0x118] sm:$0x3] }
  0x47   : > { %2835 = vmatpush1.bf16.msra.mxu1 %v2834_v61  ;;  %2548 = vmatprep.mubr.f32.mxu1 %v3515_v63  ;;  %v2787_v61 = vpack.c.bf16 %v649_v42, %v648_v41  ;;  %v3623_v19 = vsel %vm442_vm0, %v483_v52, %v484_v55  ;;  %v2790_v41 = vpack.c.bf16 %v651_v2, %v650_v1  ;;  %v338_v42 = vrot.slane %v3365_v56, 1  ;;  %v572_v1 = vld [vmem:[%s4940_s1 + $0x88] sm:$0xff]  ;;  %v589_v2 = vld [vmem:[%s4940_s1 + $0x110] sm:$0xff]  ;;  %v591_v63 = vld [vmem:[%s4940_s1 + $0x120] sm:$0xff] }
  0x48   : > { %2836 = vmatprep.subr.bf16.mxu1 %v4945_v3  ;;  %5034 = vst [vmem:[#allocation19_spill] sm:$0xff] %v3623_v19  ;;  %v3650_v56 = vsel %vm442_vm0, %v484_v55, %v486_v14  ;;  %v2846_v52 = vpack.c.bf16 %v570_v26, %v569_v23  ;;  %v3664_v55 = vsel %vm442_vm0, %v488_v27, %v489_v30  ;;  %v3672_v23 = vld [vmem:[%s3281_s21 + $0x10] sm:$0x3]  ;;  %v3686_v27 = vld [vmem:[%s3281_s21] sm:$0xff] }
  0x49   : > { %2782 = vmatpush1.bf16.msra.mxu0 %v2781_v9  ;;  %v2843_v9 = vpack.c.bf16 %v568_v50, %v567_v49  ;;  %v571_v49 = vld [vmem:[%s4940_s1 + $0x80] sm:$0xff]  ;;  %5035 = vst [vmem:[#allocation20_spill] sm:$0xff] %v3650_v56  ;;  %5036 = vst [vmem:[#allocation21_spill] sm:$0xff] %v3664_v55  ;;  %v3677_v26 = vsel %vm329_vm1, %v336_v34, %v338_v42  ;;  %v443_v34 = vrot.slane %v3686_v27, 2 }
  0x4a   : > { %2549 = vmatmul.mubr.f32.gmra.mrb[8].mxu1 %v3544_v16  ;;  %2783 = vmatprep.subr.bf16.mxu0 %v4945_v3 }
  0x4b   : > { %2838 = vmatpush1.bf16.msra.mxu1 %v2837_v17  ;;  %2551 = vmatprep.mubr.f32.mxu1 %v3549_v22  ;;  %v588_v17 = vld [vmem:[%s4940_s1 + $0x108] sm:$0xff] }
  0x4c   : > { %2839 = vmatprep.subr.bf16.mxu1 %v4945_v3  ;;  %v2872_v50 = vpack.c.bf16 %v588_v17, %v587_v15  ;;  %v494_v15 = vrot.slane %v3641_v47, 2  ;;  %v3669_v17 = vld [vmem:[%s3281_s21 + $0x100] sm:$0x3] }
  0x4d   : > { %2785 = vmatpush1.bf16.msra.mxu0 %v2784_v32  ;;  %v3634_v32 = vld [vmem:[%s3281_s21 + $0xe8] sm:$0x3]  ;;  %v496_v16 = vrot.slane %v3669_v17, 2 }
  0x4e   : > { %2552 = vmatmul.mubr.f32.gmra.mrb[10].mxu1 %v3578_v44  ;;  %2786 = vmatprep.subr.bf16.mxu0 %v4945_v3  ;;  %v341_v44 = vrot.slane %v3371_v59, 1 }
  0x4f   : > { %2841 = vmatpush1.bf16.msra.mxu1 %v2840_v45  ;;  %2554 = vmatprep.mubr.f32.mxu1 %v3583_v48  ;;  %v3638_v45 = vld [vmem:[%s3281_s21 + $0xf0] sm:$0xff]  ;;  %v340_v48 = vrot.slane %v3368_v58, 1 }
  0x50   : > { %2842 = vmatprep.subr.bf16.mxu1 %v4945_v3  ;;  %v493_v14 = vrot.slane %v3638_v45, 2 }
  0x51   : > { %2788 = vmatpush1.bf16.msra.mxu0 %v2787_v61  ;;  %v491_v61 = vrot.slane %v3634_v32, 2  ;;  %v3739_v25 = vsel %vm329_vm1, %v340_v48, %v341_v44  ;;  %v593_v48 = vld [vmem:[%s4940_s1 + $0x130] sm:$0xff] }
  0x52   : > { %2555 = vmatmul.mubr.f32.gmra.mrb[12].mxu1 %v3612_v5  ;;  %2789 = vmatprep.subr.bf16.mxu0 %v4945_v3  ;;  %v446_v5 = vrot.slane %v3672_v23, 2  ;;  %v2884_v36 = vpack.c.bf16 %v594_v4, %v593_v48 }
  0x53   : > { %2844 = vmatpush1.bf16.msra.mxu1 %v2843_v9  ;;  %2557 = vmatprep.mubr.f32.mxu1 %v3623_v19  ;;  %v590_v9 = vld [vmem:[%s4940_s1 + $0x118] sm:$0xff]  ;;  %v3680_v19 = vld [vmem:[%s3281_s21 + $0x108] sm:$0xff]  ;;  %v3698_v42 = vsel %vm442_vm0, %v489_v30, %v491_v61  ;;  %v3711_v30 = vsel %vm442_vm0, %v493_v14, %v494_v15 }
  0x54   : > { %2845 = vmatprep.subr.bf16.mxu1 %v4945_v3  ;;  %v3683_v3 = vld [vmem:[%s3281_s21 + $0x110] sm:$0xff]  ;;  %v2876_v22 = vpack.c.bf16 %v590_v9, %v589_v2  ;;  %5037 = vst [vmem:[#allocation22_spill] sm:$0xff] %v3698_v42  ;;  %v592_v2 = vld [vmem:[%s4940_s1 + $0x128] sm:$0xff]  ;;  %v5038_v9 = vmov 0.0|0.0   ;;  %5039 = vst [vmem:[#allocation23_spill] sm:$0xff] %v3711_v30 }
  0x55   : > { %2791 = vmatpush1.bf16.msra.mxu0 %v2790_v41  ;;  %v3693_v41 = vld [vmem:[%s3281_s21 + $0x8] sm:$0xff]  ;;  %v574_v61 = vld [vmem:[%s4940_s1 + $0x98] sm:$0xff]  ;;  %v2880_v10 = vpack.c.bf16 %v592_v2, %v591_v63 }
  0x56   : > { %2558 = vmatmul.mubr.f32.gmra.mrb[14].mxu1 %v3650_v56  ;;  %2873 = vmatprep.subr.bf16.mxu0 %v2872_v50  ;;  %v2849_v56 = vpack.c.bf16 %v572_v1, %v571_v49  ;;  %v573_v49 = vld [vmem:[%s4940_s1 + $0x90] sm:$0xff]  ;;  %v498_v1 = vrot.slane %v3680_v19, 2  ;;  %v3729_v14 = vld [vmem:[%s3281_s21 + $0x128] sm:$0xff] }
  0x57   : > { %2847 = vmatpush1.bf16.msra.mxu1 %v2846_v52  ;;  %2560 = vmatprep.mubr.f32.mxu1 %v3664_v55  ;;  %v444_v52 = vrot.slane %v3693_v41, 2  ;;  %v499_v55 = vrot.slane %v3683_v3, 2  ;;  %5041 = vst [vmem:[#allocation25_spill] sm:$0xff] %v3729_v14  ;;  %v504_v2 = vrot.slane %v3729_v14, 2 }
  0x58   : > { %733 = vmatmul.mubr.f32.vlgmr.msra.gmra.mrb[0].mxu0 %v3291_v24  ;;  %2848 = vmatprep.subr.bf16.mxu1 %v5038_v9 }
  0x59   : > { %737 = vmatprep.mubr.f32.mxu0 %v3677_v26  ;;  %2875 = vmatpush3.bf16.msra.mxu0 %v2872_v50  ;;  %v3732_v43 = vsel %vm442_vm0, %v443_v34, %v444_v52  ;;  %v3735_v29 = vsel %vm442_vm0, %v444_v52, %v446_v5  ;;  %v3744_v50 = vsel %vm442_vm0, %v494_v15, %v496_v16  ;;  %v501_v34 = vrot.slane %v3722_v60, 2  ;;  %v575_v16 = vld [vmem:[%s4940_s1 + $0xa0] sm:$0xff]  ;;  %v3767_v52 = vld [vmem:[%s3281_s21 + $0x130] sm:$0x3] }
  0x5a   : > { %5042 = vst [vmem:[#allocation26_spill] sm:$0xff] %v3732_v43  ;;  %5043 = vst [vmem:[#allocation27_spill] sm:$0xff] %v3735_v29  ;;  %2561 = vmatmul.mubr.f32.gmra.mrb[16].mxu1 %v3698_v42  ;;  %2877 = vmatprep.subr.bf16.mxu0 %v2876_v22  ;;  %v2852_v5 = vpack.c.bf16 %v574_v61, %v573_v49  ;;  %v3756_v63 = vsel %vm442_vm0, %v498_v1, %v499_v55  ;;  %v503_v15 = vrot.slane %v3726_v46, 2  ;;  %v3771_v49 = vld [vmem:[%s3281_s21 + $0x138] sm:$0xff]  ;;  %v3774_v61 = vld [vmem:[%s3281_s21 + $0x140] sm:$0xff] }
  0x5b   : > { %2850 = vmatpush1.bf16.msra.mxu1 %v2849_v56  ;;  %2563 = vmatprep.mubr.f32.mxu1 %v3711_v30  ;;  %5044 = vst [vmem:[#allocation28_spill] sm:$0xff] %v3744_v50  ;;  %5045 = vst [vmem:[#allocation29_spill] sm:$0xff] %v3756_v63  ;;  %v576_v56 = vld [vmem:[%s4940_s1 + $0xa8] sm:$0xff]  ;;  %v3778_v1 = vsel %vm329_vm1, %v341_v44, %v343_v13  ;;  %v345_v30 = vrot.slane %v3393_v6, 1  ;;  %v346_v42 = vrot.slane %v3396_v7, 1  ;;  %v595_v13 = vld [vmem:[%s4940_s1 + $0x140] sm:$0xff] }
  0x5c   : > { %738 = vmatmul.mubr.f32.gmra.mrb[2].mxu0 %v3300_v28  ;;  %2851 = vmatprep.subr.bf16.mxu1 %v5038_v9  ;;  %5046 = vst [vmem:[#allocation30_spill] sm:$0xff] %v3767_v52  ;;  %5047 = vst [vmem:[#allocation31_spill] sm:$0xff] %v3771_v49  ;;  %v3784_v29 = vsel %vm442_vm0, %v499_v55, %v501_v34  ;;  %v596_v44 = vld [vmem:[%s4940_s1 + $0x148] sm:$0xff]  ;;  %v577_v55 = vld [vmem:[%s4940_s1 + $0xb0] sm:$0xff]  ;;  %v508_v48 = vrot.slane %v3771_v49, 2  ;;  %v509_v4 = vrot.slane %v3774_v61, 2 }
  0x5d   : > { %742 = vmatprep.mubr.f32.mxu0 %v3739_v25  ;;  %5048 = vst [vmem:[#allocation32_spill] sm:$0xff] %v3774_v61  ;;  %2879 = vmatpush3.bf16.msra.mxu0 %v2876_v22  ;;  %5049 = vst [vmem:[#allocation33_spill] sm:$0xff] %v3784_v29  ;;  %v2855_v22 = vpack.c.bf16 %v576_v56, %v575_v16  ;;  %v578_v34 = vld [vmem:[%s4940_s1 + $0xb8] sm:$0xff]  ;;  %v3807_v16 = vld [vmem:[%s3281_s21 + $0x148] sm:$0x3]  ;;  %v348_v43 = vrot.slane %v3424_v18, 1  ;;  %v2888_v49 = vpack.c.bf16 %v596_v44, %v595_v13 }
  0x5e   : > { %2564 = vmatmul.mubr.f32.gmra.mrb[18].mxu1 %v3744_v50  ;;  %2881 = vmatprep.subr.bf16.mxu0 %v2880_v10  ;;  %v506_v50 = vrot.slane %v3767_v52, 2  ;;  %5051 = vst [vmem:[#allocation35_spill] sm:$0xff] %v3807_v16  ;;  %v3811_v56 = vld [vmem:[%s3281_s21 + $0x150] sm:$0xff]  ;;  %v2858_v52 = vpack.c.bf16 %v578_v34, %v577_v55  ;;  %v598_v18 = vld [vmem:[%s4940_s1 + $0x158] sm:$0xff]  ;;  %v3846_v55 = vld [vmem:[%s3281_s21 + $0x160] sm:$0x3] }
  0x5f   : > { %2853 = vmatpush1.bf16.msra.mxu1 %v2852_v5  ;;  %2566 = vmatprep.mubr.f32.mxu1 %v3756_v63  ;;  %v3796_v5 = vsel %vm442_vm0, %v503_v15, %v504_v2  ;;  %5052 = vst [vmem:[#allocation36_spill] sm:$0xff] %v3811_v56  ;;  %v3814_v15 = vld [vmem:[%s3281_s21 + $0x158] sm:$0xff]  ;;  %v3818_v63 = vsel %vm329_vm1, %v345_v30, %v346_v42  ;;  %v597_v30 = vld [vmem:[%s4940_s1 + $0x150] sm:$0xff]  ;;  %v513_v13 = vrot.slane %v3811_v56, 2  ;;  %5056 = vst [vmem:[#allocation40_spill] sm:$0xff] %v3846_v55 }
  0x60   : > { %743 = vmatmul.mubr.f32.gmra.mrb[4].mxu0 %v3368_v58  ;;  %2854 = vmatprep.subr.bf16.mxu1 %v5038_v9  ;;  %5050 = vst [vmem:[#allocation34_spill] sm:$0xff] %v3796_v5  ;;  %5053 = vst [vmem:[#allocation37_spill] sm:$0xff] %v3814_v15  ;;  %v3823_v61 = vsel %vm442_vm0, %v504_v2, %v506_v50  ;;  %v579_v50 = vld [vmem:[%s4940_s1 + $0xc0] sm:$0xff]  ;;  %v580_v2 = vld [vmem:[%s4940_s1 + $0xc8] sm:$0xff]  ;;  %v514_v44 = vrot.slane %v3814_v15, 2  ;;  %v351_v56 = vrot.slane %v3430_v21, 1 }
  0x61   : > { %747 = vmatprep.mubr.f32.mxu0 %v3778_v1  ;;  %2883 = vmatpush3.bf16.msra.mxu0 %v2880_v10  ;;  %5054 = vst [vmem:[#allocation38_spill] sm:$0xff] %v3823_v61  ;;  %v511_v10 = vrot.slane %v3807_v16, 2  ;;  %v3850_v34 = vld [vmem:[%s3281_s21 + $0x168] sm:$0xff]  ;;  %v2892_v15 = vpack.c.bf16 %v598_v18, %v597_v30 }
  0x62   : > { %2567 = vmatmul.mubr.f32.gmra.mrb[20].mxu1 %v3784_v29  ;;  %2885 = vmatprep.subr.bf16.mxu0 %v2884_v36  ;;  %5057 = vst [vmem:[#allocation41_spill] sm:$0xff] %v3850_v34  ;;  %v350_v29 = vrot.slane %v3427_v20, 1  ;;  %v518_v30 = vrot.slane %v3850_v34, 2 }
  0x63   : > { %2856 = vmatpush1.bf16.msra.mxu1 %v2855_v22  ;;  %2569 = vmatprep.mubr.f32.mxu1 %v3796_v5  ;;  %v3835_v22 = vsel %vm442_vm0, %v508_v48, %v509_v4  ;;  %v3853_v48 = vld [vmem:[%s3281_s21 + $0x170] sm:$0xff]  ;;  %v3857_v5 = vsel %vm329_vm1, %v346_v42, %v348_v43  ;;  %v3863_v16 = vsel %vm442_vm0, %v509_v4, %v511_v10  ;;  %v599_v43 = vld [vmem:[%s4940_s1 + $0x160] sm:$0xff]  ;;  %v600_v42 = vld [vmem:[%s4940_s1 + $0x168] sm:$0xff] }
  0x64   : > { %748 = vmatmul.mubr.f32.gmra.mrb[6].mxu0 %v3371_v59  ;;  %2857 = vmatprep.subr.bf16.mxu1 %v5038_v9  ;;  %5055 = vst [vmem:[#allocation39_spill] sm:$0xff] %v3835_v22  ;;  %5058 = vst [vmem:[#allocation42_spill] sm:$0xff] %v3853_v48  ;;  %v581_v4 = vld [vmem:[%s4940_s1 + $0xd0] sm:$0xff]  ;;  %v582_v10 = vld [vmem:[%s4940_s1 + $0xd8] sm:$0xff]  ;;  %v519_v18 = vrot.slane %v3853_v48, 2  ;;  %v2896_v34 = vpack.c.bf16 %v600_v42, %v599_v43 }
  0x65   : > { %752 = vmatprep.mubr.f32.mxu0 %v3818_v63  ;;  %2887 = vmatpush3.bf16.msra.mxu0 %v2884_v36  ;;  %5059 = vst [vmem:[#allocation43_spill] sm:$0xff] %v3863_v16  ;;  %v2861_v36 = vpack.c.bf16 %v580_v2, %v579_v50  ;;  %v3886_v50 = vld [vmem:[%s3281_s21 + $0x178] sm:$0x3]  ;;  %v3890_v2 = vld [vmem:[%s3281_s21 + $0x180] sm:$0xff]  ;;  %v2864_v14 = vpack.c.bf16 %v582_v10, %v581_v4  ;;  %v3925_v42 = vld [vmem:[%s3281_s21 + $0x190] sm:$0x3] }
  0x66   : > { %2570 = vmatmul.mubr.f32.gmra.mrb[22].mxu1 %v3823_v61  ;;  %2889 = vmatprep.subr.bf16.mxu0 %v2888_v49  ;;  %v516_v61 = vrot.slane %v3846_v55, 2  ;;  %v353_v55 = vrot.slane %v3458_v35, 1  ;;  %v521_v46 = vrot.slane %v3886_v50, 2  ;;  %v3914_v35 = vsel %vm442_vm0, %v518_v30, %v519_v18 }
  0x67   : > { %2859 = vmatpush1.bf16.msra.mxu1 %v2858_v52  ;;  %2572 = vmatprep.mubr.f32.mxu1 %v3835_v22  ;;  %v3875_v52 = vsel %vm442_vm0, %v513_v13, %v514_v44  ;;  %v3893_v13 = vld [vmem:[%s3281_s21 + $0x188] sm:$0xff]  ;;  %v3897_v22 = vsel %vm329_vm1, %v350_v29, %v351_v56  ;;  %v602_v29 = vld [vmem:[%s4940_s1 + $0x178] sm:$0xff]  ;;  %v355_v10 = vrot.slane %v3461_v39, 1  ;;  %v356_v30 = vrot.slane %v3464_v40, 1 }
  0x68   : > { %753 = vmatmul.mubr.f32.gmra.mrb[8].mxu0 %v3393_v6  ;;  %2860 = vmatprep.subr.bf16.mxu1 %v5038_v9  ;;  %5060 = vst [vmem:[#allocation44_spill] sm:$0xff] %v3875_v52  ;;  %5061 = vst [vmem:[#allocation45_spill] sm:$0xff] %v3893_v13  ;;  %v3902_v48 = vsel %vm442_vm0, %v514_v44, %v516_v61  ;;  %v583_v61 = vld [vmem:[%s4940_s1 + $0xe0] sm:$0xff]  ;;  %v584_v44 = vld [vmem:[%s4940_s1 + $0xe8] sm:$0xff]  ;;  %v614_v43 = vrot.slane %v3893_v13, 2  ;;  %v3930_v4 = vsel %vm329_vm1, %v351_v56, %v353_v55 }
  0x69   : > { %757 = vmatprep.mubr.f32.mxu0 %v3857_v5  ;;  %2891 = vmatpush3.bf16.msra.mxu0 %v2888_v49  ;;  %v601_v49 = vld [vmem:[%s4940_s1 + $0x170] sm:$0xff]  ;;  %v2867_v13 = vpack.c.bf16 %v584_v44, %v583_v61 }
  0x6a   : > { %2573 = vmatmul.mubr.f32.gmra.mrb[24].mxu1 %v3863_v16  ;;  %2893 = vmatprep.subr.bf16.mxu0 %v2892_v15  ;;  %v3936_v16 = vsel %vm442_vm0, %v519_v18, %v521_v46  ;;  %v585_v55 = vld [vmem:[%s4940_s1 + $0xf0] sm:$0xff]  ;;  %v330_v46 = vrot.slane %v3686_v27, 1  ;;  %v331_v18 = vrot.slane %v3693_v41, 1 }
  0x6b   : > { %2862 = vmatpush1.bf16.msra.mxu1 %v2861_v36  ;;  %2575 = vmatprep.mubr.f32.mxu1 %v3875_v52  ;;  %v613_v36 = vrot.slane %v3890_v2, 2  ;;  %v2900_v52 = vpack.c.bf16 %v602_v29, %v601_v49  ;;  %v3955_v49 = vsel %vm329_vm1, %v355_v10, %v356_v30  ;;  %v358_v29 = vrot.slane %v3492_v51, 1  ;;  %v1586_v51 = vld [vmem:[%s4940_s1 + $0x308] sm:$0xff] }
  0x6c   : > { %758 = vmatmul.mubr.f32.gmra.mrb[10].mxu0 %v3396_v7  ;;  %2863 = vmatprep.subr.bf16.mxu1 %v5038_v9  ;;  %v360_v10 = vrot.slane %v3495_v53, 1 }
  0x6d   : > { %762 = vmatprep.mubr.f32.mxu0 %v3897_v22  ;;  %2895 = vmatpush3.bf16.msra.mxu0 %v2892_v15  ;;  %v616_v15 = vrot.slane %v3925_v42, 2  ;;  %v3942_v56 = vsel %vm442_vm0, %v613_v36, %v614_v43  ;;  %v1585_v36 = vld [vmem:[%s4940_s1 + $0x300] sm:$0xff] }
  0x6e   : > { %2576 = vmatmul.mubr.f32.gmra.mrb[26].mxu1 %v3902_v48  ;;  %2897 = vmatprep.subr.bf16.mxu0 %v2896_v34 }
  0x6f   : > { %2865 = vmatpush1.bf16.msra.mxu1 %v2864_v14  ;;  %2578 = vmatprep.mubr.f32.mxu1 %v3914_v35  ;;  %v586_v14 = vld [vmem:[%s4940_s1 + $0xf8] sm:$0xff]  ;;  %v3960_v61 = vsel %vm442_vm0, %v614_v43, %v616_v15  ;;  %v3975_v43 = vsel %vm329_vm1, %v356_v30, %v358_v29  ;;  %v361_v15 = vrot.slane %v3498_v54, 1 }
  0x70   : > { %763 = vmatmul.mubr.f32.gmra.mrb[12].mxu0 %v3427_v20  ;;  %2866 = vmatprep.subr.bf16.mxu1 %v5038_v9  ;;  %v2870_v44 = vpack.c.bf16 %v586_v14, %v585_v55  ;;  %v1617_v55 = vld [vmem:[%s4940_s1 + $0x400] sm:$0xff]  ;;  %v1588_v29 = vld [vmem:[%s4940_s1 + $0x318] sm:$0xff] }
  0x71   : > { %767 = vmatprep.mubr.f32.mxu0 %v3930_v4  ;;  %2899 = vmatpush3.bf16.msra.mxu0 %v2896_v34  ;;  %v332_v34 = vsel %vm329_vm1, %v330_v46, %v331_v18  ;;  %v1587_v46 = vld [vmem:[%s4940_s1 + $0x310] sm:$0xff] }
  0x72   : > { %2579 = vmatmul.mubr.f32.gmra.mrb[28].mxu1 %v3936_v16  ;;  %2901 = vmatprep.subr.bf16.mxu0 %v2900_v52 }
  0x73   : > { %2868 = vmatpush1.bf16.msra.mxu1 %v2867_v13  ;;  %2581 = vmatprep.mubr.f32.mxu1 %v3942_v56  ;;  %v333_v13 = vrot.slane %v3672_v23, 1  ;;  %v1618_v23 = vld [vmem:[%s4940_s1 + $0x408] sm:$0xff] }
  0x74   : > { %768 = vmatmul.mubr.f32.gmra.mrb[14].mxu0 %v3430_v21  ;;  %2869 = vmatprep.subr.bf16.mxu1 %v5038_v9  ;;  %v3985_v14 = vpack.c.bf16 %v1618_v23, %v1617_v55  ;;  %v1591_v55 = vld [vmem:[%s4940_s1 + $0x330] sm:$0xff] }
  0x75   : > { %772 = vmatprep.mubr.f32.mxu0 %v3955_v49  ;;  %2903 = vmatpush3.bf16.msra.mxu0 %v2900_v52  ;;  %v2905_v52 = vpack.c.bf16 %v1586_v51, %v1585_v36  ;;  %v334_v30 = vsel %vm329_vm1, %v331_v18, %v333_v13  ;;  %v2908_v18 = vpack.c.bf16 %v1588_v29, %v1587_v46  ;;  %v1589_v36 = vld [vmem:[%s4940_s1 + $0x320] sm:$0xff]  ;;  %v365_v51 = vrot.slane %v3529_v11, 1  ;;  %v1595_v29 = vld [vmem:[%s4940_s1 + $0x350] sm:$0xff] }
  0x76   : > { %2582 = vmatmul.mubr.f32.gmra.mrb[30].mxu1 %v3960_v61  ;;  %2953 = vmatprep.subr.bf16.mxu0 %v3985_v14  ;;  %v366_v13 = vrot.slane %v3532_v12, 1 }
  0x77   : > { %2871 = vmatpush1.bf16.msra.mxu1 %v2870_v44  ;;  %1182 = vmatprep.mubr.f32.mxu1 %v332_v34  ;;  %v4000_v44 = vsel %vm329_vm1, %v360_v10, %v361_v15  ;;  %v363_v34 = vrot.slane %v3526_v8, 1 }
  0x78   : > { %773 = vmatmul.mubr.f32.gmra.mrb[16].mxu0 %v3461_v39  ;;  %2904 = vmatprep.subr.bf16.mxu1 %v5038_v9 }
  0x79   : > { %777 = vmatprep.mubr.f32.mxu0 %v3975_v43  ;;  %v4014_v8 = vsel %vm329_vm1, %v361_v15, %v363_v34  ;;  %v368_v15 = vrot.slane %v3560_v31, 1 }
  0x7a   : > { %1183 = vmatmul.mubr.f32.vlgmr.msra.gmra.mrb[32].mxu1 %v3686_v27  ;;  %v1590_v27 = vld [vmem:[%s4940_s1 + $0x328] sm:$0xff] }
  0x7b   : > { %2906 = vmatpush1.bf16.msra.mxu1 %v2905_v52  ;;  %1187 = vmatprep.mubr.f32.mxu1 %v334_v30  ;;  %v2911_v10 = vpack.c.bf16 %v1590_v27, %v1589_v36  ;;  %v1593_v52 = vld [vmem:[%s4940_s1 + $0x340] sm:$0xff]  ;;  %v4045_v31 = vsel %vm329_vm1, %v366_v13, %v368_v15  ;;  %v371_v30 = vrot.slane %v3566_v38, 1  ;;  %v378_v15 = vrot.slane %v3634_v32, 1 }
  0x7c   : > { %778 = vmatmul.mubr.f32.gmra.mrb[18].mxu0 %v3464_v40  ;;  %2907 = vmatprep.subr.bf16.mxu1 %v5038_v9  ;;  %v1597_v27 = vld [vmem:[%s4940_s1 + $0x360] sm:$0xff] }
  0x7d   : > { %782 = vmatprep.mubr.f32.mxu0 %v4000_v44 }
  0x7e   : > { %1188 = vmatmul.mubr.f32.gmra.mrb[34].mxu1 %v3693_v41  ;;  %v1592_v41 = vld [vmem:[%s4940_s1 + $0x338] sm:$0xff] }
  0x7f   : > { %1192 = vmatprep.mubr.f32.mxu1 %v3321_v37  ;;  %2909 = vmatpush1.bf16.msra.mxu1 %v2908_v18  ;;  %v4030_v37 = vsel %vm329_vm1, %v365_v51, %v366_v13  ;;  %v2914_v23 = vpack.c.bf16 %v1592_v41, %v1591_v55  ;;  %v373_v18 = vrot.slane %v3594_v57, 1  ;;  %v375_v51 = vrot.slane %v3597_v62, 1  ;;  %v1599_v55 = vld [vmem:[%s4940_s1 + $0x370] sm:$0xff] }
  0x80   : > { %783 = vmatmul.mubr.f32.gmra.mrb[20].mxu0 %v3495_v53  ;;  %2910 = vmatprep.subr.bf16.mxu1 %v5038_v9  ;;  %v376_v13 = vrot.slane %v3600_v0, 1 }
  0x81   : > { %787 = vmatprep.mubr.f32.mxu0 %v4014_v8  ;;  %v4076_v57 = vsel %vm329_vm1, %v371_v30, %v373_v18 }
  0x82   : > { %1193 = vmatmul.mubr.f32.gmra.mrb[36].mxu1 %v3291_v24  ;;  %v1594_v24 = vld [vmem:[%s4940_s1 + $0x348] sm:$0xff]  ;;  %v4092_v41 = vsel %vm329_vm1, %v375_v51, %v376_v13  ;;  %v4107_v32 = vsel %vm329_vm1, %v376_v13, %v378_v15  ;;  %v1607_v13 = vld [vmem:[%s4940_s1 + $0x3b0] sm:$0xff]  ;;  %v1609_v15 = vld [vmem:[%s4940_s1 + $0x3c0] sm:$0xff] }
  0x83   : > { %1197 = vmatprep.mubr.f32.mxu1 %v3677_v26  ;;  %2912 = vmatpush1.bf16.msra.mxu1 %v2911_v10  ;;  %v370_v26 = vrot.slane %v3563_v33, 1  ;;  %v2917_v46 = vpack.c.bf16 %v1594_v24, %v1593_v52  ;;  %v1601_v52 = vld [vmem:[%s4940_s1 + $0x380] sm:$0xff]  ;;  %v380_v24 = vrot.slane %v3638_v45, 1 }
  0x84   : > { %788 = vmatmul.mubr.f32.gmra.mrb[22].mxu0 %v3498_v54  ;;  %2913 = vmatprep.subr.bf16.mxu1 %v5038_v9 }
  0x85   : > { %792 = vmatprep.mubr.f32.mxu0 %v4030_v37  ;;  %v4061_v34 = vsel %vm329_vm1, %v370_v26, %v371_v30  ;;  %v381_v26 = vrot.slane %v3641_v47, 1 }
  0x86   : > { %1198 = vmatmul.mubr.f32.gmra.mrb[38].mxu1 %v3300_v28  ;;  %v1596_v28 = vld [vmem:[%s4940_s1 + $0x358] sm:$0xff] }
  0x87   : > { %1202 = vmatprep.mubr.f32.mxu1 %v3739_v25  ;;  %2915 = vmatpush1.bf16.msra.mxu1 %v2914_v23  ;;  %v2920_v36 = vpack.c.bf16 %v1596_v28, %v1595_v29  ;;  %v4123_v29 = vsel %vm329_vm1, %v380_v24, %v381_v26  ;;  %v383_v28 = vrot.slane %v3669_v17, 1 }
  0x88   : > { %793 = vmatmul.mubr.f32.gmra.mrb[24].mxu0 %v3529_v11  ;;  %2916 = vmatprep.subr.bf16.mxu1 %v5038_v9 }
  0x89   : > { %797 = vmatprep.mubr.f32.mxu0 %v4045_v31  ;;  %v4138_v17 = vsel %vm329_vm1, %v381_v26, %v383_v28 }
  0x8a   : > { %1203 = vmatmul.mubr.f32.gmra.mrb[40].mxu1 %v3368_v58  ;;  %v1598_v58 = vld [vmem:[%s4940_s1 + $0x368] sm:$0xff] }
  0x8b   : > { %1207 = vmatprep.mubr.f32.mxu1 %v3778_v1  ;;  %2918 = vmatpush1.bf16.msra.mxu1 %v2917_v46  ;;  %v2923_v10 = vpack.c.bf16 %v1598_v58, %v1597_v27  ;;  %v1603_v46 = vld [vmem:[%s4940_s1 + $0x390] sm:$0xff]  ;;  %v385_v27 = vrot.slane %v3680_v19, 1  ;;  %v386_v58 = vrot.slane %v3683_v3, 1 }
  0x8c   : > { %798 = vmatmul.mubr.f32.gmra.mrb[26].mxu0 %v3532_v12  ;;  %2919 = vmatprep.subr.bf16.mxu1 %v5038_v9 }
  0x8d   : > { %802 = vmatprep.mubr.f32.mxu0 %v4061_v34 }
  0x8e   : > { %1208 = vmatmul.mubr.f32.gmra.mrb[42].mxu1 %v3371_v59  ;;  %v1600_v59 = vld [vmem:[%s4940_s1 + $0x378] sm:$0xff] }
  0x8f   : > { %1212 = vmatprep.mubr.f32.mxu1 %v3818_v63  ;;  %2921 = vmatpush1.bf16.msra.mxu1 %v2920_v36  ;;  %v2926_v23 = vpack.c.bf16 %v1600_v59, %v1599_v55  ;;  %v1605_v36 = vld [vmem:[%s4940_s1 + $0x3a0] sm:$0xff]  ;;  %v388_v55 = vrot.slane %v3722_v60, 1 }
  0x90   : > { %803 = vmatmul.mubr.f32.gmra.mrb[28].mxu0 %v3563_v33  ;;  %2922 = vmatprep.subr.bf16.mxu1 %v5038_v9 }
  0x91   : > { %807 = vmatprep.mubr.f32.mxu0 %v4076_v57  ;;  %v4169_v60 = vsel %vm329_vm1, %v386_v58, %v388_v55  ;;  %v1615_v55 = vld [vmem:[%s4940_s1 + $0x3f0] sm:$0xff] }
  0x92   : > { %1213 = vmatmul.mubr.f32.gmra.mrb[44].mxu1 %v3393_v6  ;;  %v1602_v6 = vld [vmem:[%s4940_s1 + $0x388] sm:$0xff] }
  0x93   : > { %1217 = vmatprep.mubr.f32.mxu1 %v3857_v5  ;;  %2924 = vmatpush1.bf16.msra.mxu1 %v2923_v10  ;;  %v2929_v30 = vpack.c.bf16 %v1602_v6, %v1601_v52  ;;  %v4154_v10 = vsel %vm329_vm1, %v385_v27, %v386_v58  ;;  %v5063_v6 = vld [vmem:[#allocation25_spill] sm:$0xff]  ;;  %v5065_v27 = vld [vmem:[#allocation31_spill] sm:$0xff] }
  0x94   : > { %808 = vmatmul.mubr.f32.gmra.mrb[30].mxu0 %v3566_v38  ;;  %2925 = vmatprep.subr.bf16.mxu1 %v5038_v9  ;;  %v391_v24 = vrot.slane %v5063_v6, 1  ;;  %v395_v58 = vrot.slane %v5065_v27, 1 }
  0x95   : > { %812 = vmatprep.mubr.f32.mxu0 %v4092_v41 }
  0x96   : > { %1218 = vmatmul.mubr.f32.gmra.mrb[46].mxu1 %v3396_v7  ;;  %v1604_v7 = vld [vmem:[%s4940_s1 + $0x398] sm:$0xff] }
  0x97   : > { %1222 = vmatprep.mubr.f32.mxu1 %v3897_v22  ;;  %2927 = vmatpush1.bf16.msra.mxu1 %v2926_v23  ;;  %v2932_v18 = vpack.c.bf16 %v1604_v7, %v1603_v46  ;;  %v5062_v23 = vld [vmem:[#allocation24_spill] sm:$0xff]  ;;  %v5064_v7 = vld [vmem:[#allocation30_spill] sm:$0xff] }
  0x98   : > { %813 = vmatmul.mubr.f32.gmra.mrb[32].mxu0 %v3597_v62  ;;  %2928 = vmatprep.subr.bf16.mxu1 %v5038_v9  ;;  %v390_v52 = vrot.slane %v5062_v23, 1  ;;  %v393_v28 = vrot.slane %v5064_v7, 1 }
  0x99   : > { %817 = vmatprep.mubr.f32.mxu0 %v4107_v32 }
  0x9a   : > { %1223 = vmatmul.mubr.f32.gmra.mrb[48].mxu1 %v3427_v20  ;;  %v1606_v20 = vld [vmem:[%s4940_s1 + $0x3a8] sm:$0xff]  ;;  %v4185_v46 = vsel %vm329_vm1, %v390_v52, %v391_v24 }
  0x9b   : > { %1227 = vmatprep.mubr.f32.mxu1 %v3930_v4  ;;  %2930 = vmatpush1.bf16.msra.mxu1 %v2929_v30  ;;  %v2935_v51 = vpack.c.bf16 %v1606_v20, %v1605_v36  ;;  %v1611_v30 = vld [vmem:[%s4940_s1 + $0x3d0] sm:$0xff]  ;;  %v1613_v36 = vld [vmem:[%s4940_s1 + $0x3e0] sm:$0xff]  ;;  %v4200_v20 = vsel %vm329_vm1, %v391_v24, %v393_v28 }
  0x9c   : > { %818 = vmatmul.mubr.f32.gmra.mrb[34].mxu0 %v3600_v0  ;;  %2931 = vmatprep.subr.bf16.mxu1 %v5038_v9 }
  0x9d   : > { %822 = vmatprep.mubr.f32.mxu0 %v4123_v29 }
  0x9e   : > { %1228 = vmatmul.mubr.f32.gmra.mrb[50].mxu1 %v3430_v21  ;;  %v1608_v21 = vld [vmem:[%s4940_s1 + $0x3b8] sm:$0xff] }
  0x9f   : > { %1232 = vmatprep.mubr.f32.mxu1 %v3955_v49  ;;  %2933 = vmatpush1.bf16.msra.mxu1 %v2932_v18  ;;  %v2938_v59 = vpack.c.bf16 %v1608_v21, %v1607_v13 }
  0xa0   : > { %823 = vmatmul.mubr.f32.gmra.mrb[36].mxu0 %v3638_v45  ;;  %2934 = vmatprep.subr.bf16.mxu1 %v5038_v9 }
  0xa1   : > { %827 = vmatprep.mubr.f32.mxu0 %v4138_v17 }
  0xa2   : > { %1233 = vmatmul.mubr.f32.gmra.mrb[52].mxu1 %v3461_v39  ;;  %v1610_v39 = vld [vmem:[%s4940_s1 + $0x3c8] sm:$0xff] }
  0xa3   : > { %1237 = vmatprep.mubr.f32.mxu1 %v3975_v43  ;;  %2936 = vmatpush1.bf16.msra.mxu1 %v2935_v51  ;;  %v2941_v26 = vpack.c.bf16 %v1610_v39, %v1609_v15  ;;  %v5066_v51 = vld [vmem:[#allocation32_spill] sm:$0xff]  ;;  %v5067_v15 = vld [vmem:[#allocation35_spill] sm:$0xff] }
  0xa4   : > { %828 = vmatmul.mubr.f32.gmra.mrb[38].mxu0 %v3641_v47  ;;  %2937 = vmatprep.subr.bf16.mxu1 %v5038_v9  ;;  %v396_v13 = vrot.slane %v5066_v51, 1  ;;  %v398_v39 = vrot.slane %v5067_v15, 1  ;;  %v1622_v15 = vld [vmem:[%s4940_s1 + $0x428] sm:$0xff] }
  0xa5   : > { %832 = vmatprep.mubr.f32.mxu0 %v4154_v10 }
  0xa6   : > { %1238 = vmatmul.mubr.f32.gmra.mrb[54].mxu1 %v3464_v40  ;;  %v1612_v40 = vld [vmem:[%s4940_s1 + $0x3d8] sm:$0xff]  ;;  %v4225_v24 = vsel %vm329_vm1, %v396_v13, %v398_v39  ;;  %v5075_v39 = vld [vmem:[#allocation27_spill] sm:$0xff] }
  0xa7   : > { %1242 = vmatprep.mubr.f32.mxu1 %v4000_v44  ;;  %2939 = vmatpush1.bf16.msra.mxu1 %v2938_v59  ;;  %v2944_v18 = vpack.c.bf16 %v1612_v40, %v1611_v30  ;;  %v4216_v59 = vsel %vm329_vm1, %v395_v58, %v396_v13  ;;  %v5069_v30 = vld [vmem:[#allocation37_spill] sm:$0xff] }
  0xa8   : > { %833 = vmatmul.mubr.f32.gmra.mrb[40].mxu0 %v3680_v19  ;;  %2940 = vmatprep.subr.bf16.mxu1 %v5038_v9  ;;  %v401_v40 = vrot.slane %v5069_v30, 1 }
  0xa9   : > { %837 = vmatprep.mubr.f32.mxu0 %v4169_v60 }
  0xaa   : > { %1243 = vmatmul.mubr.f32.gmra.mrb[56].mxu1 %v3495_v53  ;;  %v1614_v53 = vld [vmem:[%s4940_s1 + $0x3e8] sm:$0xff] }
  0xab   : > { %1247 = vmatprep.mubr.f32.mxu1 %v4014_v8  ;;  %2942 = vmatpush1.bf16.msra.mxu1 %v2941_v26  ;;  %v2947_v21 = vpack.c.bf16 %v1614_v53, %v1613_v36  ;;  %v5072_v53 = vld [vmem:[#allocation42_spill] sm:$0xff] }
  0xac   : > { %838 = vmatmul.mubr.f32.gmra.mrb[42].mxu0 %v3683_v3  ;;  %2943 = vmatprep.subr.bf16.mxu1 %v5038_v9 }
  0xad   : > { %842 = vmatprep.mubr.f32.mxu0 %v4185_v46 }
  0xae   : > { %1248 = vmatmul.mubr.f32.gmra.mrb[58].mxu1 %v3498_v54  ;;  %v1616_v54 = vld [vmem:[%s4940_s1 + $0x3f8] sm:$0xff] }
  0xaf   : > { %1252 = vmatprep.mubr.f32.mxu1 %v4030_v37  ;;  %2945 = vmatpush1.bf16.msra.mxu1 %v2944_v18  ;;  %v2950_v52 = vpack.c.bf16 %v1616_v54, %v1615_v55  ;;  %v5071_v18 = vld [vmem:[#allocation41_spill] sm:$0xff] }
  0xb0   : > { %843 = vmatmul.mubr.f32.gmra.mrb[44].mxu0 %v5062_v23  ;;  %2946 = vmatprep.subr.bf16.mxu1 %v5038_v9  ;;  %v405_v36 = vrot.slane %v5071_v18, 1  ;;  %v5073_v55 = vld [vmem:[#allocation45_spill] sm:$0xff] }
  0xb1   : > { %847 = vmatprep.mubr.f32.mxu0 %v4200_v20 }
  0xb2   : > { %1253 = vmatmul.mubr.f32.gmra.mrb[60].mxu1 %v3529_v11  ;;  %v5068_v11 = vld [vmem:[#allocation36_spill] sm:$0xff] }
  0xb3   : > { %1257 = vmatprep.mubr.f32.mxu1 %v4045_v31  ;;  %2948 = vmatpush1.bf16.msra.mxu1 %v2947_v21  ;;  %v400_v26 = vrot.slane %v5068_v11, 1  ;;  %v606_v21 = vrot.slane %v3890_v2, 1 }
  0xb4   : > { %848 = vmatmul.mubr.f32.gmra.mrb[46].mxu0 %v5063_v6  ;;  %2949 = vmatprep.subr.bf16.mxu1 %v5038_v9 }
  0xb5   : > { %852 = vmatprep.mubr.f32.mxu0 %v4216_v59  ;;  %v4234_v9 = vsel %vm329_vm1, %v400_v26, %v401_v40  ;;  %v1623_v26 = vld [vmem:[%s4940_s1 + $0x430] sm:$0xff] }
  0xb6   : > { %1258 = vmatmul.mubr.f32.gmra.mrb[62].mxu1 %v3532_v12  ;;  %v5070_v12 = vld [vmem:[#allocation40_spill] sm:$0xff] }
  0xb7   : > { %1262 = vmatprep.mubr.f32.mxu1 %v4061_v34  ;;  %2951 = vmatpush1.bf16.msra.mxu1 %v2950_v52  ;;  %v403_v7 = vrot.slane %v5070_v12, 1  ;;  %v5076_v52 = vld [vmem:[#allocation5_spill] sm:$0xff]  ;;  %v5077_v12 = vld [vmem:[#allocation6_spill] sm:$0xff] }
  0xb8   : > { %853 = vmatmul.mubr.f32.gmra.mrb[48].mxu0 %v5065_v27 }
  0xb9   : > { %857 = vmatprep.mubr.f32.mxu0 %v4225_v24  ;;  %v4242_v28 = vsel %vm329_vm1, %v401_v40, %v403_v7  ;;  %v1624_v40 = vld [vmem:[%s4940_s1 + $0x438] sm:$0xff]  ;;  %v5078_v7 = vld [vmem:[#allocation7_spill] sm:$0xff] }
  0xba   : > { %1263 = vmatmul.mubr.f32.gmra.mrb[64].mxu1 %v3563_v33  ;;  %v406_v33 = vrot.slane %v5072_v53, 1 }
  0xbb   : > { %1267 = vmatprep.mubr.f32.mxu1 %v4076_v57 }
  0xbc   : > { %858 = vmatmul.mubr.f32.gmra.mrb[50].mxu0 %v5066_v51  ;;  %v4251_v58 = vsel %vm329_vm1, %v405_v36, %v406_v33  ;;  %v1626_v36 = vld [vmem:[%s4940_s1 + $0x448] sm:$0xff] }
  0xbd   : > { %862 = vmatprep.mubr.f32.mxu0 %v4234_v9 }
  0xbe   : > { %1268 = vmatmul.mubr.f32.gmra.mrb[66].mxu1 %v3566_v38  ;;  %v408_v38 = vrot.slane %v3886_v50, 1 }
  0xbf   : > { %1272 = vmatprep.mubr.f32.mxu1 %v4092_v41 }
  0xc0   : > { %863 = vmatmul.mubr.f32.gmra.mrb[52].mxu0 %v5068_v11  ;;  %v4259_v13 = vsel %vm329_vm1, %v406_v33, %v408_v38  ;;  %v5079_v33 = vld [vmem:[#allocation8_spill] sm:$0xff]  ;;  %v5080_v38 = vld [vmem:[#allocation9_spill] sm:$0xff] }
  0xc1   : > { %867 = vmatprep.mubr.f32.mxu0 %v4242_v28 }
  0xc2   : > { %1273 = vmatmul.mubr.f32.gmra.mrb[68].mxu1 %v3597_v62  ;;  %v607_v62 = vrot.slane %v5073_v55, 1 }
  0xc3   : > { %1277 = vmatprep.mubr.f32.mxu1 %v4107_v32 }
  0xc4   : > { %868 = vmatmul.mubr.f32.gmra.mrb[54].mxu0 %v5069_v30  ;;  %v4268_v50 = vsel %vm329_vm1, %v606_v21, %v607_v62  ;;  %v1627_v21 = vld [vmem:[%s4940_s1 + $0x450] sm:$0xff] }
  0xc5   : > { %872 = vmatprep.mubr.f32.mxu0 %v4251_v58 }
  0xc6   : > { %1278 = vmatmul.mubr.f32.gmra.mrb[70].mxu1 %v3600_v0  ;;  %v609_v0 = vrot.slane %v3925_v42, 1  ;;  %v5074_v42 = vld [vmem:[#allocation26_spill] sm:$0xff] }
  0xc7   : > { %1282 = vmatprep.mubr.f32.mxu1 %v4123_v29 }
  0xc8   : > { %873 = vmatmul.mubr.f32.gmra.mrb[56].mxu0 %v5071_v18  ;;  %v4276_v54 = vsel %vm329_vm1, %v607_v62, %v609_v0  ;;  %v5081_v62 = vld [vmem:[#allocation10_spill] sm:$0xff]  ;;  %v5082_v0 = vld [vmem:[#allocation11_spill] sm:$0xff] }
  0xc9   : > { %877 = vmatprep.mubr.f32.mxu0 %v4259_v13 }
  0xca   : > { %1283 = vmatmul.mubr.f32.gmra.mrb[72].mxu1 %v3638_v45  ;;  %v1619_v45 = vld [vmem:[%s4940_s1 + $0x410] sm:$0xff] }
  0xcb   : > { %1287 = vmatprep.mubr.f32.mxu1 %v4138_v17 }
  0xcc   : > { %878 = vmatmul.mubr.f32.gmra.mrb[58].mxu0 %v5072_v53 }
  0xcd   : > { %882 = vmatprep.mubr.f32.mxu0 %v4268_v50 }
  0xce   : > { %1288 = vmatmul.mubr.f32.gmra.mrb[74].mxu1 %v3641_v47  ;;  %v1620_v47 = vld [vmem:[%s4940_s1 + $0x418] sm:$0xff] }
  0xcf   : > { %1292 = vmatprep.mubr.f32.mxu1 %v4154_v10 }
  0xd0   : > { %883 = vmatmul.mubr.f32.gmra.mrb[60].mxu0 %v3890_v2  ;;  %v2956_v2 = vpack.c.bf16 %v1620_v47, %v1619_v45  ;;  %v1629_v45 = vld [vmem:[%s4940_s1 + $0x460] sm:$0xff]  ;;  %v1630_v47 = vld [vmem:[%s4940_s1 + $0x468] sm:$0xff] }
  0xd1   : > { %887 = vmatprep.mubr.f32.mxu0 %v4276_v54 }
  0xd2   : > { %1293 = vmatmul.mubr.f32.gmra.mrb[76].mxu1 %v3680_v19  ;;  %v1621_v19 = vld [vmem:[%s4940_s1 + $0x420] sm:$0xff] }
  0xd3   : > { %1297 = vmatprep.mubr.f32.mxu1 %v4169_v60 }
  0xd4   : > { %888 = vmatmul.mubr.f32.gmra.mrb[62].mxu0 %v5073_v55  ;;  %v1628_v55 = vld [vmem:[%s4940_s1 + $0x458] sm:$0xff] }
  0xd5   : > { %2616 = vmatprep.mubr.f32.mxu0 %v5074_v42  ;;  %v5083_v42 = vld [vmem:[#allocation12_spill] sm:$0xff] }
  0xd6   : > { %1298 = vmatmul.mubr.f32.gmra.mrb[78].mxu1 %v3683_v3  ;;  %v2960_v3 = vpack.c.bf16 %v1622_v15, %v1621_v19  ;;  %v1631_v19 = vld [vmem:[%s4940_s1 + $0x470] sm:$0xff]  ;;  %v1632_v15 = vld [vmem:[%s4940_s1 + $0x478] sm:$0xff] }
  0xd7   : > { %1302 = vmatprep.mubr.f32.mxu1 %v4185_v46 }
  0xd8   : > { %2617 = vmatmul.mubr.f32.vlgmr.msra.gmra.mrb[64].mxu0 %v5075_v39  ;;  %v5085_v39 = vld [vmem:[#allocation14_spill] sm:$0xff] }
  0xd9   : > { %2619 = vmatprep.mubr.f32.mxu0 %v5076_v52  ;;  %2955 = vmatpush3.bf16.msra.mxu0 %v3985_v14  ;;  %v2964_v14 = vpack.c.bf16 %v1624_v40, %v1623_v26  ;;  %v5086_v52 = vld [vmem:[#allocation15_spill] sm:$0xff]  ;;  %v5088_v26 = vld [vmem:[#allocation17_spill] sm:$0xff]  ;;  %v5089_v40 = vld [vmem:[#allocation18_spill] sm:$0xff] }
  0xda   : > { %1303 = vmatmul.mubr.f32.gmra.mrb[80].mxu1 %v5062_v23  ;;  %2957 = vmatprep.subr.bf16.mxu0 %v2956_v2  ;;  %v1625_v23 = vld [vmem:[%s4940_s1 + $0x440] sm:$0xff] }
  0xdb   : > { %1307 = vmatprep.mubr.f32.mxu1 %v4200_v20 }
  0xdc   : > { %2620 = vmatmul.mubr.f32.gmra.mrb[66].mxu0 %v5077_v12  ;;  %v5090_v12 = vld [vmem:[#allocation19_spill] sm:$0xff] }
  0xdd   : > { %2622 = vmatprep.mubr.f32.mxu0 %v5078_v7  ;;  %2959 = vmatpush3.bf16.msra.mxu0 %v2956_v2  ;;  %v5084_v2 = vld [vmem:[#allocation13_spill] sm:$0xff] }
  0xde   : > { %1308 = vmatmul.mubr.f32.gmra.mrb[82].mxu1 %v5063_v6  ;;  %2961 = vmatprep.subr.bf16.mxu0 %v2960_v3  ;;  %v2968_v6 = vpack.c.bf16 %v1626_v36, %v1625_v23  ;;  %v3043_v23 = vld [vmem:[%s3281_s21 + $0x30] sm:$0xff] }
  0xdf   : > { %1312 = vmatprep.mubr.f32.mxu1 %v4216_v59  ;;  %v5094_v36 = vld [vmem:[#allocation23_spill] sm:$0xff] }
  0xe0   : > { %2623 = vmatmul.mubr.f32.gmra.mrb[68].mxu0 %v5079_v33 }
  0xe1   : > { %2625 = vmatprep.mubr.f32.mxu0 %v5080_v38  ;;  %2963 = vmatpush3.bf16.msra.mxu0 %v2960_v3  ;;  %v5087_v3 = vld [vmem:[#allocation16_spill] sm:$0xff] }
  0xe2   : > { %1313 = vmatmul.mubr.f32.gmra.mrb[84].mxu1 %v5065_v27  ;;  %2965 = vmatprep.subr.bf16.mxu0 %v2964_v14  ;;  %v2972_v27 = vpack.c.bf16 %v1628_v55, %v1627_v21  ;;  %v3045_v21 = vld [vmem:[%s3281_s21 + $0x48] sm:$0xff]  ;;  %v5097_v55 = vld [vmem:[#allocation33_spill] sm:$0xff] }
  0xe3   : > { %1317 = vmatprep.mubr.f32.mxu1 %v4225_v24 }
  0xe4   : > { %2626 = vmatmul.mubr.f32.gmra.mrb[70].mxu0 %v5081_v62 }
  0xe5   : > { %2628 = vmatprep.mubr.f32.mxu0 %v5082_v0  ;;  %2967 = vmatpush3.bf16.msra.mxu0 %v2964_v14  ;;  %v5092_v14 = vld [vmem:[#allocation21_spill] sm:$0xff] }
  0xe6   : > { %1318 = vmatmul.mubr.f32.gmra.mrb[86].mxu1 %v5066_v51  ;;  %2969 = vmatprep.subr.bf16.mxu0 %v2968_v6  ;;  %v2976_v51 = vpack.c.bf16 %v1630_v47, %v1629_v45  ;;  %v5099_v45 = vld [vmem:[#allocation38_spill] sm:$0xff]  ;;  %v3047_v47 = vld [vmem:[%s3281_s21 + $0x60] sm:$0xff] }
  0xe7   : > { %1322 = vmatprep.mubr.f32.mxu1 %v4234_v9 }
  0xe8   : > { %2629 = vmatmul.mubr.f32.gmra.mrb[72].mxu0 %v5083_v42 }
  0xe9   : > { %2631 = vmatprep.mubr.f32.mxu0 %v5084_v2  ;;  %2971 = vmatpush3.bf16.msra.mxu0 %v2968_v6  ;;  %v3044_v6 = vld [vmem:[%s3281_s21 + $0x38] sm:$0xff] }
  0xea   : > { %1323 = vmatmul.mubr.f32.gmra.mrb[88].mxu1 %v5068_v11  ;;  %2973 = vmatprep.subr.bf16.mxu0 %v2972_v27  ;;  %v2980_v11 = vpack.c.bf16 %v1632_v15, %v1631_v19  ;;  %v5102_v19 = vld [vmem:[#allocation44_spill] sm:$0xff] }
  0xeb   : > { %1327 = vmatprep.mubr.f32.mxu1 %v4242_v28 }
  0xec   : > { %2632 = vmatmul.mubr.f32.gmra.mrb[74].mxu0 %v5085_v39 }
  0xed   : > { %2634 = vmatprep.mubr.f32.mxu0 %v5086_v52  ;;  %2975 = vmatpush3.bf16.msra.mxu0 %v2972_v27  ;;  %v3046_v27 = vld [vmem:[%s3281_s21 + $0x50] sm:$0xff] }
  0xee   : > { %1328 = vmatmul.mubr.f32.gmra.mrb[90].mxu1 %v5069_v30  ;;  %2977 = vmatprep.subr.bf16.mxu0 %v2976_v51  ;;  %v5091_v30 = vld [vmem:[#allocation20_spill] sm:$0xff] }
  0xef   : > { %1332 = vmatprep.mubr.f32.mxu1 %v4251_v58 }
  0xf0   : > { %2635 = vmatmul.mubr.f32.gmra.mrb[76].mxu0 %v5087_v3 }
  0xf1   : > { %2637 = vmatprep.mubr.f32.mxu0 %v5088_v26  ;;  %2979 = vmatpush3.bf16.msra.mxu0 %v2976_v51  ;;  %v5101_v51 = vld [vmem:[#allocation43_spill] sm:$0xff] }
  0xf2   : > { %1333 = vmatmul.mubr.f32.gmra.mrb[92].mxu1 %v5071_v18  ;;  %2981 = vmatprep.subr.bf16.mxu0 %v2980_v11  ;;  %v5093_v18 = vld [vmem:[#allocation22_spill] sm:$0xff] }
  0xf3   : > { %1337 = vmatprep.mubr.f32.mxu1 %v4259_v13 }
  0xf4   : > { %2638 = vmatmul.mubr.f32.gmra.mrb[78].mxu0 %v5089_v40 }
  0xf5   : > { %2640 = vmatprep.mubr.f32.mxu0 %v5090_v12  ;;  %2983 = vmatpush3.bf16.msra.mxu0 %v2980_v11  ;;  %v3048_v11 = vld [vmem:[%s3281_s21 + $0x68] sm:$0xff] }
  0xf6   : > { %1338 = vmatmul.mubr.f32.gmra.mrb[94].mxu1 %v5072_v53  ;;  %v5095_v53 = vld [vmem:[#allocation28_spill] sm:$0xff] }
  0xf7   : > { %1697 = vmatprep.mubr.f32.mxu1 %v3739_v25  ;;  %v5096_v25 = vld [vmem:[#allocation29_spill] sm:$0xff] }
  0xf8   : > { %2641 = vmatmul.mubr.f32.gmra.mrb[80].mxu0 %v5091_v30 }
  0xf9   : > { %2643 = vmatprep.mubr.f32.mxu0 %v5092_v14 }
  0xfa   : > { %1698 = vmatmul.mubr.f32.vlgmr.msra.gmra.mrb[96].mxu1 %v3043_v23  ;;  %v3049_v23 = vld [vmem:[%s3281_s21 + $0x78] sm:$0xff] }
  0xfb   : > { %1702 = vmatprep.mubr.f32.mxu1 %v3778_v1  ;;  %v5098_v1 = vld [vmem:[#allocation34_spill] sm:$0xff] }
  0xfc   : > { %2644 = vmatmul.mubr.f32.gmra.mrb[82].mxu0 %v5093_v18 }
  0xfd   : > { %2646 = vmatprep.mubr.f32.mxu0 %v5094_v36 }
  0xfe   : > { %1703 = vmatmul.mubr.f32.gmra.mrb[98].mxu1 %v3044_v6 }
  0xff   : > { %1707 = vmatprep.mubr.f32.mxu1 %v3818_v63  ;;  %v5100_v63 = vld [vmem:[#allocation39_spill] sm:$0xff] }
 0x100   : > { %2647 = vmatmul.mubr.f32.gmra.mrb[84].mxu0 %v5095_v53 }
 0x101   : > { %2649 = vmatprep.mubr.f32.mxu0 %v5096_v25 }
 0x102   : > { %1708 = vmatmul.mubr.f32.gmra.mrb[100].mxu1 %v3045_v21  ;;  %v3050_v21 = vld [vmem:[%s3281_s21 + $0x80] sm:$0xff] }
 0x103   : > { %1712 = vmatprep.mubr.f32.mxu1 %v3857_v5 }
 0x104   : > { %2650 = vmatmul.mubr.f32.gmra.mrb[86].mxu0 %v5097_v55 }
 0x105   : > { %2652 = vmatprep.mubr.f32.mxu0 %v5098_v1 }
 0x106   : > { %1713 = vmatmul.mubr.f32.gmra.mrb[102].mxu1 %v3046_v27 }
 0x107   : > { %1717 = vmatprep.mubr.f32.mxu1 %v3897_v22 }
 0x108   : > { %2653 = vmatmul.mubr.f32.gmra.mrb[88].mxu0 %v5099_v45 }
 0x109   : > { %2655 = vmatprep.mubr.f32.mxu0 %v5100_v63 }
 0x10a   : > { %1718 = vmatmul.mubr.f32.gmra.mrb[104].mxu1 %v3047_v47  ;;  %v3051_v47 = vld [vmem:[%s3281_s21 + $0x90] sm:$0xff] }
 0x10b   : > { %1722 = vmatprep.mubr.f32.mxu1 %v3930_v4 }
 0x10c   : > { %2656 = vmatmul.mubr.f32.gmra.mrb[90].mxu0 %v5101_v51 }
 0x10d   : > { %v4383_v5 = vpop.f32.mrb[0].mxu1  ;;  %2658 = vmatprep.mubr.f32.mxu0 %v5102_v19 }
 0x10e   : > { %v959_v15 = vpop.f32.mrb[1].mxu1  ;;  %1723 = vmatmul.mubr.f32.gmra.mrb[106].mxu1 %v3048_v11 }
 0x10f   : > { %1727 = vmatprep.mubr.f32.mxu1 %v3955_v49 }
 0x110   : > { %2659 = vmatmul.mubr.f32.gmra.mrb[92].mxu0 %v3902_v48 }
 0x111   : > { %v4389_v22 = vpop.f32.mrb[2].mxu1  ;;  %2661 = vmatprep.mubr.f32.mxu0 %v3914_v35 }
 0x112   : > { %v4392_v4 = vpop.f32.mrb[3].mxu1  ;;  %1728 = vmatmul.mubr.f32.gmra.mrb[108].mxu1 %v3049_v23 }
 0x113   : > { %1732 = vmatprep.mubr.f32.mxu1 %v3975_v43 }
 0x114   : > { %2662 = vmatmul.mubr.f32.gmra.mrb[94].mxu0 %v3936_v16 }
 0x115   : > { %v4397_v6 = vpop.f32.mrb[4].mxu1  ;;  %2696 = vmatprep.mubr.f32.mxu0 %v5078_v7 }
 0x116   : > { %v4400_v49 = vpop.f32.mrb[5].mxu1  ;;  %1733 = vmatmul.mubr.f32.gmra.mrb[110].mxu1 %v3050_v21 }
 0x117   : > { %1737 = vmatprep.mubr.f32.mxu1 %v4000_v44 }
 0x118   : > { %2697 = vmatmul.mubr.f32.vlgmr.msra.gmra.mrb[96].mxu0 %v5079_v33  ;;  %v3052_v33 = vld [vmem:[%s3281_s21 + $0x98] sm:$0xff] }
 0x119   : > { %v4405_v27 = vpop.f32.mrb[6].mxu1  ;;  %2699 = vmatprep.mubr.f32.mxu0 %v5080_v38 }
 0x11a   : > { %v4408_v43 = vpop.f32.mrb[7].mxu1  ;;  %1738 = vmatmul.mubr.f32.gmra.mrb[112].mxu1 %v3051_v47 }
 0x11b   : > { %1742 = vmatprep.mubr.f32.mxu1 %v4014_v8 }
 0x11c   : > { %2700 = vmatmul.mubr.f32.gmra.mrb[98].mxu0 %v5081_v62  ;;  %v3053_v62 = vld [vmem:[%s3281_s21 + $0xa8] sm:$0xff] }
 0x11d   : > { %v4413_v7 = vpop.f32.mrb[8].mxu1  ;;  %2702 = vmatprep.mubr.f32.mxu0 %v5082_v0 }
 0x11e   : > { %v4416_v44 = vpop.f32.mrb[9].mxu1  ;;  %1743 = vmatmul.mubr.f32.gmra.mrb[114].mxu1 %v3052_v33 }
 0x11f   : > { %1747 = vmatprep.mubr.f32.mxu1 %v4030_v37 }
 0x120   : > { %2703 = vmatmul.mubr.f32.gmra.mrb[100].mxu0 %v5083_v42  ;;  %v3054_v42 = vld [vmem:[%s3281_s21 + $0xb0] sm:$0xff] }
 0x121   : > { %v4421_v38 = vpop.f32.mrb[10].mxu1  ;;  %2705 = vmatprep.mubr.f32.mxu0 %v5084_v2 }
 0x122   : > { %v4424_v8 = vpop.f32.mrb[11].mxu1  ;;  %1748 = vmatmul.mubr.f32.gmra.mrb[116].mxu1 %v3053_v62 }
 0x123   : > { %1752 = vmatprep.mubr.f32.mxu1 %v4045_v31 }
 0x124   : > { %2706 = vmatmul.mubr.f32.gmra.mrb[102].mxu0 %v5085_v39  ;;  %v3055_v39 = vld [vmem:[%s3281_s21 + $0xc0] sm:$0xff] }
 0x125   : > { %v4429_v0 = vpop.f32.mrb[12].mxu1  ;;  %2708 = vmatprep.mubr.f32.mxu0 %v5086_v52 }
 0x126   : > { %v4432_v37 = vpop.f32.mrb[13].mxu1  ;;  %1753 = vmatmul.mubr.f32.gmra.mrb[118].mxu1 %v3054_v42 }
 0x127   : > { %1757 = vmatprep.mubr.f32.mxu1 %v4061_v34 }
 0x128   : > { %2709 = vmatmul.mubr.f32.gmra.mrb[104].mxu0 %v5087_v3 }
 0x129   : > { %v4437_v2 = vpop.f32.mrb[14].mxu1  ;;  %2711 = vmatprep.mubr.f32.mxu0 %v5088_v26  ;;  %v3056_v26 = vld [vmem:[%s3281_s21 + $0xc8] sm:$0xff] }
 0x12a   : > { %v4440_v31 = vpop.f32.mrb[15].mxu1  ;;  %1758 = vmatmul.mubr.f32.gmra.mrb[120].mxu1 %v3055_v39 }
 0x12b   : > { %v734_v11 = vpop.f32.mrb[0].mxu0  ;;  %1762 = vmatprep.mubr.f32.mxu1 %v4076_v57 }
 0x12c   : > { %v4444_v52 = vadd.f32 %v959_v15, %v734_v11  ;;  %2712 = vmatmul.mubr.f32.gmra.mrb[106].mxu0 %v5089_v40  ;;  %v736_v23 = vpop.f32.mrb[1].mxu0 }
 0x12d   : > { %v4447_v34 = vpop.f32.mrb[16].mxu1  ;;  %2714 = vmatprep.mubr.f32.mxu0 %v5090_v12  ;;  %v3057_v12 = vld [vmem:[%s3281_s21 + $0xd8] sm:$0xff] }
 0x12e   : > { %v4450_v3 = vpop.f32.mrb[17].mxu1  ;;  %1763 = vmatmul.mubr.f32.gmra.mrb[122].mxu1 %v3056_v26 }
 0x12f   : > { %v739_v21 = vpop.f32.mrb[2].mxu0  ;;  %1767 = vmatprep.mubr.f32.mxu1 %v4092_v41 }
 0x130   : > { %v4455_v47 = vadd.f32 %v4383_v5, %v739_v21  ;;  %2715 = vmatmul.mubr.f32.gmra.mrb[108].mxu0 %v5091_v30  ;;  %v741_v57 = vpop.f32.mrb[3].mxu0 }
 0x131   : > { %v4458_v40 = vpop.f32.mrb[18].mxu1  ;;  %2717 = vmatprep.mubr.f32.mxu0 %v5092_v14  ;;  %v3058_v14 = vld [vmem:[%s3281_s21 + $0xe0] sm:$0xff] }
 0x132   : > { %v4461_v15 = vpop.f32.mrb[19].mxu1  ;;  %1768 = vmatmul.mubr.f32.gmra.mrb[124].mxu1 %v3057_v12  ;;  %v3062_v12 = vld [vmem:[%s3281_s21 + $0x110] sm:$0xff] }
 0x133   : > { %v744_v33 = vpop.f32.mrb[4].mxu0  ;;  %1772 = vmatprep.mubr.f32.mxu1 %v4107_v32 }
 0x134   : > { %v4466_v41 = vadd.f32 %v4392_v4, %v744_v33  ;;  %2718 = vmatmul.mubr.f32.gmra.mrb[110].mxu0 %v5093_v18  ;;  %v746_v5 = vpop.f32.mrb[5].mxu0 }
 0x135   : > { %v4469_v30 = vpop.f32.mrb[20].mxu1  ;;  %2720 = vmatprep.mubr.f32.mxu0 %v5094_v36  ;;  %v3059_v36 = vld [vmem:[%s3281_s21 + $0xf0] sm:$0xff] }
 0x136   : > { %v4472_v62 = vpop.f32.mrb[21].mxu1  ;;  %1773 = vmatmul.mubr.f32.gmra.mrb[126].mxu1 %v3058_v14 }
 0x137   : > { %v749_v42 = vpop.f32.mrb[6].mxu0  ;;  %1777 = vmatprep.mubr.f32.mxu1 %v4123_v29 }
 0x138   : > { %v4477_v32 = vadd.f32 %v4389_v22, %v749_v42  ;;  %2721 = vmatmul.mubr.f32.gmra.mrb[112].mxu0 %v5095_v53  ;;  %v751_v4 = vpop.f32.mrb[7].mxu0  ;;  %v3063_v42 = vld [vmem:[%s3281_s21 + $0x120] sm:$0xff] }
 0x139   : > { %v4480_v18 = vpop.f32.mrb[22].mxu1  ;;  %2723 = vmatprep.mubr.f32.mxu0 %v5096_v25  ;;  %v3060_v25 = vld [vmem:[%s3281_s21 + $0xf8] sm:$0xff] }
 0x13a   : > { %v4483_v39 = vpop.f32.mrb[23].mxu1  ;;  %1778 = vmatmul.mubr.f32.gmra.mrb[128].mxu1 %v3059_v36  ;;  %v4539_v36 = vld [vmem:[%s3281_s21 + $0x1a8] sm:$0x3] }
 0x13b   : > { %v754_v11 = vpop.f32.mrb[8].mxu0  ;;  %1782 = vmatprep.mubr.f32.mxu1 %v4138_v17 }
 0x13c   : > { %v4488_v29 = vadd.f32 %v4400_v49, %v754_v11  ;;  %v756_v22 = vpop.f32.mrb[9].mxu0  ;;  %2724 = vmatmul.mubr.f32.gmra.mrb[114].mxu0 %v5097_v55 }
 0x13d   : > { %v4491_v53 = vpop.f32.mrb[24].mxu1  ;;  %2726 = vmatprep.mubr.f32.mxu0 %v5098_v1  ;;  %v3061_v1 = vld [vmem:[%s3281_s21 + $0x108] sm:$0xff]  ;;  %v1581_v22 = vrot.slane %v4539_v36, 2 }
 0x13e   : > { %v4494_v23 = vpop.f32.mrb[25].mxu1  ;;  %1783 = vmatmul.mubr.f32.gmra.mrb[130].mxu1 %v3060_v25 }
 0x13f   : > { %v759_v26 = vpop.f32.mrb[10].mxu0  ;;  %1787 = vmatprep.mubr.f32.mxu1 %v4154_v10 }
 0x140   : > { %v4499_v17 = vadd.f32 %v4397_v6, %v759_v26  ;;  %v761_v49 = vpop.f32.mrb[11].mxu0  ;;  %2727 = vmatmul.mubr.f32.gmra.mrb[116].mxu0 %v5099_v45 }
 0x141   : > { %v4502_v21 = vpop.f32.mrb[26].mxu1  ;;  %2729 = vmatprep.mubr.f32.mxu0 %v5100_v63  ;;  %v3064_v49 = vld [vmem:[%s3281_s21 + $0x128] sm:$0xff] }
 0x142   : > { %v4505_v55 = vpop.f32.mrb[27].mxu1  ;;  %1788 = vmatmul.mubr.f32.gmra.mrb[132].mxu1 %v3061_v1 }
 0x143   : > { %v764_v57 = vpop.f32.mrb[12].mxu0  ;;  %1792 = vmatprep.mubr.f32.mxu1 %v4169_v60  ;;  %v4521_v60 = vld [vmem:[%s3281_s21 + $0x198] sm:$0xff] }
 0x144   : > { %v4510_v10 = vadd.f32 %v4408_v43, %v764_v57  ;;  %v766_v6 = vpop.f32.mrb[13].mxu0  ;;  %2730 = vmatmul.mubr.f32.gmra.mrb[118].mxu0 %v5101_v51  ;;  %v4524_v43 = vld [vmem:[%s3281_s21 + $0x1a0] sm:$0xff] }
 0x145   : > { %v4513_v45 = vpop.f32.mrb[28].mxu1  ;;  %2732 = vmatprep.mubr.f32.mxu0 %v5102_v19  ;;  %v1579_v4 = vrot.slane %v4524_v43, 2 }
 0x146   : > { %v4516_v63 = vpop.f32.mrb[29].mxu1  ;;  %1793 = vmatmul.mubr.f32.gmra.mrb[134].mxu1 %v3062_v12  ;;  %v3065_v12 = vld [vmem:[%s3281_s21 + $0x138] sm:$0xff] }
 0x147   : > { %v769_v33 = vpop.f32.mrb[14].mxu0  ;;  %1797 = vmatprep.mubr.f32.mxu1 %v4185_v46  ;;  %v1578_v46 = vrot.slane %v4521_v60, 2 }
 0x148   : > { %v4527_v5 = vadd.f32 %v4405_v27, %v769_v33  ;;  %v771_v51 = vpop.f32.mrb[15].mxu0  ;;  %2733 = vmatmul.mubr.f32.gmra.mrb[120].mxu0 %v3902_v48 }
 0x149   : > { %v4530_v14 = vpop.f32.mrb[30].mxu1  ;;  %2735 = vmatprep.mubr.f32.mxu0 %v3914_v35 }
 0x14a   : > { %v4533_v19 = vpop.f32.mrb[31].mxu1  ;;  %1798 = vmatmul.mubr.f32.gmra.mrb[136].mxu1 %v3063_v42 }
 0x14b   : > { %v774_v27 = vpop.f32.mrb[16].mxu0  ;;  %1802 = vmatprep.mubr.f32.mxu1 %v4200_v20  ;;  %v1580_v20 = vsel %vm442_vm0, %v1578_v46, %v1579_v4  ;;  %v3066_v46 = vld [vmem:[%s3281_s21 + $0x140] sm:$0xff] }
 0x14c   : > { %v4543_v48 = vadd.f32 %v4416_v44, %v774_v27  ;;  %v776_v11 = vpop.f32.mrb[17].mxu0  ;;  %2736 = vmatmul.mubr.f32.gmra.mrb[122].mxu0 %v3936_v16 }
 0x14d   : > { %v1184_v35 = vpop.f32.mrb[32].mxu1  ;;  %2738 = vmatprep.mubr.f32.mxu0 %v3942_v56 }
 0x14e   : > { %v4549_v25 = vadd.f32 %v1184_v35, %v4444_v52  ;;  %v1186_v26 = vpop.f32.mrb[33].mxu1  ;;  %1803 = vmatmul.mubr.f32.gmra.mrb[138].mxu1 %v3064_v49  ;;  %v1582_v52 = vsel %vm442_vm0, %v1579_v4, %v1581_v22  ;;  %v3067_v35 = vld [vmem:[%s3281_s21 + $0x150] sm:$0xff] }
 0x14f   : > { %v779_v1 = vpop.f32.mrb[18].mxu0  ;;  %1807 = vmatprep.mubr.f32.mxu1 %v4216_v59 }
 0x150   : > { %v4555_v44 = vadd.f32 %v4413_v7, %v779_v1  ;;  %v781_v16 = vpop.f32.mrb[19].mxu0  ;;  %2739 = vmatmul.mubr.f32.gmra.mrb[124].mxu0 %v3960_v61 }
 0x151   : > { %v1189_v56 = vpop.f32.mrb[34].mxu1  ;;  %2741 = vmatprep.mubr.f32.mxu0 %v1580_v20  ;;  %v3068_v20 = vld [vmem:[%s3281_s21 + $0x158] sm:$0xff] }
 0x152   : > { %v4560_v57 = vadd.f32 %v1189_v56, %v4455_v47  ;;  %v1191_v6 = vpop.f32.mrb[35].mxu1  ;;  %1808 = vmatmul.mubr.f32.gmra.mrb[140].mxu1 %v3065_v12 }
 0x153   : > { %v784_v33 = vpop.f32.mrb[20].mxu0  ;;  %1812 = vmatprep.mubr.f32.mxu1 %v4225_v24 }
 0x154   : > { %v4565_v59 = vadd.f32 %v4424_v8, %v784_v33  ;;  %v786_v7 = vpop.f32.mrb[21].mxu0  ;;  %2742 = vmatmul.mubr.f32.gmra.mrb[126].mxu0 %v1582_v52  ;;  %v3069_v52 = vld [vmem:[%s3281_s21 + $0x168] sm:$0xff] }
 0x155   : > { %v1194_v61 = vpop.f32.mrb[36].mxu1  ;;  %v3070_v7 = vld [vmem:[%s3281_s21 + $0x170] sm:$0xff] }
 0x156   : > { %v4568_v51 = vadd.f32 %v1194_v61, %v4466_v41  ;;  %v1196_v42 = vpop.f32.mrb[37].mxu1  ;;  %1813 = vmatmul.mubr.f32.gmra.mrb[142].mxu1 %v3066_v46 }
 0x157   : > { %v789_v47 = vpop.f32.mrb[22].mxu0  ;;  %1817 = vmatprep.mubr.f32.mxu1 %v4234_v9 }
 0x158   : > { %v4573_v4 = vadd.f32 %v4421_v38, %v789_v47  ;;  %v791_v24 = vpop.f32.mrb[23].mxu0 }
 0x159   : > { %v1199_v27 = vpop.f32.mrb[38].mxu1  ;;  %v3071_v24 = vld [vmem:[%s3281_s21 + $0x180] sm:$0xff] }
 0x15a   : > { %v4576_v8 = vadd.f32 %v1199_v27, %v4477_v32  ;;  %v1201_v11 = vpop.f32.mrb[39].mxu1  ;;  %1818 = vmatmul.mubr.f32.gmra.mrb[144].mxu1 %v3067_v35  ;;  %v1574_v35 = vrot.slane %v4539_v36, 1 }
 0x15b   : > { %v794_v41 = vpop.f32.mrb[24].mxu0  ;;  %1822 = vmatprep.mubr.f32.mxu1 %v4242_v28 }
 0x15c   : > { %v4581_v22 = vadd.f32 %v4432_v37, %v794_v41  ;;  %v796_v26 = vpop.f32.mrb[25].mxu0 }
 0x15d   : > { %v1204_v9 = vpop.f32.mrb[40].mxu1 }
 0x15e   : > { %v4584_v38 = vadd.f32 %v1204_v9, %v4488_v29  ;;  %v1206_v49 = vpop.f32.mrb[41].mxu1  ;;  %1823 = vmatmul.mubr.f32.gmra.mrb[146].mxu1 %v3068_v20 }
 0x15f   : > { %v799_v32 = vpop.f32.mrb[26].mxu0  ;;  %1827 = vmatprep.mubr.f32.mxu1 %v4251_v58 }
 0x160   : > { %v4589_v1 = vadd.f32 %v4429_v0, %v799_v32  ;;  %v801_v16 = vpop.f32.mrb[27].mxu0 }
 0x161   : > { %v1209_v28 = vpop.f32.mrb[42].mxu1 }
 0x162   : > { %v4592_v37 = vadd.f32 %v1209_v28, %v4499_v17  ;;  %v1211_v56 = vpop.f32.mrb[43].mxu1  ;;  %1828 = vmatmul.mubr.f32.gmra.mrb[148].mxu1 %v3069_v52 }
 0x163   : > { %v804_v29 = vpop.f32.mrb[28].mxu0  ;;  %1832 = vmatprep.mubr.f32.mxu1 %v4259_v13  ;;  %v1571_v13 = vrot.slane %v4521_v60, 1 }
 0x164   : > { %v4597_v6 = vadd.f32 %v4440_v31, %v804_v29  ;;  %v806_v12 = vpop.f32.mrb[29].mxu0  ;;  %v1572_v31 = vrot.slane %v4524_v43, 1 }
 0x165   : > { %v1214_v58 = vpop.f32.mrb[44].mxu1 }
 0x166   : > { %v4600_v0 = vadd.f32 %v1214_v58, %v4510_v10  ;;  %v1216_v33 = vpop.f32.mrb[45].mxu1  ;;  %1833 = vmatmul.mubr.f32.gmra.mrb[150].mxu1 %v3070_v7  ;;  %v1573_v11 = vsel %vm329_vm1, %v1571_v13, %v1572_v31 }
 0x167   : > { %v809_v17 = vpop.f32.mrb[30].mxu0  ;;  %1837 = vmatprep.mubr.f32.mxu1 %v4268_v50 }
 0x168   : > { %v4605_v61 = vadd.f32 %v4437_v2, %v809_v17  ;;  %v811_v42 = vpop.f32.mrb[31].mxu0 }
 0x169   : > { %v1219_v46 = vpop.f32.mrb[46].mxu1 }
 0x16a   : > { %v4610_v47 = vadd.f32 %v1219_v46, %v4527_v5  ;;  %v1221_v10 = vpop.f32.mrb[47].mxu1  ;;  %1838 = vmatmul.mubr.f32.gmra.mrb[152].mxu1 %v3071_v24  ;;  %v3072_v5 = vld [vmem:[%s3281_s21 + $0x188] sm:$0xff]  ;;  %s208_s21 = sand.u32 1, %s3135_s13  }
 0x16b   : > { %v814_v27 = vpop.f32.mrb[32].mxu0  ;;  %1842 = vmatprep.mubr.f32.mxu1 %v4276_v54  ;;  %v1575_v54 = vsel %vm329_vm1, %v1572_v31, %v1574_v35  ;;  %s2351_s4 = sshll.u32 %s208_s21, 8  ;;  %s4893_s11 = scalar_lea.sflag [#allocation3], %s208_s21 }
 0x16c   : > { %v1040_v50 = vadd.f32 %v4450_v3, %v814_v27  ;;  %v816_v2 = vpop.f32.mrb[33].mxu0  ;;  %s4787_s5 = scalar_lea.vmem [#allocation2], %s2351_s4 }
 0x16d   : > { %v1224_v41 = vpop.f32.mrb[48].mxu1  ;;  %s2236_s7 = sshll.u32 %s4787_s5, 4  ;;  %s4888_s7 = int_to_ptr.vmem [resolvable:$true] %s2236_s7 }
 0x16e   : > { %v4618_v26 = vadd.f32 %v1224_v41, %v4543_v48  ;;  %v1226_v9 = vpop.f32.mrb[49].mxu1  ;;  %1843 = vmatmul.mubr.f32.gmra.mrb[154].mxu1 %v3072_v5  ;;  %s3073_s15 = scalar_lea.vmem %s4888_s7, 4096  ;;  %p3080_p1 = scmp.lt.s32.totalorder %s4888_s7, %s3078_s19 }
 0x16f   : > { %v819_v49 = vpop.f32.mrb[34].mxu0  ;;  %1847 = vmatprep.mubr.f32.mxu1 %v1573_v11  ;;  %p3074_p12 = scmp.ne.s32.totalorder %s4888_s7, %s3073_s15  ;;  %p3081_p2 = scmp.lt.s32.totalorder %s3079_s23, %s3073_s15 }
 0x170   : > { %v1045_v20 = vadd.f32 %v4447_v34, %v819_v49  ;;  %v821_v32 = vpop.f32.mrb[35].mxu0 }
 0x171   : > { %v1229_v3 = vpop.f32.mrb[50].mxu1  ;;  %p3075_p13 = pnand %p3074_p12, %p3217_p4  ;;  %p3082_p3 = por %p3081_p2, %p3080_p1 }
 0x172   : > { %v4624_v16 = vadd.f32 %v1229_v3, %v4555_v44  ;;  %v1231_v28 = vpop.f32.mrb[51].mxu1  ;;  %1848 = vmatmul.mubr.f32.gmra.mrb[156].mxu1 %v4521_v60 }
 0x173   : > { %v824_v36 = vpop.f32.mrb[36].mxu0  ;;  %1852 = vmatprep.mubr.f32.mxu1 %v1575_v54  ;;  %p3076_p0 = pneg %p3075_p13 }
 0x174   : > { %v1050_v48 = vadd.f32 %v4461_v15, %v824_v36  ;;  %v826_v56 = vpop.f32.mrb[37].mxu0 }
 0x175   : > { %v1234_v52 = vpop.f32.mrb[52].mxu1  ;;  %p3083_p5 = pnand %p3082_p3, %p3076_p0 }
 0x176   : > { %v4629_v29 = vadd.f32 %v1234_v52, %v4565_v59  ;;  %v1236_v34 = vpop.f32.mrb[53].mxu1  ;;  %1853 = vmatmul.mubr.f32.gmra.mrb[158].mxu1 %v4524_v43 }
 0x177   : > { %v829_v12 = vpop.f32.mrb[38].mxu0 }
 0x178   : > { %v1055_v58 = vadd.f32 %v4458_v40, %v829_v12  ;;  %v831_v44 = vpop.f32.mrb[39].mxu0 }
 0x179   : > { %v1239_v33 = vpop.f32.mrb[54].mxu1 }
 0x17a   : > { %v4634_v7 = vadd.f32 %v1239_v33, %v4573_v4  ;;  %v1241_v60 = vpop.f32.mrb[55].mxu1 }
 0x17b   : > { %v834_v17 = vpop.f32.mrb[40].mxu0 }
 0x17c   : > { %v1060_v15 = vadd.f32 %v4472_v62, %v834_v17  ;;  %v836_v42 = vpop.f32.mrb[41].mxu0 }
 0x17d   : > { %v1244_v13 = vpop.f32.mrb[56].mxu1 }
 0x17e   : > { %v4638_v59 = vadd.f32 %v1244_v13, %v4581_v22  ;;  %v1246_v31 = vpop.f32.mrb[57].mxu1 }
 0x17f   : > { %v839_v46 = vpop.f32.mrb[42].mxu0 }
 0x180   : > { %v1065_v43 = vadd.f32 %v4469_v30, %v839_v46  ;;  %v841_v10 = vpop.f32.mrb[43].mxu0 }
 0x181   : > { %v1249_v40 = vpop.f32.mrb[58].mxu1 }
 0x182   : > { %v4642_v24 = vadd.f32 %v1249_v40, %v4589_v1  ;;  %v1251_v4 = vpop.f32.mrb[59].mxu1 }
 0x183   : > { %v844_v27 = vpop.f32.mrb[44].mxu0 }
 0x184   : > { %v1070_v2 = vadd.f32 %v4483_v39, %v844_v27  ;;  %v846_v11 = vpop.f32.mrb[45].mxu0 }
 0x185   : > { %v1254_v62 = vpop.f32.mrb[60].mxu1 }
 0x186   : > { %v4646_v35 = vadd.f32 %v1254_v62, %v4597_v6  ;;  %v1256_v22 = vpop.f32.mrb[61].mxu1 }
 0x187   : > { %v849_v41 = vpop.f32.mrb[46].mxu0 }
 0x188   : > { %v1075_v9 = vadd.f32 %v4480_v18, %v849_v41  ;;  %v851_v5 = vpop.f32.mrb[47].mxu0 }
 0x189   : > { %v1259_v30 = vpop.f32.mrb[62].mxu1 }
 0x18a   : > { %v4650_v49 = vadd.f32 %v1259_v30, %v4605_v61  ;;  %v1261_v1 = vpop.f32.mrb[63].mxu1 }
 0x18b   : > { %v854_v32 = vpop.f32.mrb[48].mxu0 }
 0x18c   : > { %v1080_v54 = vadd.f32 %v4494_v23, %v854_v32  ;;  %v856_v3 = vpop.f32.mrb[49].mxu0 }
 0x18d   : > { %v1264_v39 = vpop.f32.mrb[64].mxu1 }
 0x18e   : > { %v4653_v28 = vadd.f32 %v1264_v39, %v1040_v50  ;;  %v1266_v36 = vpop.f32.mrb[65].mxu1 }
 0x18f   : > { %v859_v6 = vpop.f32.mrb[50].mxu0 }
 0x190   : > { %v1085_v56 = vadd.f32 %v4491_v53, %v859_v6  ;;  %v861_v52 = vpop.f32.mrb[51].mxu0 }
 0x191   : > { %v1269_v34 = vpop.f32.mrb[66].mxu1 }
 0x192   : > { %v4656_v18 = vadd.f32 %v1269_v34, %v1045_v20  ;;  %v1271_v12 = vpop.f32.mrb[67].mxu1 }
 0x193   : > { %v864_v44 = vpop.f32.mrb[52].mxu0 }
 0x194   : > { %v1090_v61 = vadd.f32 %v4505_v55, %v864_v44  ;;  %v866_v33 = vpop.f32.mrb[53].mxu0 }
 0x195   : > { %v1274_v60 = vpop.f32.mrb[68].mxu1 }
 0x196   : > { %v4659_v17 = vadd.f32 %v1274_v60, %v1050_v48  ;;  %v1276_v23 = vpop.f32.mrb[69].mxu1 }
 0x197   : > { %v869_v42 = vpop.f32.mrb[54].mxu0 }
 0x198   : > { %v1095_v50 = vadd.f32 %v4502_v21, %v869_v42  ;;  %v871_v13 = vpop.f32.mrb[55].mxu0 }
 0x199   : > { %v1279_v31 = vpop.f32.mrb[70].mxu1 }
 0x19a   : > { %v4662_v46 = vadd.f32 %v1279_v31, %v1055_v58  ;;  %v1281_v53 = vpop.f32.mrb[71].mxu1 }
 0x19b   : > { %v874_v10 = vpop.f32.mrb[56].mxu0 }
 0x19c   : > { %v1100_v20 = vadd.f32 %v4516_v63, %v874_v10  ;;  %v876_v40 = vpop.f32.mrb[57].mxu0 }
 0x19d   : > { %v1284_v4 = vpop.f32.mrb[72].mxu1 }
 0x19e   : > { %v4665_v27 = vadd.f32 %v1284_v4, %v1060_v15  ;;  %v1286_v55 = vpop.f32.mrb[73].mxu1 }
 0x19f   : > { %v879_v11 = vpop.f32.mrb[58].mxu0 }
 0x1a0   : > { %v1105_v48 = vadd.f32 %v4513_v45, %v879_v11  ;;  %v881_v62 = vpop.f32.mrb[59].mxu0 }
 0x1a1   : > { %v1289_v22 = vpop.f32.mrb[74].mxu1 }
 0x1a2   : > { %v4668_v41 = vadd.f32 %v1289_v22, %v1065_v43  ;;  %v1291_v21 = vpop.f32.mrb[75].mxu1 }
 0x1a3   : > { %v884_v5 = vpop.f32.mrb[60].mxu0 }
 0x1a4   : > { %v1110_v58 = vadd.f32 %v4533_v19, %v884_v5  ;;  %v886_v30 = vpop.f32.mrb[61].mxu0 }
 0x1a5   : > { %v1294_v1 = vpop.f32.mrb[76].mxu1 }
 0x1a6   : > { %v4671_v32 = vadd.f32 %v1294_v1, %v1070_v2  ;;  %v1296_v63 = vpop.f32.mrb[77].mxu1 }
 0x1a7   : > { %v889_v3 = vpop.f32.mrb[62].mxu0 }
 0x1a8   : > { %v1115_v15 = vadd.f32 %v4530_v14, %v889_v3  ;;  %v891_v39 = vpop.f32.mrb[63].mxu0 }
 0x1a9   : > { %v1299_v36 = vpop.f32.mrb[78].mxu1 }
 0x1aa   : > { %v4674_v6 = vadd.f32 %v1299_v36, %v1075_v9  ;;  %v1301_v45 = vpop.f32.mrb[79].mxu1 }
 0x1ab   : > { %v2618_v52 = vpop.f32.mrb[64].mxu0 }
 0x1ac   : > { %v4677_v43 = vadd.f32 %v2618_v52, %v4560_v57  ;;  %v1409_v34 = vpop.f32.mrb[65].mxu0 }
 0x1ad   : > { %v1304_v12 = vpop.f32.mrb[80].mxu1  ;;  %v4680_v19 = vadd.f32 %v1409_v34, %v4549_v25 }
 0x1ae   : > { %v4682_v2 = vadd.f32 %v1304_v12, %v1080_v54  ;;  %v1306_v44 = vpop.f32.mrb[81].mxu1 }
 0x1af   : > { %v2621_v33 = vpop.f32.mrb[66].mxu0 }
 0x1b0   : > { %v4685_v14 = vadd.f32 %v2621_v33, %v4576_v8  ;;  %v1419_v60 = vpop.f32.mrb[67].mxu0 }
 0x1b1   : > { %v1309_v9 = vpop.f32.mrb[82].mxu1  ;;  %v4688_v23 = vadd.f32 %v1419_v60, %v4568_v51 }
 0x1b2   : > { %v4690_v42 = vadd.f32 %v1309_v9, %v1085_v56  ;;  %v1311_v57 = vpop.f32.mrb[83].mxu1 }
 0x1b3   : > { %v2624_v13 = vpop.f32.mrb[68].mxu0 }
 0x1b4   : > { %v4693_v31 = vadd.f32 %v2624_v13, %v4592_v37  ;;  %v1429_v25 = vpop.f32.mrb[69].mxu0 }
 0x1b5   : > { %v1314_v54 = vpop.f32.mrb[84].mxu1  ;;  %v4696_v53 = vadd.f32 %v1429_v25, %v4584_v38 }
 0x1b6   : > { %v4698_v10 = vadd.f32 %v1314_v54, %v1090_v61  ;;  %v1316_v8 = vpop.f32.mrb[85].mxu1 }
 0x1b7   : > { %v2627_v40 = vpop.f32.mrb[70].mxu0 }
 0x1b8   : > { %v4701_v4 = vadd.f32 %v2627_v40, %v4610_v47  ;;  %v1439_v51 = vpop.f32.mrb[71].mxu0 }
 0x1b9   : > { %v1319_v56 = vpop.f32.mrb[86].mxu1  ;;  %v4704_v55 = vadd.f32 %v1439_v51, %v4600_v0 }
 0x1ba   : > { %v1320_v11 = vadd.f32 %v1319_v56, %v1095_v50  ;;  %v1321_v37 = vpop.f32.mrb[87].mxu1 }
 0x1bb   : > { %v2630_v62 = vpop.f32.mrb[72].mxu0 }
 0x1bc   : > { %v4707_v22 = vadd.f32 %v2630_v62, %v4624_v16  ;;  %v1449_v38 = vpop.f32.mrb[73].mxu0 }
 0x1bd   : > { %v1324_v21 = vpop.f32.mrb[88].mxu1  ;;  %v4710_v61 = vadd.f32 %v1449_v38, %v4618_v26 }
 0x1be   : > { %v1325_v5 = vadd.f32 %v1324_v21, %v1100_v20  ;;  %v1326_v30 = vpop.f32.mrb[89].mxu1 }
 0x1bf   : > { %v2633_v47 = vpop.f32.mrb[74].mxu0 }
 0x1c0   : > { %v4713_v1 = vadd.f32 %v2633_v47, %v4634_v7  ;;  %v1459_v63 = vpop.f32.mrb[75].mxu0 }
 0x1c1   : > { %v1329_v0 = vpop.f32.mrb[90].mxu1  ;;  %v4716_v50 = vadd.f32 %v1459_v63, %v4629_v29 }
 0x1c2   : > { %v1330_v3 = vadd.f32 %v1329_v0, %v1105_v48  ;;  %v1331_v39 = vpop.f32.mrb[91].mxu1 }
 0x1c3   : > { %v2636_v16 = vpop.f32.mrb[76].mxu0 }
 0x1c4   : > { %v4719_v36 = vadd.f32 %v2636_v16, %v4642_v24  ;;  %v1469_v45 = vpop.f32.mrb[77].mxu0 }
 0x1c5   : > { %v1334_v26 = vpop.f32.mrb[92].mxu1  ;;  %v4722_v20 = vadd.f32 %v1469_v45, %v4638_v59 }
 0x1c6   : > { %v1335_v52 = vadd.f32 %v1334_v26, %v1110_v58  ;;  %v1336_v34 = vpop.f32.mrb[93].mxu1 }
 0x1c7   : > { %v2639_v7 = vpop.f32.mrb[78].mxu0 }
 0x1c8   : > { %v4725_v12 = vadd.f32 %v2639_v7, %v4650_v49  ;;  %v1479_v44 = vpop.f32.mrb[79].mxu0 }
 0x1c9   : > { %v1339_v29 = vpop.f32.mrb[94].mxu1  ;;  %v4728_v48 = vadd.f32 %v1479_v44, %v4646_v35 }
 0x1ca   : > { %v1340_v33 = vadd.f32 %v1339_v29, %v1115_v15  ;;  %v1341_v60 = vpop.f32.mrb[95].mxu1 }
 0x1cb   : > { %v2642_v24 = vpop.f32.mrb[80].mxu0 }
 0x1cc   : > { %v4731_v9 = vadd.f32 %v2642_v24, %v4656_v18  ;;  %v1489_v57 = vpop.f32.mrb[81].mxu0 }
 0x1cd   : > { %v4734_v59 = vadd.f32 %v1489_v57, %v4653_v28  ;;  %v1699_v58 = vpop.f32.mrb[96].mxu1 }
 0x1ce   : > { %v1701_v13 = vpop.f32.mrb[97].mxu1 }
 0x1cf   : > { %v2645_v25 = vpop.f32.mrb[82].mxu0 }
 0x1d0   : > { %v4737_v49 = vadd.f32 %v2645_v25, %v4662_v46  ;;  %v1499_v54 = vpop.f32.mrb[83].mxu0 }
 0x1d1   : > { %v4740_v35 = vadd.f32 %v1499_v54, %v4659_v17  ;;  %v1704_v15 = vpop.f32.mrb[98].mxu1 }
 0x1d2   : > { %v1706_v8 = vpop.f32.mrb[99].mxu1 }
 0x1d3   : > { %v2648_v40 = vpop.f32.mrb[84].mxu0 }
 0x1d4   : > { %v4743_v18 = vadd.f32 %v2648_v40, %v4668_v41  ;;  %v1509_v51 = vpop.f32.mrb[85].mxu0 }
 0x1d5   : > { %v4746_v28 = vadd.f32 %v1509_v51, %v4665_v27  ;;  %v1709_v56 = vpop.f32.mrb[100].mxu1 }
 0x1d6   : > { %v1711_v37 = vpop.f32.mrb[101].mxu1 }
 0x1d7   : > { %v2651_v62 = vpop.f32.mrb[86].mxu0 }
 0x1d8   : > { %v4749_v46 = vadd.f32 %v2651_v62, %v4674_v6  ;;  %v1519_v38 = vpop.f32.mrb[87].mxu0 }
 0x1d9   : > { %v4752_v17 = vadd.f32 %v1519_v38, %v4671_v32  ;;  %v1714_v21 = vpop.f32.mrb[102].mxu1 }
 0x1da   : > { %v1716_v30 = vpop.f32.mrb[103].mxu1 }
 0x1db   : > { %v2654_v47 = vpop.f32.mrb[88].mxu0 }
 0x1dc   : > { %v4755_v41 = vadd.f32 %v2654_v47, %v4690_v42  ;;  %v1529_v63 = vpop.f32.mrb[89].mxu0 }
 0x1dd   : > { %v4758_v27 = vadd.f32 %v1529_v63, %v4682_v2  ;;  %v1719_v0 = vpop.f32.mrb[104].mxu1 }
 0x1de   : > { %v1721_v39 = vpop.f32.mrb[105].mxu1 }
 0x1df   : > { %v2657_v16 = vpop.f32.mrb[90].mxu0 }
 0x1e0   : > { %v4760_v45 = vadd.f32 %v2657_v16, %v1320_v11  ;;  %v1539_v6 = vpop.f32.mrb[91].mxu0 }
 0x1e1   : > { %v4763_v32 = vadd.f32 %v1539_v6, %v4698_v10  ;;  %v1724_v26 = vpop.f32.mrb[106].mxu1 }
 0x1e2   : > { %v1726_v34 = vpop.f32.mrb[107].mxu1 }
 0x1e3   : > { %v2660_v7 = vpop.f32.mrb[92].mxu0 }
 0x1e4   : > { %v4765_v44 = vadd.f32 %v2660_v7, %v1330_v3  ;;  %v1549_v42 = vpop.f32.mrb[93].mxu0 }
 0x1e5   : > { %v4767_v29 = vadd.f32 %v1549_v42, %v1325_v5  ;;  %v1729_v2 = vpop.f32.mrb[108].mxu1  ;;  %v4777_v5 = vld [vmem:[%s4941_s2] ss:$0 sm:$0xff] }
 0x1e6   : > { %v1731_v60 = vpop.f32.mrb[109].mxu1 }
 0x1e7   : > { %v2663_v24 = vpop.f32.mrb[94].mxu0 }
 0x1e8   : > { %v4769_v57 = vadd.f32 %v2663_v24, %v1340_v33  ;;  %v1559_v11 = vpop.f32.mrb[95].mxu0 }
 0x1e9   : > { %v4771_v13 = vadd.f32 %v1559_v11, %v1335_v52  ;;  %v1734_v25 = vpop.f32.mrb[110].mxu1 }
 0x1ea   : > { %v1736_v10 = vpop.f32.mrb[111].mxu1 }
 0x1eb   : > { %v2698_v54 = vpop.f32.mrb[96].mxu0 }
 0x1ec   : > { %v1930_v8 = vadd.f32 %v2698_v54, %v1704_v15  ;;  %v1924_v40 = vpop.f32.mrb[97].mxu0 }
 0x1ed   : > { %v1739_v3 = vpop.f32.mrb[112].mxu1  ;;  %v1925_v51 = vadd.f32 %v1924_v40, %v1699_v58 }
 0x1ee   : > { %v2084_v33 = vadd.f32 %v1930_v8, %v4677_v43  ;;  %v1741_v37 = vpop.f32.mrb[113].mxu1 }
 0x1ef   : > { %v2083_v52 = vadd.f32 %v1925_v51, %v4680_v19  ;;  %v2701_v62 = vpop.f32.mrb[98].mxu0 }
 0x1f0   : > { %v2123_v38 = vadd.f32 %v4777_v5, %v2084_v33  ;;  %v1940_v30 = vadd.f32 %v2701_v62, %v1714_v21  ;;  %v1934_v15 = vpop.f32.mrb[99].mxu0 }
 0x1f1   : > { %v2122_v47 = vadd.f32 %v4777_v5, %v2083_v52  ;;  %v1744_v63 = vpop.f32.mrb[114].mxu1  ;;  %v1935_v39 = vadd.f32 %v1934_v15, %v1709_v56 }
 0x1f2   : > { %v2155_v16 = vmax.f32 %v2123_v38, 0.0  ;;  %v2086_v6 = vadd.f32 %v1940_v30, %v4685_v14  ;;  %v1746_v58 = vpop.f32.mrb[115].mxu1 }
 0x1f3   : > { %v2154_v34 = vmax.f32 %v2122_v47, 0.0  ;;  %v2085_v7 = vadd.f32 %v1935_v39, %v4688_v23  ;;  %v2704_v43 = vpop.f32.mrb[100].mxu0 }
 0x1f4   : > { %2187 = vst [vmem:[%s4787_s5 + $0x8] sm:$0xff] %v2155_v16  ;;  %v2125_v19 = vadd.f32 %v4777_v5, %v2086_v6  ;;  %v1950_v21 = vadd.f32 %v2704_v43, %v1724_v26  ;;  %v1944_v42 = vpop.f32.mrb[101].mxu0 }
 0x1f5   : > { %2186 = vst [vmem:[%s4787_s5] sm:$0xff] %v2154_v34  ;;  %v2124_v56 = vadd.f32 %v4777_v5, %v2085_v7  ;;  %v1749_v14 = vpop.f32.mrb[116].mxu1  ;;  %v1945_v60 = vadd.f32 %v1944_v42, %v1719_v0 }
 0x1f6   : > { %v2157_v24 = vmax.f32 %v2125_v19, 0.0  ;;  %v2088_v23 = vadd.f32 %v1950_v21, %v4693_v31  ;;  %v1751_v11 = vpop.f32.mrb[117].mxu1 }
 0x1f7   : > { %v2156_v10 = vmax.f32 %v2124_v56, 0.0  ;;  %v2087_v54 = vadd.f32 %v1945_v60, %v4696_v53  ;;  %v2707_v8 = vpop.f32.mrb[102].mxu0 }
 0x1f8   : > { %2189 = vst [vmem:[%s4787_s5 + $0x18] sm:$0xff] %v2157_v24  ;;  %v2127_v40 = vadd.f32 %v4777_v5, %v2088_v23  ;;  %v1960_v26 = vadd.f32 %v2707_v8, %v1734_v25  ;;  %v1954_v51 = vpop.f32.mrb[103].mxu0 }
 0x1f9   : > { %2188 = vst [vmem:[%s4787_s5 + $0x10] sm:$0xff] %v2156_v10  ;;  %v2126_v33 = vadd.f32 %v4777_v5, %v2087_v54  ;;  %v1754_v37 = vpop.f32.mrb[118].mxu1  ;;  %v1955_v0 = vadd.f32 %v1954_v51, %v1729_v2 }
 0x1fa   : > { %v2159_v52 = vmax.f32 %v2127_v40, 0.0  ;;  %v2090_v31 = vadd.f32 %v1960_v26, %v4701_v4  ;;  %v1756_v62 = vpop.f32.mrb[119].mxu1 }
 0x1fb   : > { %v2158_v38 = vmax.f32 %v2126_v33, 0.0  ;;  %v2089_v53 = vadd.f32 %v1955_v0, %v4704_v55  ;;  %v2710_v30 = vpop.f32.mrb[104].mxu0 }
 0x1fc   : > { %2191 = vst [vmem:[%s4787_s5 + $0x28] sm:$0xff] %v2159_v52  ;;  %v2129_v15 = vadd.f32 %v4777_v5, %v2090_v31  ;;  %v1970_v25 = vadd.f32 %v2710_v30, %v1744_v63  ;;  %v1964_v47 = vpop.f32.mrb[105].mxu0 }
 0x1fd   : > { %2190 = vst [vmem:[%s4787_s5 + $0x20] sm:$0xff] %v2158_v38  ;;  %v2128_v39 = vadd.f32 %v4777_v5, %v2089_v53  ;;  %v1759_v16 = vpop.f32.mrb[120].mxu1  ;;  %v1965_v2 = vadd.f32 %v1964_v47, %v1739_v3 }
 0x1fe   : > { %v2161_v6 = vmax.f32 %v2129_v15, 0.0  ;;  %v2092_v4 = vadd.f32 %v1970_v25, %v4707_v22  ;;  %v1761_v58 = vpop.f32.mrb[121].mxu1 }
 0x1ff   : > { %v2160_v34 = vmax.f32 %v2128_v39, 0.0  ;;  %v2091_v55 = vadd.f32 %v1965_v2, %v4710_v61  ;;  %v2713_v7 = vpop.f32.mrb[106].mxu0 }
 0x200   : > { %2193 = vst [vmem:[%s4787_s5 + $0x38] sm:$0xff] %v2161_v6  ;;  %v2131_v43 = vadd.f32 %v4777_v5, %v2092_v4  ;;  %v1980_v63 = vadd.f32 %v2713_v7, %v1754_v37  ;;  %v1974_v19 = vpop.f32.mrb[107].mxu0 }
 0x201   : > { %2192 = vst [vmem:[%s4787_s5 + $0x30] sm:$0xff] %v2160_v34  ;;  %v2130_v21 = vadd.f32 %v4777_v5, %v2091_v55  ;;  %v1764_v42 = vpop.f32.mrb[122].mxu1  ;;  %v1975_v3 = vadd.f32 %v1974_v19, %v1749_v14 }
 0x202   : > { %v2163_v56 = vmax.f32 %v2131_v43, 0.0  ;;  %v2094_v22 = vadd.f32 %v1980_v63, %v4713_v1  ;;  %v1766_v60 = vpop.f32.mrb[123].mxu1 }
 0x203   : > { %v2162_v24 = vmax.f32 %v2130_v21, 0.0  ;;  %v2093_v61 = vadd.f32 %v1975_v3, %v4716_v50  ;;  %v2716_v23 = vpop.f32.mrb[108].mxu0 }
 0x204   : > { %2195 = vst [vmem:[%s4787_s5 + $0x48] sm:$0xff] %v2163_v56  ;;  %v2133_v11 = vadd.f32 %v4777_v5, %v2094_v22  ;;  %v1990_v10 = vadd.f32 %v2716_v23, %v1764_v42  ;;  %v1984_v54 = vpop.f32.mrb[109].mxu0 }
 0x205   : > { %2194 = vst [vmem:[%s4787_s5 + $0x40] sm:$0xff] %v2162_v24  ;;  %v2132_v8 = vadd.f32 %v4777_v5, %v2093_v61  ;;  %v1769_v40 = vpop.f32.mrb[124].mxu1  ;;  %v1985_v14 = vadd.f32 %v1984_v54, %v1759_v16 }
 0x206   : > { %v2165_v26 = vmax.f32 %v2133_v11, 0.0  ;;  %v2096_v1 = vadd.f32 %v1990_v10, %v4719_v36  ;;  %v1771_v51 = vpop.f32.mrb[125].mxu1 }
 0x207   : > { %v2164_v33 = vmax.f32 %v2132_v8, 0.0  ;;  %v2095_v50 = vadd.f32 %v1985_v14, %v4722_v20  ;;  %v2719_v37 = vpop.f32.mrb[110].mxu0 }
 0x208   : > { %2197 = vst [vmem:[%s4787_s5 + $0x58] sm:$0xff] %v2165_v26  ;;  %v2135_v0 = vadd.f32 %v4777_v5, %v2096_v1  ;;  %v1994_v52 = vpop.f32.mrb[111].mxu0 }
 0x209   : > { %2196 = vst [vmem:[%s4787_s5 + $0x50] sm:$0xff] %v2164_v33  ;;  %v2134_v31 = vadd.f32 %v4777_v5, %v2095_v50  ;;  %v1774_v62 = vpop.f32.mrb[126].mxu1  ;;  %v1995_v38 = vadd.f32 %v1994_v52, %v1769_v40 }
 0x20a   : > { %v2167_v53 = vmax.f32 %v2135_v0, 0.0  ;;  %v2000_v30 = vadd.f32 %v2719_v37, %v1774_v62  ;;  %v1776_v15 = vpop.f32.mrb[127].mxu1 }
 0x20b   : > { %v2166_v36 = vmax.f32 %v2134_v31, 0.0  ;;  %v2097_v25 = vadd.f32 %v1995_v38, %v4728_v48  ;;  %v2722_v47 = vpop.f32.mrb[112].mxu0 }
 0x20c   : > { %2199 = vst [vmem:[%s4787_s5 + $0x68] sm:$0xff] %v2167_v53  ;;  %v2098_v20 = vadd.f32 %v2000_v30, %v4725_v12  ;;  %v2004_v39 = vpop.f32.mrb[113].mxu0 }
 0x20d   : > { %2198 = vst [vmem:[%s4787_s5 + $0x60] sm:$0xff] %v2166_v36  ;;  %v2136_v16 = vadd.f32 %v4777_v5, %v2097_v25  ;;  %v1779_v2 = vpop.f32.mrb[128].mxu1 }
 0x20e   : > { %v2137_v6 = vadd.f32 %v4777_v5, %v2098_v20  ;;  %v2005_v4 = vadd.f32 %v2004_v39, %v1779_v2  ;;  %v1781_v58 = vpop.f32.mrb[129].mxu1 }
 0x20f   : > { %v2168_v34 = vmax.f32 %v2136_v16, 0.0  ;;  %v2725_v55 = vpop.f32.mrb[114].mxu0 }
 0x210   : > { %v2169_v7 = vmax.f32 %v2137_v6, 0.0  ;;  %v2099_v48 = vadd.f32 %v2005_v4, %v4734_v59  ;;  %v2014_v43 = vpop.f32.mrb[115].mxu0 }
 0x211   : > { %2200 = vst [vmem:[%s4787_s5 + $0x70] sm:$0xff] %v2168_v34  ;;  %v1784_v63 = vpop.f32.mrb[130].mxu1 }
 0x212   : > { %2201 = vst [vmem:[%s4787_s5 + $0x78] sm:$0xff] %v2169_v7  ;;  %v2138_v12 = vadd.f32 %v4777_v5, %v2099_v48  ;;  %v2010_v19 = vadd.f32 %v2722_v47, %v1784_v63  ;;  %v1786_v21 = vpop.f32.mrb[131].mxu1 }
 0x213   : > { %v2728_v42 = vpop.f32.mrb[116].mxu0 }
 0x214   : > { %v2170_v3 = vmax.f32 %v2138_v12, 0.0  ;;  %v2100_v56 = vadd.f32 %v2010_v19, %v4731_v9  ;;  %v2024_v22 = vpop.f32.mrb[117].mxu0 }
 0x215   : > { %v1789_v60 = vpop.f32.mrb[132].mxu1 }
 0x216   : > { %2202 = vst [vmem:[%s4787_s5 + $0x80] sm:$0xff] %v2170_v3  ;;  %v2139_v24 = vadd.f32 %v4777_v5, %v2100_v56  ;;  %v2015_v61 = vadd.f32 %v2014_v43, %v1789_v60  ;;  %v1791_v59 = vpop.f32.mrb[133].mxu1 }
 0x217   : > { %v2731_v23 = vpop.f32.mrb[118].mxu0 }
 0x218   : > { %v2171_v11 = vmax.f32 %v2139_v24, 0.0  ;;  %v2101_v10 = vadd.f32 %v2015_v61, %v4740_v35  ;;  %v2034_v54 = vpop.f32.mrb[119].mxu0 }
 0x219   : > { %v1794_v8 = vpop.f32.mrb[134].mxu1 }
 0x21a   : > { %2203 = vst [vmem:[%s4787_s5 + $0x88] sm:$0xff] %v2171_v11  ;;  %v2140_v40 = vadd.f32 %v4777_v5, %v2101_v10  ;;  %v2020_v14 = vadd.f32 %v2725_v55, %v1794_v8  ;;  %v1796_v9 = vpop.f32.mrb[135].mxu1 }
 0x21b   : > { %v2734_v26 = vpop.f32.mrb[120].mxu0 }
 0x21c   : > { %v2172_v1 = vmax.f32 %v2140_v40, 0.0  ;;  %v2102_v51 = vadd.f32 %v2020_v14, %v4737_v49  ;;  %v2044_v33 = vpop.f32.mrb[121].mxu0 }
 0x21d   : > { %v1799_v50 = vpop.f32.mrb[136].mxu1 }
 0x21e   : > { %2204 = vst [vmem:[%s4787_s5 + $0x90] sm:$0xff] %v2172_v1  ;;  %v2141_v37 = vadd.f32 %v4777_v5, %v2102_v51  ;;  %v2025_v0 = vadd.f32 %v2024_v22, %v1799_v50  ;;  %v1801_v35 = vpop.f32.mrb[137].mxu1 }
 0x21f   : > { %v2737_v52 = vpop.f32.mrb[122].mxu0 }
 0x220   : > { %v2173_v31 = vmax.f32 %v2141_v37, 0.0  ;;  %v2103_v62 = vadd.f32 %v2025_v0, %v4746_v28  ;;  %v2054_v38 = vpop.f32.mrb[123].mxu0 }
 0x221   : > { %v1804_v53 = vpop.f32.mrb[138].mxu1 }
 0x222   : > { %2205 = vst [vmem:[%s4787_s5 + $0x98] sm:$0xff] %v2173_v31  ;;  %v2142_v30 = vadd.f32 %v4777_v5, %v2103_v62  ;;  %v2030_v15 = vadd.f32 %v2728_v42, %v1804_v53  ;;  %v1806_v49 = vpop.f32.mrb[139].mxu1 }
 0x223   : > { %v2740_v36 = vpop.f32.mrb[124].mxu0 }
 0x224   : > { %v2174_v25 = vmax.f32 %v2142_v30, 0.0  ;;  %v2104_v47 = vadd.f32 %v2030_v15, %v4743_v18  ;;  %v2064_v20 = vpop.f32.mrb[125].mxu0 }
 0x225   : > { %v1809_v39 = vpop.f32.mrb[140].mxu1 }
 0x226   : > { %2206 = vst [vmem:[%s4787_s5 + $0xa0] sm:$0xff] %v2174_v25  ;;  %v2143_v16 = vadd.f32 %v4777_v5, %v2104_v47  ;;  %v2035_v2 = vadd.f32 %v2034_v54, %v1809_v39  ;;  %v1811_v28 = vpop.f32.mrb[141].mxu1 }
 0x227   : > { %v4848_v6 = vpop.f32.mrb[126].mxu0 }
 0x228   : > { %v2175_v4 = vmax.f32 %v2143_v16, 0.0  ;;  %v2105_v58 = vadd.f32 %v2035_v2, %v4752_v17  ;;  %v2074_v34 = vpop.f32.mrb[127].mxu0 }
 0x229   : > { %v1814_v55 = vpop.f32.mrb[142].mxu1 }
 0x22a   : > { %2207 = vst [vmem:[%s4787_s5 + $0xa8] sm:$0xff] %v2175_v4  ;;  %v2144_v7 = vadd.f32 %v4777_v5, %v2105_v58  ;;  %v2040_v18 = vadd.f32 %v2731_v23, %v1814_v55  ;;  %v1816_v48 = vpop.f32.mrb[143].mxu1 }
 0x22c   : > { %v2176_v43 = vmax.f32 %v2144_v7, 0.0  ;;  %v2106_v63 = vadd.f32 %v2040_v18, %v4749_v46 }
 0x22d   : > { %v1819_v12 = vpop.f32.mrb[144].mxu1 }
 0x22e   : > { %2208 = vst [vmem:[%s4787_s5 + $0xb0] sm:$0xff] %v2176_v43  ;;  %v2145_v19 = vadd.f32 %v4777_v5, %v2106_v63  ;;  %v2045_v21 = vadd.f32 %v2044_v33, %v1819_v12  ;;  %v1821_v42 = vpop.f32.mrb[145].mxu1 }
 0x230   : > { %v2177_v3 = vmax.f32 %v2145_v19, 0.0  ;;  %v2107_v17 = vadd.f32 %v2045_v21, %v4758_v27 }
 0x231   : > { %v1824_v56 = vpop.f32.mrb[146].mxu1 }
 0x232   : > { %2209 = vst [vmem:[%s4787_s5 + $0xb8] sm:$0xff] %v2177_v3  ;;  %v2146_v22 = vadd.f32 %v4777_v5, %v2107_v17  ;;  %v2050_v60 = vadd.f32 %v2734_v26, %v1824_v56  ;;  %v1826_v24 = vpop.f32.mrb[147].mxu1 }
 0x234   : > { %v2178_v61 = vmax.f32 %v2146_v22, 0.0  ;;  %v2108_v46 = vadd.f32 %v2050_v60, %v4755_v41 }
 0x235   : > { %v1829_v59 = vpop.f32.mrb[148].mxu1 }
 0x236   : > { %2210 = vst [vmem:[%s4787_s5 + $0xc0] sm:$0xff] %v2178_v61  ;;  %v2147_v23 = vadd.f32 %v4777_v5, %v2108_v46  ;;  %v2055_v11 = vadd.f32 %v2054_v38, %v1829_v59  ;;  %v1831_v10 = vpop.f32.mrb[149].mxu1 }
 0x238   : > { %v2179_v54 = vmax.f32 %v2147_v23, 0.0  ;;  %v2109_v27 = vadd.f32 %v2055_v11, %v4763_v32 }
 0x239   : > { %v1834_v8 = vpop.f32.mrb[150].mxu1 }
 0x23a   : > { %2211 = vst [vmem:[%s4787_s5 + $0xc8] sm:$0xff] %v2179_v54  ;;  %v2148_v40 = vadd.f32 %v4777_v5, %v2109_v27  ;;  %v2060_v14 = vadd.f32 %v2737_v52, %v1834_v8  ;;  %v1836_v9 = vpop.f32.mrb[151].mxu1 }
 0x23c   : > { %v2180_v26 = vmax.f32 %v2148_v40, 0.0  ;;  %v2110_v41 = vadd.f32 %v2060_v14, %v4760_v45 }
 0x23d   : > { %v1839_v1 = vpop.f32.mrb[152].mxu1 }
 0x23e   : > { %2212 = vst [vmem:[%s4787_s5 + $0xd0] sm:$0xff] %v2180_v26  ;;  %v2149_v51 = vadd.f32 %v4777_v5, %v2110_v41  ;;  %v2065_v33 = vadd.f32 %v2064_v20, %v1839_v1  ;;  %v1841_v50 = vpop.f32.mrb[153].mxu1 }
 0x240   : > { %v2181_v37 = vmax.f32 %v2149_v51, 0.0  ;;  %v2111_v32 = vadd.f32 %v2065_v33, %v4767_v29 }
 0x241   : > { %v1844_v0 = vpop.f32.mrb[154].mxu1 }
 0x242   : > { %2213 = vst [vmem:[%s4787_s5 + $0xd8] sm:$0xff] %v2181_v37  ;;  %v2150_v35 = vadd.f32 %v4777_v5, %v2111_v32  ;;  %v2070_v52 = vadd.f32 %v2740_v36, %v1844_v0  ;;  %v1846_v31 = vpop.f32.mrb[155].mxu1 }
 0x244   : > { %v2182_v62 = vmax.f32 %v2150_v35, 0.0  ;;  %v2112_v45 = vadd.f32 %v2070_v52, %v4765_v44 }
 0x245   : > { %v1849_v38 = vpop.f32.mrb[156].mxu1 }
 0x246   : > { %2214 = vst [vmem:[%s4787_s5 + $0xe0] sm:$0xff] %v2182_v62  ;;  %v2151_v53 = vadd.f32 %v4777_v5, %v2112_v45  ;;  %v2075_v30 = vadd.f32 %v2074_v34, %v1849_v38  ;;  %v1851_v15 = vpop.f32.mrb[157].mxu1 }
 0x248   : > { %v2183_v29 = vmax.f32 %v2151_v53, 0.0  ;;  %v2113_v49 = vadd.f32 %v2075_v30, %v4771_v13 }
 0x249   : > { %v1854_v25 = vpop.f32.mrb[158].mxu1 }
 0x24a   : > { %2215 = vst [vmem:[%s4787_s5 + $0xe8] sm:$0xff] %v2183_v29  ;;  %v2152_v36 = vadd.f32 %v4777_v5, %v2113_v49  ;;  %v2080_v44 = vadd.f32 %v4848_v6, %v1854_v25  ;;  %v1856_v47 = vpop.f32.mrb[159].mxu1 }
 0x24c   : > { %v2184_v20 = vmax.f32 %v2152_v36, 0.0  ;;  %v2114_v39 = vadd.f32 %v2080_v44, %v4769_v57 }
 0x24e   : > { %2216 = vst [vmem:[%s4787_s5 + $0xf0] sm:$0xff] %v2184_v20  ;;  %v2153_v16 = vadd.f32 %v4777_v5, %v2114_v39 }
 0x250   : > { %v2185_v13 = vmax.f32 %v2153_v16, 0.0 }
 0x252   : > { %2217 = vst [vmem:[%s4787_s5 + $0xf8] sm:$0xff] %v2185_v13 }
 0x253   : > { %3086 = shalt.err (!%p3083_p5)
}
 0x254   : > { %s3087_s26 = scalar_lea.hbm %s4886_s10, 4096  ;;  %s3091_s21 = scalar_lea.hbm %s4942_s3, 8192 }
 0x255   : > { %p3088_p6 = scmp.ne.s32.totalorder %s4886_s10, %s3087_s26  ;;  %p3092_p10 = scmp.lt.u32.totalorder %s4886_s10, %s4942_s3 }
 0x256   : > { %p3093_p11 = scmp.lt.u32.totalorder %s3091_s21, %s3087_s26  ;;  %p3095_p13 = scmp.lt.u32.totalorder %s3087_s26, %s4886_s10 }
 0x257   : > { %p3089_p7 = pnand %p3088_p6, %p3217_p4 }
 0x258   : > { %p3094_p12 = por %p3093_p11, %p3092_p10 }
 0x259   : > { %p3090_p9 = pneg %p3089_p7 }
 0x25a   : > { %p3096_p0 = por %p3095_p13, %p3094_p12 }
 0x25c   : > { %p3097_p1 = pnand %p3096_p0, %p3090_p9 }
 0x25e   : > { %3100 = shalt.err (!%p3097_p1)
}
 0x25f   : > { %s3155_s4 = smov 128   ;;  %s3156_s5 = smov 8  }
 0x260   : > { %2985 = dma.vmem_to_hbm [thread:$0]  (%p3217_p4), %s4888_s7, 4096, %s4886_s10, %s4893_s11, %s3155_s4, %s3155_s4, %s3156_s5  }
 0x261 PF: > { %p2991_p2 = scmp.ge.s32.totalorder %s3151_s17, 2  ;;  %s2251_s6 = sand.u32 1, %s3131_s12  }
 0x262   : > { %s2252_s8 = scalar_lea.sflag [#allocation3], %s2251_s6 }
 0x263   : > { %p2988_p3 = pnand %p2991_p2, %p3224_p8 }
 0x265   : > { %3126 = dma.done.wait (!%p2988_p3), %s2252_s8, 4096  }
 0x266   : > { %3128 = vsyncadd (!%p2988_p3), %s2252_s8, 4294963200  ;;  %s16_s17 = sadd.s32 1, %s3151_s17   ;;  %s5103_s12 = smov %s3135_s13 }
 0x267   : > { %p13_p5 = scmp.ge.s32.totalorder %s16_s17, 4   ;;  %s5104_s13 = smov %s3139_s14 }
 0x268   : > { %s5105_s14 = smov %s3230_s25  ;;  %s5106_s15 = smov %s3147_s16 }
 0x269   : > { %s5107_s16 = smov %s5109_s20  ;;  %15 = sbr.rel (!%p13_p5) target bundleno = 4 (0x4), region = 74 }
 0x270   :  { %2257 = vsyncpa [#allocation3], 1 }
 0x271   :  { %2259 = vsyncpa [#allocation3 + $0x1], 1 }

// kernel: tpu_custom_call.1
= control target key start
LH: loop header
LB: loop body
LE: loop exit
PB: predicated region body
PF: predicated region fallthrough
CT: control target
= control target key end

     0   :  { %8 = vsyncpa [#allocation3], 0  ;;  %s4937_s0 = inlined_call_operand.vmem [shape: f32[2,18,18,128], index: 0, kind: input, shape index: {}]   ;;  %s4938_s1 = inlined_call_operand.vmem [shape: f32[1152,128], index: 1, kind: input, shape index: {}]   ;;  %s4939_s2 = inlined_call_operand.vmem [shape: f32[1,128], index: 2, kind: input, shape index: {}]   ;;  %s4940_s3 = inlined_call_operand.hbm [shape: f32[2,16,16,128], index: 3, kind: output, shape index: {}]  }
   0x1   :  { %10 = vsyncpa [#allocation3 + $0x1], 0  ;;  %s3175_s12 = smov 0   ;;  %s3177_s13 = smov 0  }
   0x2   :  { %s3179_s14 = smov 0   ;;  %s3181_s15 = smov 0  }
   0x3   :  { %s3183_s16 = smov 0   ;;  %s3185_s17 = smov 0  }
   0x4 LB: > { %s2342_s18 = sadd.s32 4294967295, %s3149_s17   ;;  %s2343_s19 = sadd.s32 4294967294, %s3149_s17   ;;  %s3149_s17 = sphi %s3185_s17, %s16_s17   ;;  %s3145_s16 = sphi %s3183_s16, %s5105_s16   ;;  %s3141_s15 = sphi %s3181_s15, %s5104_s15   ;;  %s3137_s14 = sphi %s3179_s14, %s5103_s14   ;;  %s3133_s13 = sphi %s3177_s13, %s5102_s13   ;;  %s3129_s12 = sphi %s3175_s12, %s5101_s12  }
   0x5   : > { %s35_s20 = sadd.s32 1, %s3145_s16  ;;  %s124_s21 = sadd.s32 1, %s3137_s14 }
   0x6   : > { %p37_p0 = scmp.ge.s32.totalorder %s35_s20, 2  ;;  %p134_p1 = scmp.ne.s32.totalorder %s3137_s14, %s3133_s13 }
   0x7   : > { %p135_p2 = scmp.eq.s32.totalorder %s2342_s18, 1  ;;  %p140_p3 = scmp.ne.s32.totalorder %s3133_s13, %s3129_s12 }
   0x8   : > { %s5107_s20 = smov (%p37_p0, %s35_s20), 0  ;;  %p141_p5 = scmp.eq.s32.totalorder %s2343_s19, 1 }
   0x9   : > { %p3215_p4 = por %p135_p2, %p134_p1  ;;  %s117_s23 = ssub.s32 %s3145_s16, %s5107_s20 }
   0xa   : > { %p2348_p6 = scmp.ge.s32.totalorder %s3149_s17, 1  ;;  %p122_p7 = scmp.eq.s32.totalorder %s117_s23, 0 }
   0xb   : > { %p3222_p8 = por %p141_p5, %p140_p3  ;;  %p180_p9 = scmp.lt.s32.totalorder %s3149_s17, 3 }
   0xc   : > { %s3228_s25 = scalar_select %p122_p7, %s3137_s14, %s124_s21  }
   0xd   : > { %p181_p10 = pnand %p2348_p6, %p180_p9 }
   0xf   : > { %184 = sbr.rel (%p181_p10) target bundleno = 609 (0x261), region = 32 }
  0x16   : > { %v620_v0 = vld [vmem:[%s4938_s1 + $0x180] sm:$0xff]  ;;  %v621_v1 = vld [vmem:[%s4938_s1 + $0x188] sm:$0xff]  ;;  %p211_p11 = scmp.lt.s32.totalorder %s3141_s15, 1  ;;  %v4943_v3 = vmov 0.0|0.0   ;;  %v622_v6 = vld [vmem:[%s4938_s1 + $0x190] sm:$0xff]  ;;  %vm442_vm0 = vcmask 1045504  }
  0x17   : > { %v652_v2 = vld [vmem:[%s4938_s1 + $0x280] sm:$0xff]  ;;  %2742 = vmatprep.subr.bf16.mxu0 %v4943_v3  ;;  %v2743_v4 = vpack.c.bf16 %v621_v1, %v620_v0  ;;  %v653_v5 = vld [vmem:[%s4938_s1 + $0x288] sm:$0xff]  ;;  %v623_v7 = vld [vmem:[%s4938_s1 + $0x198] sm:$0xff]  ;;  %vm329_vm1 = vcmask 1046528   ;;  %s2357_s6 = sshll.u32 %s3141_s15, 12  ;;  %s3152_s18 = smov [#allocation2]  }
  0x18   : > { %v2790_v8 = vpack.c.bf16 %v653_v5, %v652_v2  ;;  %v654_v9 = vld [vmem:[%s4938_s1 + $0x290] sm:$0xff]  ;;  %v655_v10 = vld [vmem:[%s4938_s1 + $0x298] sm:$0xff]  ;;  %s212_s23 = scalar_select %p211_p11, %s3141_s15, 1  ;;  %v2746_v11 = vpack.c.bf16 %v623_v7, %v622_v6  ;;  %v656_v13 = vld [vmem:[%s4938_s1 + $0x2a0] sm:$0xff] }
  0x19   : > { %2744 = vmatpush1.bf16.msra.mxu0 %v2743_v4  ;;  %v2794_v12 = vpack.c.bf16 %v655_v10, %v654_v9  ;;  %v657_v14 = vld [vmem:[%s4938_s1 + $0x2a8] sm:$0xff]  ;;  %v624_v15 = vld [vmem:[%s4938_s1 + $0x1a0] sm:$0xff]  ;;  %v658_v19 = vld [vmem:[%s4938_s1 + $0x2b0] sm:$0xff]  ;;  %s4884_s10 = scalar_lea.hbm %s4940_s3, %s2357_s6  ;;  %s3075_s19 = sshll.u32 %s3152_s18, 4  ;;  %s3076_s19 = int_to_ptr.vmem [resolvable:$false] %s3075_s19 }
  0x1a   : > { %2791 = vmatprep.subr.bf16.mxu1 %v2790_v8  ;;  %2745 = vmatprep.subr.bf16.mxu0 %v4943_v3  ;;  %v625_v16 = vld [vmem:[%s4938_s1 + $0x1a8] sm:$0xff]  ;;  %s2982_s7 = smul.u32 432, %s212_s23  ;;  %v2798_v17 = vpack.c.bf16 %v657_v14, %v656_v13  ;;  %v659_v20 = vld [vmem:[%s4938_s1 + $0x2b8] sm:$0xff]  ;;  %v626_v21 = vld [vmem:[%s4938_s1 + $0x1b0] sm:$0xff]  ;;  %s3077_s23 = scalar_lea.vmem %s3076_s19, 8192 }
  0x1b   : > { %2793 = vmatpush3.bf16.msra.mxu1 %v2790_v8  ;;  %v2749_v18 = vpack.c.bf16 %v625_v16, %v624_v15  ;;  %v627_v22 = vld [vmem:[%s4938_s1 + $0x1b8] sm:$0xff]  ;;  %v2802_v23 = vpack.c.bf16 %v659_v20, %v658_v19  ;;  %v660_v26 = vld [vmem:[%s4938_s1 + $0x2c0] sm:$0xff]  ;;  %v661_v27 = vld [vmem:[%s4938_s1 + $0x2c8] sm:$0xff] }
  0x1c   : > { %2795 = vmatprep.subr.bf16.mxu1 %v2794_v12  ;;  %s3279_s21 = scalar_lea.vmem %s4937_s0, %s2982_s7  ;;  %v2752_v25 = vpack.c.bf16 %v627_v22, %v626_v21  ;;  %v628_v31 = vld [vmem:[%s4938_s1 + $0x1c0] sm:$0xff]  ;;  %v629_v32 = vld [vmem:[%s4938_s1 + $0x1c8] sm:$0xff]  ;;  %v2806_v35 = vpack.c.bf16 %v661_v27, %v660_v26  ;;  %v662_v39 = vld [vmem:[%s4938_s1 + $0x2d0] sm:$0xff] }
  0x1d   : > { %2747 = vmatpush1.bf16.msra.mxu0 %v2746_v11  ;;  %v3289_v24 = vld [vmem:[%s3279_s21 + $0x18] sm:$0xff]  ;;  %v3298_v28 = vld [vmem:[%s3279_s21 + $0x20] sm:$0xff]  ;;  %v2755_v38 = vpack.c.bf16 %v629_v32, %v628_v31  ;;  %v630_v41 = vld [vmem:[%s4938_s1 + $0x1d0] sm:$0xff] }
  0x1e   : > { %2748 = vmatprep.subr.bf16.mxu0 %v4943_v3  ;;  %v448_v29 = vrot.slane %v3289_v24, 2  ;;  %v335_v30 = vrot.slane %v3289_v24, 1  ;;  %v449_v33 = vrot.slane %v3298_v28, 2  ;;  %v336_v34 = vrot.slane %v3298_v28, 1  ;;  %v663_v40 = vld [vmem:[%s4938_s1 + $0x2d8] sm:$0xff]  ;;  %v664_v45 = vld [vmem:[%s4938_s1 + $0x2e0] sm:$0xff] }
  0x1f   : > { %2797 = vmatpush3.bf16.msra.mxu1 %v2794_v12  ;;  %v631_v42 = vld [vmem:[%s4938_s1 + $0x1d8] sm:$0xff]  ;;  %v2810_v43 = vpack.c.bf16 %v663_v40, %v662_v39  ;;  %v665_v46 = vld [vmem:[%s4938_s1 + $0x2e8] sm:$0xff]  ;;  %v632_v47 = vld [vmem:[%s4938_s1 + $0x1e0] sm:$0xff] }
  0x20   : > { %2799 = vmatprep.subr.bf16.mxu1 %v2798_v17  ;;  %v3314_v36 = vsel %vm442_vm0, %v448_v29, %v449_v33  ;;  %v3319_v37 = vsel %vm329_vm1, %v335_v30, %v336_v34  ;;  %v2758_v44 = vpack.c.bf16 %v631_v42, %v630_v41  ;;  %v633_v48 = vld [vmem:[%s4938_s1 + $0x1e8] sm:$0xff]  ;;  %v2814_v49 = vpack.c.bf16 %v665_v46, %v664_v45  ;;  %v666_v51 = vld [vmem:[%s4938_s1 + $0x2f0] sm:$0xff]  ;;  %v667_v52 = vld [vmem:[%s4938_s1 + $0x2f8] sm:$0xff] }
  0x21   : > { %2750 = vmatpush1.bf16.msra.mxu0 %v2749_v18  ;;  %5018 = vst [vmem:[#allocation5_spill] sm:$0xff] %v3314_v36  ;;  %2534 = vmatprep.mubr.f32.mxu1 %v3314_v36  ;;  %v2761_v50 = vpack.c.bf16 %v633_v48, %v632_v47  ;;  %v634_v53 = vld [vmem:[%s4938_s1 + $0x1f0] sm:$0xff]  ;;  %v635_v54 = vld [vmem:[%s4938_s1 + $0x1f8] sm:$0xff]  ;;  %v2818_v55 = vpack.c.bf16 %v667_v52, %v666_v51  ;;  %v3363_v56 = vld [vmem:[%s3279_s21 + $0x28] sm:$0x3] }
  0x22   : > { %2751 = vmatprep.subr.bf16.mxu0 %v4943_v3  ;;  %732 = vmatprep.mubr.f32.mxu0 %v3319_v37  ;;  %v2764_v57 = vpack.c.bf16 %v635_v54, %v634_v53  ;;  %v3366_v58 = vld [vmem:[%s3279_s21 + $0x30] sm:$0xff]  ;;  %v3369_v59 = vld [vmem:[%s3279_s21 + $0x38] sm:$0xff]  ;;  %v636_v60 = vld [vmem:[%s4938_s1 + $0x200] sm:$0xff]  ;;  %v451_v62 = vrot.slane %v3363_v56, 2 }
  0x23   : > { %2801 = vmatpush3.bf16.msra.mxu1 %v2798_v17  ;;  %v637_v61 = vld [vmem:[%s4938_s1 + $0x208] sm:$0xff]  ;;  %v555_v63 = vld [vmem:[%s4938_s1] sm:$0xff]  ;;  %v453_v1 = vrot.slane %v3366_v58, 2  ;;  %v454_v2 = vrot.slane %v3369_v59, 2  ;;  %v3394_v7 = vld [vmem:[%s3279_s21 + $0x50] sm:$0xff] }
  0x24   : > { %2803 = vmatprep.subr.bf16.mxu1 %v2802_v23  ;;  %v556_v0 = vld [vmem:[%s4938_s1 + $0x8] sm:$0xff]  ;;  %v3388_v4 = vld [vmem:[%s3279_s21 + $0x40] sm:$0x3]  ;;  %v2767_v5 = vpack.c.bf16 %v637_v61, %v636_v60  ;;  %v638_v8 = vld [vmem:[%s4938_s1 + $0x210] sm:$0xff]  ;;  %v3406_v10 = vsel %vm442_vm0, %v449_v33, %v451_v62  ;;  %v459_v17 = vrot.slane %v3394_v7, 2 }
  0x25   : > { %2753 = vmatpush1.bf16.msra.mxu0 %v2752_v25  ;;  %v3391_v6 = vld [vmem:[%s3279_s21 + $0x48] sm:$0xff]  ;;  %v639_v9 = vld [vmem:[%s4938_s1 + $0x218] sm:$0xff]  ;;  %5019 = vst [vmem:[#allocation6_spill] sm:$0xff] %v3406_v10  ;;  %v2823_v11 = vpack.c.bf16 %v556_v0, %v555_v63  ;;  %v456_v12 = vrot.slane %v3388_v4, 2  ;;  %v3411_v13 = vsel %vm442_vm0, %v453_v1, %v454_v2  ;;  %v557_v14 = vld [vmem:[%s4938_s1 + $0x10] sm:$0xff] }
  0x26   : > { %2754 = vmatprep.subr.bf16.mxu0 %v4943_v3  ;;  %5020 = vst [vmem:[#allocation7_spill] sm:$0xff] %v3411_v13  ;;  %v558_v15 = vld [vmem:[%s4938_s1 + $0x18] sm:$0xff]  ;;  %v458_v16 = vrot.slane %v3391_v6, 2  ;;  %v2770_v19 = vpack.c.bf16 %v639_v9, %v638_v8  ;;  %v3425_v20 = vld [vmem:[%s3279_s21 + $0x60] sm:$0xff]  ;;  %v3428_v21 = vld [vmem:[%s3279_s21 + $0x68] sm:$0xff] }
  0x27   : > { %2805 = vmatpush3.bf16.msra.mxu1 %v2802_v23  ;;  %v3422_v18 = vld [vmem:[%s3279_s21 + $0x58] sm:$0x3]  ;;  %v640_v22 = vld [vmem:[%s4938_s1 + $0x220] sm:$0xff]  ;;  %v641_v23 = vld [vmem:[%s4938_s1 + $0x228] sm:$0xff]  ;;  %v3440_v25 = vsel %vm442_vm0, %v454_v2, %v456_v12  ;;  %v2826_v26 = vpack.c.bf16 %v558_v15, %v557_v14  ;;  %v463_v32 = vrot.slane %v3425_v20, 2  ;;  %v464_v33 = vrot.slane %v3428_v21, 2 }
  0x28   : > { %2807 = vmatprep.subr.bf16.mxu1 %v2806_v35  ;;  %5021 = vst [vmem:[#allocation8_spill] sm:$0xff] %v3440_v25  ;;  %v461_v27 = vrot.slane %v3422_v18, 2  ;;  %v3445_v29 = vsel %vm442_vm0, %v458_v16, %v459_v17  ;;  %v559_v30 = vld [vmem:[%s4938_s1 + $0x20] sm:$0xff]  ;;  %v560_v31 = vld [vmem:[%s4938_s1 + $0x28] sm:$0xff]  ;;  %v3459_v39 = vld [vmem:[%s3279_s21 + $0x78] sm:$0xff] }
  0x29   : > { %2756 = vmatpush1.bf16.msra.mxu0 %v2755_v38  ;;  %5022 = vst [vmem:[#allocation9_spill] sm:$0xff] %v3445_v29  ;;  %v2773_v38 = vpack.c.bf16 %v641_v23, %v640_v22  ;;  %v3462_v40 = vld [vmem:[%s3279_s21 + $0x80] sm:$0xff]  ;;  %v642_v41 = vld [vmem:[%s4938_s1 + $0x230] sm:$0xff]  ;;  %v643_v42 = vld [vmem:[%s4938_s1 + $0x238] sm:$0xff]  ;;  %v3479_v46 = vsel %vm442_vm0, %v463_v32, %v464_v33 }
  0x2a   : > { %2757 = vmatprep.subr.bf16.mxu0 %v4943_v3  ;;  %5024 = vst [vmem:[#allocation11_spill] sm:$0xff] %v3479_v46  ;;  %v561_v47 = vld [vmem:[%s4938_s1 + $0x30] sm:$0xff]  ;;  %v562_v48 = vld [vmem:[%s4938_s1 + $0x38] sm:$0xff]  ;;  %v3490_v51 = vld [vmem:[%s3279_s21 + $0x88] sm:$0x3]  ;;  %v2776_v52 = vpack.c.bf16 %v643_v42, %v642_v41 }
  0x2b   : > { %2809 = vmatpush3.bf16.msra.mxu1 %v2806_v35  ;;  %v3456_v35 = vld [vmem:[%s3279_s21 + $0x70] sm:$0x3]  ;;  %v3496_v54 = vld [vmem:[%s3279_s21 + $0x98] sm:$0xff]  ;;  %v2832_v61 = vpack.c.bf16 %v562_v48, %v561_v47  ;;  %v471_v62 = vrot.slane %v3490_v51, 2  ;;  %v563_v0 = vld [vmem:[%s4938_s1 + $0x40] sm:$0xff] }
  0x2c   : > { %2811 = vmatprep.subr.bf16.mxu1 %v2810_v43  ;;  %v466_v45 = vrot.slane %v3456_v35, 2  ;;  %v3493_v53 = vld [vmem:[%s3279_s21 + $0x90] sm:$0xff]  ;;  %v564_v1 = vld [vmem:[%s4938_s1 + $0x48] sm:$0xff]  ;;  %v3524_v8 = vld [vmem:[%s3279_s21 + $0xa0] sm:$0x3] }
  0x2d   : > { %2759 = vmatpush1.bf16.msra.mxu0 %v2758_v44  ;;  %v2829_v44 = vpack.c.bf16 %v560_v31, %v559_v30  ;;  %v473_v2 = vrot.slane %v3493_v53, 2  ;;  %v3530_v12 = vld [vmem:[%s3279_s21 + $0xb0] sm:$0xff]  ;;  %v647_v15 = vld [vmem:[%s4938_s1 + $0x258] sm:$0xff]  ;;  %v648_v41 = vld [vmem:[%s4938_s1 + $0x260] sm:$0xff] }
  0x2e   : > { %2760 = vmatprep.subr.bf16.mxu0 %v4943_v3  ;;  %v3508_v60 = vsel %vm442_vm0, %v464_v33, %v466_v45  ;;  %v646_v14 = vld [vmem:[%s4938_s1 + $0x250] sm:$0xff]  ;;  %v479_v30 = vrot.slane %v3530_v12, 2  ;;  %v3558_v31 = vld [vmem:[%s3279_s21 + $0xb8] sm:$0x3]  ;;  %v3561_v33 = vld [vmem:[%s3279_s21 + $0xc0] sm:$0xff] }
  0x2f   : > { %2813 = vmatpush3.bf16.msra.mxu1 %v2810_v43  ;;  %v3474_v43 = vsel %vm442_vm0, %v459_v17, %v461_v27  ;;  %5025 = vst [vmem:[#allocation12_spill] sm:$0xff] %v3508_v60  ;;  %v2835_v17 = vpack.c.bf16 %v564_v1, %v563_v0  ;;  %v565_v23 = vld [vmem:[%s4938_s1 + $0x50] sm:$0xff]  ;;  %v2782_v32 = vpack.c.bf16 %v647_v15, %v646_v14  ;;  %v649_v42 = vld [vmem:[%s4938_s1 + $0x268] sm:$0xff]  ;;  %v481_v47 = vrot.slane %v3558_v31, 2  ;;  %v3598_v0 = vld [vmem:[%s3279_s21 + $0xe0] sm:$0xff] }
  0x30   : > { %2815 = vmatprep.subr.bf16.mxu1 %v2814_v49  ;;  %5023 = vst [vmem:[#allocation10_spill] sm:$0xff] %v3474_v43  ;;  %v650_v1 = vld [vmem:[%s4938_s1 + $0x270] sm:$0xff]  ;;  %v587_v15 = vld [vmem:[%s4938_s1 + $0x100] sm:$0xff] }
  0x31   : > { %2762 = vmatpush1.bf16.msra.mxu0 %v2761_v50  ;;  %v469_v50 = vrot.slane %v3462_v40, 2 }
  0x32   : > { %2763 = vmatprep.subr.bf16.mxu0 %v4943_v3 }
  0x33   : > { %2817 = vmatpush3.bf16.msra.mxu1 %v2814_v49  ;;  %v468_v49 = vrot.slane %v3459_v39, 2  ;;  %v3542_v16 = vsel %vm442_vm0, %v469_v50, %v471_v62  ;;  %v3595_v62 = vld [vmem:[%s3279_s21 + $0xd8] sm:$0xff] }
  0x34   : > { %2819 = vmatprep.subr.bf16.mxu1 %v2818_v55  ;;  %5027 = vst [vmem:[#allocation14_spill] sm:$0xff] %v3542_v16 }
  0x35   : > { %2765 = vmatpush1.bf16.msra.mxu0 %v2764_v57  ;;  %v645_v57 = vld [vmem:[%s4938_s1 + $0x248] sm:$0xff]  ;;  %v3513_v63 = vsel %vm442_vm0, %v468_v49, %v469_v50  ;;  %v567_v49 = vld [vmem:[%s4938_s1 + $0x60] sm:$0xff] }
  0x36   : > { %2766 = vmatprep.subr.bf16.mxu0 %v4943_v3  ;;  %5026 = vst [vmem:[#allocation13_spill] sm:$0xff] %v3513_v63  ;;  %v568_v50 = vld [vmem:[%s4938_s1 + $0x68] sm:$0xff] }
  0x37   : > { %2821 = vmatpush3.bf16.msra.mxu1 %v2818_v55  ;;  %v644_v55 = vld [vmem:[%s4938_s1 + $0x240] sm:$0xff] }
  0x38   : > { %2822 = vmatprep.subr.bf16.mxu1 %v4943_v3  ;;  %v2779_v9 = vpack.c.bf16 %v645_v57, %v644_v55  ;;  %v3592_v57 = vld [vmem:[%s3279_s21 + $0xd0] sm:$0x3] }
  0x39   : > { %2768 = vmatpush1.bf16.msra.mxu0 %v2767_v5  ;;  %v474_v5 = vrot.slane %v3496_v54, 2  ;;  %v486_v14 = vrot.slane %v3592_v57, 2 }
  0x3a   : > { %2535 = vmatmul.mubr.f32.vlgmr.msra.gmra.mrb[0].mxu1 %v3406_v10  ;;  %2769 = vmatprep.subr.bf16.mxu0 %v4943_v3 }
  0x3b   : > { %2824 = vmatpush1.bf16.msra.mxu1 %v2823_v11  ;;  %2537 = vmatprep.mubr.f32.mxu1 %v3411_v13  ;;  %v3527_v11 = vld [vmem:[%s3279_s21 + $0xa8] sm:$0xff]  ;;  %v3547_v22 = vsel %vm442_vm0, %v473_v2, %v474_v5  ;;  %v651_v2 = vld [vmem:[%s4938_s1 + $0x278] sm:$0xff]  ;;  %v343_v13 = vrot.slane %v3388_v4, 1 }
  0x3c   : > { %2825 = vmatprep.subr.bf16.mxu1 %v4943_v3  ;;  %5028 = vst [vmem:[#allocation15_spill] sm:$0xff] %v3547_v22  ;;  %v478_v27 = vrot.slane %v3527_v11, 2  ;;  %v594_v4 = vld [vmem:[%s4938_s1 + $0x138] sm:$0xff] }
  0x3d   : > { %2771 = vmatpush1.bf16.msra.mxu0 %v2770_v19  ;;  %v476_v19 = vrot.slane %v3524_v8, 2 }
  0x3e   : > { %2538 = vmatmul.mubr.f32.gmra.mrb[2].mxu1 %v3440_v25  ;;  %2772 = vmatprep.subr.bf16.mxu0 %v4943_v3  ;;  %v3581_v48 = vsel %vm442_vm0, %v478_v27, %v479_v30  ;;  %v488_v27 = vrot.slane %v3595_v62, 2 }
  0x3f   : > { %2827 = vmatpush1.bf16.msra.mxu1 %v2826_v26  ;;  %2540 = vmatprep.mubr.f32.mxu1 %v3445_v29  ;;  %v566_v26 = vld [vmem:[%s4938_s1 + $0x58] sm:$0xff]  ;;  %5030 = vst [vmem:[#allocation17_spill] sm:$0xff] %v3581_v48 }
  0x40   : > { %2828 = vmatprep.subr.bf16.mxu1 %v4943_v3  ;;  %v2838_v45 = vpack.c.bf16 %v566_v26, %v565_v23  ;;  %v569_v23 = vld [vmem:[%s4938_s1 + $0x70] sm:$0xff]  ;;  %v570_v26 = vld [vmem:[%s4938_s1 + $0x78] sm:$0xff] }
  0x41   : > { %2774 = vmatpush1.bf16.msra.mxu0 %v2773_v38  ;;  %v3564_v38 = vld [vmem:[%s3279_s21 + $0xc8] sm:$0xff] }
  0x42   : > { %2541 = vmatmul.mubr.f32.gmra.mrb[4].mxu1 %v3474_v43  ;;  %2775 = vmatprep.subr.bf16.mxu0 %v4943_v3  ;;  %v484_v55 = vrot.slane %v3564_v38, 2 }
  0x43   : > { %2830 = vmatpush1.bf16.msra.mxu1 %v2829_v44  ;;  %2543 = vmatprep.mubr.f32.mxu1 %v3479_v46  ;;  %v3576_v44 = vsel %vm442_vm0, %v474_v5, %v476_v19  ;;  %v3610_v5 = vsel %vm442_vm0, %v479_v30, %v481_v47  ;;  %v489_v30 = vrot.slane %v3598_v0, 2  ;;  %v3639_v47 = vld [vmem:[%s3279_s21 + $0xf8] sm:$0xff]  ;;  %v3724_v46 = vld [vmem:[%s3279_s21 + $0x120] sm:$0xff] }
  0x44   : > { %2831 = vmatprep.subr.bf16.mxu1 %v4943_v3  ;;  %5029 = vst [vmem:[#allocation16_spill] sm:$0xff] %v3576_v44  ;;  %5031 = vst [vmem:[#allocation18_spill] sm:$0xff] %v3610_v5 }
  0x45   : > { %2777 = vmatpush1.bf16.msra.mxu0 %v2776_v52  ;;  %v483_v52 = vrot.slane %v3561_v33, 2  ;;  %5038 = vst [vmem:[#allocation24_spill] sm:$0xff] %v3724_v46 }
  0x46   : > { %2544 = vmatmul.mubr.f32.gmra.mrb[6].mxu1 %v3508_v60  ;;  %2778 = vmatprep.subr.bf16.mxu0 %v4943_v3  ;;  %v3720_v60 = vld [vmem:[%s3279_s21 + $0x118] sm:$0x3] }
  0x47   : > { %2833 = vmatpush1.bf16.msra.mxu1 %v2832_v61  ;;  %2546 = vmatprep.mubr.f32.mxu1 %v3513_v63  ;;  %v2785_v61 = vpack.c.bf16 %v649_v42, %v648_v41  ;;  %v3621_v19 = vsel %vm442_vm0, %v483_v52, %v484_v55  ;;  %v2788_v41 = vpack.c.bf16 %v651_v2, %v650_v1  ;;  %v338_v42 = vrot.slane %v3363_v56, 1  ;;  %v572_v1 = vld [vmem:[%s4938_s1 + $0x88] sm:$0xff]  ;;  %v589_v2 = vld [vmem:[%s4938_s1 + $0x110] sm:$0xff]  ;;  %v591_v63 = vld [vmem:[%s4938_s1 + $0x120] sm:$0xff] }
  0x48   : > { %2834 = vmatprep.subr.bf16.mxu1 %v4943_v3  ;;  %5032 = vst [vmem:[#allocation19_spill] sm:$0xff] %v3621_v19  ;;  %v3648_v56 = vsel %vm442_vm0, %v484_v55, %v486_v14  ;;  %v2844_v52 = vpack.c.bf16 %v570_v26, %v569_v23  ;;  %v3662_v55 = vsel %vm442_vm0, %v488_v27, %v489_v30  ;;  %v3670_v23 = vld [vmem:[%s3279_s21 + $0x10] sm:$0x3]  ;;  %v3684_v27 = vld [vmem:[%s3279_s21] sm:$0xff] }
  0x49   : > { %2780 = vmatpush1.bf16.msra.mxu0 %v2779_v9  ;;  %v2841_v9 = vpack.c.bf16 %v568_v50, %v567_v49  ;;  %v571_v49 = vld [vmem:[%s4938_s1 + $0x80] sm:$0xff]  ;;  %5033 = vst [vmem:[#allocation20_spill] sm:$0xff] %v3648_v56  ;;  %5034 = vst [vmem:[#allocation21_spill] sm:$0xff] %v3662_v55  ;;  %v3675_v26 = vsel %vm329_vm1, %v336_v34, %v338_v42  ;;  %v443_v34 = vrot.slane %v3684_v27, 2 }
  0x4a   : > { %2547 = vmatmul.mubr.f32.gmra.mrb[8].mxu1 %v3542_v16  ;;  %2781 = vmatprep.subr.bf16.mxu0 %v4943_v3 }
  0x4b   : > { %2836 = vmatpush1.bf16.msra.mxu1 %v2835_v17  ;;  %2549 = vmatprep.mubr.f32.mxu1 %v3547_v22  ;;  %v588_v17 = vld [vmem:[%s4938_s1 + $0x108] sm:$0xff] }
  0x4c   : > { %2837 = vmatprep.subr.bf16.mxu1 %v4943_v3  ;;  %v2870_v50 = vpack.c.bf16 %v588_v17, %v587_v15  ;;  %v494_v15 = vrot.slane %v3639_v47, 2  ;;  %v3667_v17 = vld [vmem:[%s3279_s21 + $0x100] sm:$0x3] }
  0x4d   : > { %2783 = vmatpush1.bf16.msra.mxu0 %v2782_v32  ;;  %v3632_v32 = vld [vmem:[%s3279_s21 + $0xe8] sm:$0x3]  ;;  %v496_v16 = vrot.slane %v3667_v17, 2 }
  0x4e   : > { %2550 = vmatmul.mubr.f32.gmra.mrb[10].mxu1 %v3576_v44  ;;  %2784 = vmatprep.subr.bf16.mxu0 %v4943_v3  ;;  %v341_v44 = vrot.slane %v3369_v59, 1 }
  0x4f   : > { %2839 = vmatpush1.bf16.msra.mxu1 %v2838_v45  ;;  %2552 = vmatprep.mubr.f32.mxu1 %v3581_v48  ;;  %v3636_v45 = vld [vmem:[%s3279_s21 + $0xf0] sm:$0xff]  ;;  %v340_v48 = vrot.slane %v3366_v58, 1 }
  0x50   : > { %2840 = vmatprep.subr.bf16.mxu1 %v4943_v3  ;;  %v493_v14 = vrot.slane %v3636_v45, 2 }
  0x51   : > { %2786 = vmatpush1.bf16.msra.mxu0 %v2785_v61  ;;  %v491_v61 = vrot.slane %v3632_v32, 2  ;;  %v3737_v25 = vsel %vm329_vm1, %v340_v48, %v341_v44  ;;  %v593_v48 = vld [vmem:[%s4938_s1 + $0x130] sm:$0xff] }
  0x52   : > { %2553 = vmatmul.mubr.f32.gmra.mrb[12].mxu1 %v3610_v5  ;;  %2787 = vmatprep.subr.bf16.mxu0 %v4943_v3  ;;  %v446_v5 = vrot.slane %v3670_v23, 2  ;;  %v2882_v36 = vpack.c.bf16 %v594_v4, %v593_v48 }
  0x53   : > { %2842 = vmatpush1.bf16.msra.mxu1 %v2841_v9  ;;  %2555 = vmatprep.mubr.f32.mxu1 %v3621_v19  ;;  %v590_v9 = vld [vmem:[%s4938_s1 + $0x118] sm:$0xff]  ;;  %v3678_v19 = vld [vmem:[%s3279_s21 + $0x108] sm:$0xff]  ;;  %v3696_v42 = vsel %vm442_vm0, %v489_v30, %v491_v61  ;;  %v3709_v30 = vsel %vm442_vm0, %v493_v14, %v494_v15 }
  0x54   : > { %2843 = vmatprep.subr.bf16.mxu1 %v4943_v3  ;;  %v3681_v3 = vld [vmem:[%s3279_s21 + $0x110] sm:$0xff]  ;;  %v2874_v22 = vpack.c.bf16 %v590_v9, %v589_v2  ;;  %5035 = vst [vmem:[#allocation22_spill] sm:$0xff] %v3696_v42  ;;  %v592_v2 = vld [vmem:[%s4938_s1 + $0x128] sm:$0xff]  ;;  %v5036_v9 = vmov 0.0|0.0   ;;  %5037 = vst [vmem:[#allocation23_spill] sm:$0xff] %v3709_v30 }
  0x55   : > { %2789 = vmatpush1.bf16.msra.mxu0 %v2788_v41  ;;  %v3691_v41 = vld [vmem:[%s3279_s21 + $0x8] sm:$0xff]  ;;  %v574_v61 = vld [vmem:[%s4938_s1 + $0x98] sm:$0xff]  ;;  %v2878_v10 = vpack.c.bf16 %v592_v2, %v591_v63 }
  0x56   : > { %2556 = vmatmul.mubr.f32.gmra.mrb[14].mxu1 %v3648_v56  ;;  %2871 = vmatprep.subr.bf16.mxu0 %v2870_v50  ;;  %v2847_v56 = vpack.c.bf16 %v572_v1, %v571_v49  ;;  %v573_v49 = vld [vmem:[%s4938_s1 + $0x90] sm:$0xff]  ;;  %v498_v1 = vrot.slane %v3678_v19, 2  ;;  %v3727_v14 = vld [vmem:[%s3279_s21 + $0x128] sm:$0xff] }
  0x57   : > { %2845 = vmatpush1.bf16.msra.mxu1 %v2844_v52  ;;  %2558 = vmatprep.mubr.f32.mxu1 %v3662_v55  ;;  %v444_v52 = vrot.slane %v3691_v41, 2  ;;  %v499_v55 = vrot.slane %v3681_v3, 2  ;;  %5039 = vst [vmem:[#allocation25_spill] sm:$0xff] %v3727_v14  ;;  %v504_v2 = vrot.slane %v3727_v14, 2 }
  0x58   : > { %733 = vmatmul.mubr.f32.vlgmr.msra.gmra.mrb[0].mxu0 %v3289_v24  ;;  %2846 = vmatprep.subr.bf16.mxu1 %v5036_v9 }
  0x59   : > { %737 = vmatprep.mubr.f32.mxu0 %v3675_v26  ;;  %2873 = vmatpush3.bf16.msra.mxu0 %v2870_v50  ;;  %v3730_v43 = vsel %vm442_vm0, %v443_v34, %v444_v52  ;;  %v3733_v29 = vsel %vm442_vm0, %v444_v52, %v446_v5  ;;  %v3742_v50 = vsel %vm442_vm0, %v494_v15, %v496_v16  ;;  %v501_v34 = vrot.slane %v3720_v60, 2  ;;  %v575_v16 = vld [vmem:[%s4938_s1 + $0xa0] sm:$0xff]  ;;  %v3765_v52 = vld [vmem:[%s3279_s21 + $0x130] sm:$0x3] }
  0x5a   : > { %5040 = vst [vmem:[#allocation26_spill] sm:$0xff] %v3730_v43  ;;  %5041 = vst [vmem:[#allocation27_spill] sm:$0xff] %v3733_v29  ;;  %2559 = vmatmul.mubr.f32.gmra.mrb[16].mxu1 %v3696_v42  ;;  %2875 = vmatprep.subr.bf16.mxu0 %v2874_v22  ;;  %v2850_v5 = vpack.c.bf16 %v574_v61, %v573_v49  ;;  %v3754_v63 = vsel %vm442_vm0, %v498_v1, %v499_v55  ;;  %v503_v15 = vrot.slane %v3724_v46, 2  ;;  %v3769_v49 = vld [vmem:[%s3279_s21 + $0x138] sm:$0xff]  ;;  %v3772_v61 = vld [vmem:[%s3279_s21 + $0x140] sm:$0xff] }
  0x5b   : > { %2848 = vmatpush1.bf16.msra.mxu1 %v2847_v56  ;;  %2561 = vmatprep.mubr.f32.mxu1 %v3709_v30  ;;  %5042 = vst [vmem:[#allocation28_spill] sm:$0xff] %v3742_v50  ;;  %5043 = vst [vmem:[#allocation29_spill] sm:$0xff] %v3754_v63  ;;  %v576_v56 = vld [vmem:[%s4938_s1 + $0xa8] sm:$0xff]  ;;  %v3776_v1 = vsel %vm329_vm1, %v341_v44, %v343_v13  ;;  %v345_v30 = vrot.slane %v3391_v6, 1  ;;  %v346_v42 = vrot.slane %v3394_v7, 1  ;;  %v595_v13 = vld [vmem:[%s4938_s1 + $0x140] sm:$0xff] }
  0x5c   : > { %738 = vmatmul.mubr.f32.gmra.mrb[2].mxu0 %v3298_v28  ;;  %2849 = vmatprep.subr.bf16.mxu1 %v5036_v9  ;;  %5044 = vst [vmem:[#allocation30_spill] sm:$0xff] %v3765_v52  ;;  %5045 = vst [vmem:[#allocation31_spill] sm:$0xff] %v3769_v49  ;;  %v3782_v29 = vsel %vm442_vm0, %v499_v55, %v501_v34  ;;  %v596_v44 = vld [vmem:[%s4938_s1 + $0x148] sm:$0xff]  ;;  %v577_v55 = vld [vmem:[%s4938_s1 + $0xb0] sm:$0xff]  ;;  %v508_v48 = vrot.slane %v3769_v49, 2  ;;  %v509_v4 = vrot.slane %v3772_v61, 2 }
  0x5d   : > { %742 = vmatprep.mubr.f32.mxu0 %v3737_v25  ;;  %5046 = vst [vmem:[#allocation32_spill] sm:$0xff] %v3772_v61  ;;  %2877 = vmatpush3.bf16.msra.mxu0 %v2874_v22  ;;  %5047 = vst [vmem:[#allocation33_spill] sm:$0xff] %v3782_v29  ;;  %v2853_v22 = vpack.c.bf16 %v576_v56, %v575_v16  ;;  %v578_v34 = vld [vmem:[%s4938_s1 + $0xb8] sm:$0xff]  ;;  %v3805_v16 = vld [vmem:[%s3279_s21 + $0x148] sm:$0x3]  ;;  %v348_v43 = vrot.slane %v3422_v18, 1  ;;  %v2886_v49 = vpack.c.bf16 %v596_v44, %v595_v13 }
  0x5e   : > { %2562 = vmatmul.mubr.f32.gmra.mrb[18].mxu1 %v3742_v50  ;;  %2879 = vmatprep.subr.bf16.mxu0 %v2878_v10  ;;  %v506_v50 = vrot.slane %v3765_v52, 2  ;;  %5049 = vst [vmem:[#allocation35_spill] sm:$0xff] %v3805_v16  ;;  %v3809_v56 = vld [vmem:[%s3279_s21 + $0x150] sm:$0xff]  ;;  %v2856_v52 = vpack.c.bf16 %v578_v34, %v577_v55  ;;  %v598_v18 = vld [vmem:[%s4938_s1 + $0x158] sm:$0xff]  ;;  %v3844_v55 = vld [vmem:[%s3279_s21 + $0x160] sm:$0x3] }
  0x5f   : > { %2851 = vmatpush1.bf16.msra.mxu1 %v2850_v5  ;;  %2564 = vmatprep.mubr.f32.mxu1 %v3754_v63  ;;  %v3794_v5 = vsel %vm442_vm0, %v503_v15, %v504_v2  ;;  %5050 = vst [vmem:[#allocation36_spill] sm:$0xff] %v3809_v56  ;;  %v3812_v15 = vld [vmem:[%s3279_s21 + $0x158] sm:$0xff]  ;;  %v3816_v63 = vsel %vm329_vm1, %v345_v30, %v346_v42  ;;  %v597_v30 = vld [vmem:[%s4938_s1 + $0x150] sm:$0xff]  ;;  %v513_v13 = vrot.slane %v3809_v56, 2  ;;  %5054 = vst [vmem:[#allocation40_spill] sm:$0xff] %v3844_v55 }
  0x60   : > { %743 = vmatmul.mubr.f32.gmra.mrb[4].mxu0 %v3366_v58  ;;  %2852 = vmatprep.subr.bf16.mxu1 %v5036_v9  ;;  %5048 = vst [vmem:[#allocation34_spill] sm:$0xff] %v3794_v5  ;;  %5051 = vst [vmem:[#allocation37_spill] sm:$0xff] %v3812_v15  ;;  %v3821_v61 = vsel %vm442_vm0, %v504_v2, %v506_v50  ;;  %v579_v50 = vld [vmem:[%s4938_s1 + $0xc0] sm:$0xff]  ;;  %v580_v2 = vld [vmem:[%s4938_s1 + $0xc8] sm:$0xff]  ;;  %v514_v44 = vrot.slane %v3812_v15, 2  ;;  %v351_v56 = vrot.slane %v3428_v21, 1 }
  0x61   : > { %747 = vmatprep.mubr.f32.mxu0 %v3776_v1  ;;  %2881 = vmatpush3.bf16.msra.mxu0 %v2878_v10  ;;  %5052 = vst [vmem:[#allocation38_spill] sm:$0xff] %v3821_v61  ;;  %v511_v10 = vrot.slane %v3805_v16, 2  ;;  %v3848_v34 = vld [vmem:[%s3279_s21 + $0x168] sm:$0xff]  ;;  %v2890_v15 = vpack.c.bf16 %v598_v18, %v597_v30 }
  0x62   : > { %2565 = vmatmul.mubr.f32.gmra.mrb[20].mxu1 %v3782_v29  ;;  %2883 = vmatprep.subr.bf16.mxu0 %v2882_v36  ;;  %5055 = vst [vmem:[#allocation41_spill] sm:$0xff] %v3848_v34  ;;  %v350_v29 = vrot.slane %v3425_v20, 1  ;;  %v518_v30 = vrot.slane %v3848_v34, 2 }
  0x63   : > { %2854 = vmatpush1.bf16.msra.mxu1 %v2853_v22  ;;  %2567 = vmatprep.mubr.f32.mxu1 %v3794_v5  ;;  %v3833_v22 = vsel %vm442_vm0, %v508_v48, %v509_v4  ;;  %v3851_v48 = vld [vmem:[%s3279_s21 + $0x170] sm:$0xff]  ;;  %v3855_v5 = vsel %vm329_vm1, %v346_v42, %v348_v43  ;;  %v3861_v16 = vsel %vm442_vm0, %v509_v4, %v511_v10  ;;  %v599_v43 = vld [vmem:[%s4938_s1 + $0x160] sm:$0xff]  ;;  %v600_v42 = vld [vmem:[%s4938_s1 + $0x168] sm:$0xff] }
  0x64   : > { %748 = vmatmul.mubr.f32.gmra.mrb[6].mxu0 %v3369_v59  ;;  %2855 = vmatprep.subr.bf16.mxu1 %v5036_v9  ;;  %5053 = vst [vmem:[#allocation39_spill] sm:$0xff] %v3833_v22  ;;  %5056 = vst [vmem:[#allocation42_spill] sm:$0xff] %v3851_v48  ;;  %v581_v4 = vld [vmem:[%s4938_s1 + $0xd0] sm:$0xff]  ;;  %v582_v10 = vld [vmem:[%s4938_s1 + $0xd8] sm:$0xff]  ;;  %v519_v18 = vrot.slane %v3851_v48, 2  ;;  %v2894_v34 = vpack.c.bf16 %v600_v42, %v599_v43 }
  0x65   : > { %752 = vmatprep.mubr.f32.mxu0 %v3816_v63  ;;  %2885 = vmatpush3.bf16.msra.mxu0 %v2882_v36  ;;  %5057 = vst [vmem:[#allocation43_spill] sm:$0xff] %v3861_v16  ;;  %v2859_v36 = vpack.c.bf16 %v580_v2, %v579_v50  ;;  %v3884_v50 = vld [vmem:[%s3279_s21 + $0x178] sm:$0x3]  ;;  %v3888_v2 = vld [vmem:[%s3279_s21 + $0x180] sm:$0xff]  ;;  %v2862_v14 = vpack.c.bf16 %v582_v10, %v581_v4  ;;  %v3923_v42 = vld [vmem:[%s3279_s21 + $0x190] sm:$0x3] }
  0x66   : > { %2568 = vmatmul.mubr.f32.gmra.mrb[22].mxu1 %v3821_v61  ;;  %2887 = vmatprep.subr.bf16.mxu0 %v2886_v49  ;;  %v516_v61 = vrot.slane %v3844_v55, 2  ;;  %v353_v55 = vrot.slane %v3456_v35, 1  ;;  %v521_v46 = vrot.slane %v3884_v50, 2  ;;  %v3912_v35 = vsel %vm442_vm0, %v518_v30, %v519_v18 }
  0x67   : > { %2857 = vmatpush1.bf16.msra.mxu1 %v2856_v52  ;;  %2570 = vmatprep.mubr.f32.mxu1 %v3833_v22  ;;  %v3873_v52 = vsel %vm442_vm0, %v513_v13, %v514_v44  ;;  %v3891_v13 = vld [vmem:[%s3279_s21 + $0x188] sm:$0xff]  ;;  %v3895_v22 = vsel %vm329_vm1, %v350_v29, %v351_v56  ;;  %v602_v29 = vld [vmem:[%s4938_s1 + $0x178] sm:$0xff]  ;;  %v355_v10 = vrot.slane %v3459_v39, 1  ;;  %v356_v30 = vrot.slane %v3462_v40, 1 }
  0x68   : > { %753 = vmatmul.mubr.f32.gmra.mrb[8].mxu0 %v3391_v6  ;;  %2858 = vmatprep.subr.bf16.mxu1 %v5036_v9  ;;  %5058 = vst [vmem:[#allocation44_spill] sm:$0xff] %v3873_v52  ;;  %5059 = vst [vmem:[#allocation45_spill] sm:$0xff] %v3891_v13  ;;  %v3900_v48 = vsel %vm442_vm0, %v514_v44, %v516_v61  ;;  %v583_v61 = vld [vmem:[%s4938_s1 + $0xe0] sm:$0xff]  ;;  %v584_v44 = vld [vmem:[%s4938_s1 + $0xe8] sm:$0xff]  ;;  %v614_v43 = vrot.slane %v3891_v13, 2  ;;  %v3928_v4 = vsel %vm329_vm1, %v351_v56, %v353_v55 }
  0x69   : > { %757 = vmatprep.mubr.f32.mxu0 %v3855_v5  ;;  %2889 = vmatpush3.bf16.msra.mxu0 %v2886_v49  ;;  %v601_v49 = vld [vmem:[%s4938_s1 + $0x170] sm:$0xff]  ;;  %v2865_v13 = vpack.c.bf16 %v584_v44, %v583_v61 }
  0x6a   : > { %2571 = vmatmul.mubr.f32.gmra.mrb[24].mxu1 %v3861_v16  ;;  %2891 = vmatprep.subr.bf16.mxu0 %v2890_v15  ;;  %v3934_v16 = vsel %vm442_vm0, %v519_v18, %v521_v46  ;;  %v585_v55 = vld [vmem:[%s4938_s1 + $0xf0] sm:$0xff]  ;;  %v330_v46 = vrot.slane %v3684_v27, 1  ;;  %v331_v18 = vrot.slane %v3691_v41, 1 }
  0x6b   : > { %2860 = vmatpush1.bf16.msra.mxu1 %v2859_v36  ;;  %2573 = vmatprep.mubr.f32.mxu1 %v3873_v52  ;;  %v613_v36 = vrot.slane %v3888_v2, 2  ;;  %v2898_v52 = vpack.c.bf16 %v602_v29, %v601_v49  ;;  %v3953_v49 = vsel %vm329_vm1, %v355_v10, %v356_v30  ;;  %v358_v29 = vrot.slane %v3490_v51, 1  ;;  %v1586_v51 = vld [vmem:[%s4938_s1 + $0x308] sm:$0xff] }
  0x6c   : > { %758 = vmatmul.mubr.f32.gmra.mrb[10].mxu0 %v3394_v7  ;;  %2861 = vmatprep.subr.bf16.mxu1 %v5036_v9  ;;  %v360_v10 = vrot.slane %v3493_v53, 1 }
  0x6d   : > { %762 = vmatprep.mubr.f32.mxu0 %v3895_v22  ;;  %2893 = vmatpush3.bf16.msra.mxu0 %v2890_v15  ;;  %v616_v15 = vrot.slane %v3923_v42, 2  ;;  %v3940_v56 = vsel %vm442_vm0, %v613_v36, %v614_v43  ;;  %v1585_v36 = vld [vmem:[%s4938_s1 + $0x300] sm:$0xff] }
  0x6e   : > { %2574 = vmatmul.mubr.f32.gmra.mrb[26].mxu1 %v3900_v48  ;;  %2895 = vmatprep.subr.bf16.mxu0 %v2894_v34 }
  0x6f   : > { %2863 = vmatpush1.bf16.msra.mxu1 %v2862_v14  ;;  %2576 = vmatprep.mubr.f32.mxu1 %v3912_v35  ;;  %v586_v14 = vld [vmem:[%s4938_s1 + $0xf8] sm:$0xff]  ;;  %v3958_v61 = vsel %vm442_vm0, %v614_v43, %v616_v15  ;;  %v3973_v43 = vsel %vm329_vm1, %v356_v30, %v358_v29  ;;  %v361_v15 = vrot.slane %v3496_v54, 1 }
  0x70   : > { %763 = vmatmul.mubr.f32.gmra.mrb[12].mxu0 %v3425_v20  ;;  %2864 = vmatprep.subr.bf16.mxu1 %v5036_v9  ;;  %v2868_v44 = vpack.c.bf16 %v586_v14, %v585_v55  ;;  %v1617_v55 = vld [vmem:[%s4938_s1 + $0x400] sm:$0xff]  ;;  %v1588_v29 = vld [vmem:[%s4938_s1 + $0x318] sm:$0xff] }
  0x71   : > { %767 = vmatprep.mubr.f32.mxu0 %v3928_v4  ;;  %2897 = vmatpush3.bf16.msra.mxu0 %v2894_v34  ;;  %v332_v34 = vsel %vm329_vm1, %v330_v46, %v331_v18  ;;  %v1587_v46 = vld [vmem:[%s4938_s1 + $0x310] sm:$0xff] }
  0x72   : > { %2577 = vmatmul.mubr.f32.gmra.mrb[28].mxu1 %v3934_v16  ;;  %2899 = vmatprep.subr.bf16.mxu0 %v2898_v52 }
  0x73   : > { %2866 = vmatpush1.bf16.msra.mxu1 %v2865_v13  ;;  %2579 = vmatprep.mubr.f32.mxu1 %v3940_v56  ;;  %v333_v13 = vrot.slane %v3670_v23, 1  ;;  %v1618_v23 = vld [vmem:[%s4938_s1 + $0x408] sm:$0xff] }
  0x74   : > { %768 = vmatmul.mubr.f32.gmra.mrb[14].mxu0 %v3428_v21  ;;  %2867 = vmatprep.subr.bf16.mxu1 %v5036_v9  ;;  %v3983_v14 = vpack.c.bf16 %v1618_v23, %v1617_v55  ;;  %v1591_v55 = vld [vmem:[%s4938_s1 + $0x330] sm:$0xff] }
  0x75   : > { %772 = vmatprep.mubr.f32.mxu0 %v3953_v49  ;;  %2901 = vmatpush3.bf16.msra.mxu0 %v2898_v52  ;;  %v2903_v52 = vpack.c.bf16 %v1586_v51, %v1585_v36  ;;  %v334_v30 = vsel %vm329_vm1, %v331_v18, %v333_v13  ;;  %v2906_v18 = vpack.c.bf16 %v1588_v29, %v1587_v46  ;;  %v1589_v36 = vld [vmem:[%s4938_s1 + $0x320] sm:$0xff]  ;;  %v365_v51 = vrot.slane %v3527_v11, 1  ;;  %v1595_v29 = vld [vmem:[%s4938_s1 + $0x350] sm:$0xff] }
  0x76   : > { %2580 = vmatmul.mubr.f32.gmra.mrb[30].mxu1 %v3958_v61  ;;  %2951 = vmatprep.subr.bf16.mxu0 %v3983_v14  ;;  %v366_v13 = vrot.slane %v3530_v12, 1 }
  0x77   : > { %2869 = vmatpush1.bf16.msra.mxu1 %v2868_v44  ;;  %1182 = vmatprep.mubr.f32.mxu1 %v332_v34  ;;  %v3998_v44 = vsel %vm329_vm1, %v360_v10, %v361_v15  ;;  %v363_v34 = vrot.slane %v3524_v8, 1 }
  0x78   : > { %773 = vmatmul.mubr.f32.gmra.mrb[16].mxu0 %v3459_v39  ;;  %2902 = vmatprep.subr.bf16.mxu1 %v5036_v9 }
  0x79   : > { %777 = vmatprep.mubr.f32.mxu0 %v3973_v43  ;;  %v4012_v8 = vsel %vm329_vm1, %v361_v15, %v363_v34  ;;  %v368_v15 = vrot.slane %v3558_v31, 1 }
  0x7a   : > { %1183 = vmatmul.mubr.f32.vlgmr.msra.gmra.mrb[32].mxu1 %v3684_v27  ;;  %v1590_v27 = vld [vmem:[%s4938_s1 + $0x328] sm:$0xff] }
  0x7b   : > { %2904 = vmatpush1.bf16.msra.mxu1 %v2903_v52  ;;  %1187 = vmatprep.mubr.f32.mxu1 %v334_v30  ;;  %v2909_v10 = vpack.c.bf16 %v1590_v27, %v1589_v36  ;;  %v1593_v52 = vld [vmem:[%s4938_s1 + $0x340] sm:$0xff]  ;;  %v4043_v31 = vsel %vm329_vm1, %v366_v13, %v368_v15  ;;  %v371_v30 = vrot.slane %v3564_v38, 1  ;;  %v378_v15 = vrot.slane %v3632_v32, 1 }
  0x7c   : > { %778 = vmatmul.mubr.f32.gmra.mrb[18].mxu0 %v3462_v40  ;;  %2905 = vmatprep.subr.bf16.mxu1 %v5036_v9  ;;  %v1597_v27 = vld [vmem:[%s4938_s1 + $0x360] sm:$0xff] }
  0x7d   : > { %782 = vmatprep.mubr.f32.mxu0 %v3998_v44 }
  0x7e   : > { %1188 = vmatmul.mubr.f32.gmra.mrb[34].mxu1 %v3691_v41  ;;  %v1592_v41 = vld [vmem:[%s4938_s1 + $0x338] sm:$0xff] }
  0x7f   : > { %1192 = vmatprep.mubr.f32.mxu1 %v3319_v37  ;;  %2907 = vmatpush1.bf16.msra.mxu1 %v2906_v18  ;;  %v4028_v37 = vsel %vm329_vm1, %v365_v51, %v366_v13  ;;  %v2912_v23 = vpack.c.bf16 %v1592_v41, %v1591_v55  ;;  %v373_v18 = vrot.slane %v3592_v57, 1  ;;  %v375_v51 = vrot.slane %v3595_v62, 1  ;;  %v1599_v55 = vld [vmem:[%s4938_s1 + $0x370] sm:$0xff] }
  0x80   : > { %783 = vmatmul.mubr.f32.gmra.mrb[20].mxu0 %v3493_v53  ;;  %2908 = vmatprep.subr.bf16.mxu1 %v5036_v9  ;;  %v376_v13 = vrot.slane %v3598_v0, 1 }
  0x81   : > { %787 = vmatprep.mubr.f32.mxu0 %v4012_v8  ;;  %v4074_v57 = vsel %vm329_vm1, %v371_v30, %v373_v18 }
  0x82   : > { %1193 = vmatmul.mubr.f32.gmra.mrb[36].mxu1 %v3289_v24  ;;  %v1594_v24 = vld [vmem:[%s4938_s1 + $0x348] sm:$0xff]  ;;  %v4090_v41 = vsel %vm329_vm1, %v375_v51, %v376_v13  ;;  %v4105_v32 = vsel %vm329_vm1, %v376_v13, %v378_v15  ;;  %v1607_v13 = vld [vmem:[%s4938_s1 + $0x3b0] sm:$0xff]  ;;  %v1609_v15 = vld [vmem:[%s4938_s1 + $0x3c0] sm:$0xff] }
  0x83   : > { %1197 = vmatprep.mubr.f32.mxu1 %v3675_v26  ;;  %2910 = vmatpush1.bf16.msra.mxu1 %v2909_v10  ;;  %v370_v26 = vrot.slane %v3561_v33, 1  ;;  %v2915_v46 = vpack.c.bf16 %v1594_v24, %v1593_v52  ;;  %v1601_v52 = vld [vmem:[%s4938_s1 + $0x380] sm:$0xff]  ;;  %v380_v24 = vrot.slane %v3636_v45, 1 }
  0x84   : > { %788 = vmatmul.mubr.f32.gmra.mrb[22].mxu0 %v3496_v54  ;;  %2911 = vmatprep.subr.bf16.mxu1 %v5036_v9 }
  0x85   : > { %792 = vmatprep.mubr.f32.mxu0 %v4028_v37  ;;  %v4059_v34 = vsel %vm329_vm1, %v370_v26, %v371_v30  ;;  %v381_v26 = vrot.slane %v3639_v47, 1 }
  0x86   : > { %1198 = vmatmul.mubr.f32.gmra.mrb[38].mxu1 %v3298_v28  ;;  %v1596_v28 = vld [vmem:[%s4938_s1 + $0x358] sm:$0xff] }
  0x87   : > { %1202 = vmatprep.mubr.f32.mxu1 %v3737_v25  ;;  %2913 = vmatpush1.bf16.msra.mxu1 %v2912_v23  ;;  %v2918_v36 = vpack.c.bf16 %v1596_v28, %v1595_v29  ;;  %v4121_v29 = vsel %vm329_vm1, %v380_v24, %v381_v26  ;;  %v383_v28 = vrot.slane %v3667_v17, 1 }
  0x88   : > { %793 = vmatmul.mubr.f32.gmra.mrb[24].mxu0 %v3527_v11  ;;  %2914 = vmatprep.subr.bf16.mxu1 %v5036_v9 }
  0x89   : > { %797 = vmatprep.mubr.f32.mxu0 %v4043_v31  ;;  %v4136_v17 = vsel %vm329_vm1, %v381_v26, %v383_v28 }
  0x8a   : > { %1203 = vmatmul.mubr.f32.gmra.mrb[40].mxu1 %v3366_v58  ;;  %v1598_v58 = vld [vmem:[%s4938_s1 + $0x368] sm:$0xff] }
  0x8b   : > { %1207 = vmatprep.mubr.f32.mxu1 %v3776_v1  ;;  %2916 = vmatpush1.bf16.msra.mxu1 %v2915_v46  ;;  %v2921_v10 = vpack.c.bf16 %v1598_v58, %v1597_v27  ;;  %v1603_v46 = vld [vmem:[%s4938_s1 + $0x390] sm:$0xff]  ;;  %v385_v27 = vrot.slane %v3678_v19, 1  ;;  %v386_v58 = vrot.slane %v3681_v3, 1 }
  0x8c   : > { %798 = vmatmul.mubr.f32.gmra.mrb[26].mxu0 %v3530_v12  ;;  %2917 = vmatprep.subr.bf16.mxu1 %v5036_v9 }
  0x8d   : > { %802 = vmatprep.mubr.f32.mxu0 %v4059_v34 }
  0x8e   : > { %1208 = vmatmul.mubr.f32.gmra.mrb[42].mxu1 %v3369_v59  ;;  %v1600_v59 = vld [vmem:[%s4938_s1 + $0x378] sm:$0xff] }
  0x8f   : > { %1212 = vmatprep.mubr.f32.mxu1 %v3816_v63  ;;  %2919 = vmatpush1.bf16.msra.mxu1 %v2918_v36  ;;  %v2924_v23 = vpack.c.bf16 %v1600_v59, %v1599_v55  ;;  %v1605_v36 = vld [vmem:[%s4938_s1 + $0x3a0] sm:$0xff]  ;;  %v388_v55 = vrot.slane %v3720_v60, 1 }
  0x90   : > { %803 = vmatmul.mubr.f32.gmra.mrb[28].mxu0 %v3561_v33  ;;  %2920 = vmatprep.subr.bf16.mxu1 %v5036_v9 }
  0x91   : > { %807 = vmatprep.mubr.f32.mxu0 %v4074_v57  ;;  %v4167_v60 = vsel %vm329_vm1, %v386_v58, %v388_v55  ;;  %v1615_v55 = vld [vmem:[%s4938_s1 + $0x3f0] sm:$0xff] }
  0x92   : > { %1213 = vmatmul.mubr.f32.gmra.mrb[44].mxu1 %v3391_v6  ;;  %v1602_v6 = vld [vmem:[%s4938_s1 + $0x388] sm:$0xff] }
  0x93   : > { %1217 = vmatprep.mubr.f32.mxu1 %v3855_v5  ;;  %2922 = vmatpush1.bf16.msra.mxu1 %v2921_v10  ;;  %v2927_v30 = vpack.c.bf16 %v1602_v6, %v1601_v52  ;;  %v4152_v10 = vsel %vm329_vm1, %v385_v27, %v386_v58  ;;  %v5061_v6 = vld [vmem:[#allocation25_spill] sm:$0xff]  ;;  %v5063_v27 = vld [vmem:[#allocation31_spill] sm:$0xff] }
  0x94   : > { %808 = vmatmul.mubr.f32.gmra.mrb[30].mxu0 %v3564_v38  ;;  %2923 = vmatprep.subr.bf16.mxu1 %v5036_v9  ;;  %v391_v24 = vrot.slane %v5061_v6, 1  ;;  %v395_v58 = vrot.slane %v5063_v27, 1 }
  0x95   : > { %812 = vmatprep.mubr.f32.mxu0 %v4090_v41 }
  0x96   : > { %1218 = vmatmul.mubr.f32.gmra.mrb[46].mxu1 %v3394_v7  ;;  %v1604_v7 = vld [vmem:[%s4938_s1 + $0x398] sm:$0xff] }
  0x97   : > { %1222 = vmatprep.mubr.f32.mxu1 %v3895_v22  ;;  %2925 = vmatpush1.bf16.msra.mxu1 %v2924_v23  ;;  %v2930_v18 = vpack.c.bf16 %v1604_v7, %v1603_v46  ;;  %v5060_v23 = vld [vmem:[#allocation24_spill] sm:$0xff]  ;;  %v5062_v7 = vld [vmem:[#allocation30_spill] sm:$0xff] }
  0x98   : > { %813 = vmatmul.mubr.f32.gmra.mrb[32].mxu0 %v3595_v62  ;;  %2926 = vmatprep.subr.bf16.mxu1 %v5036_v9  ;;  %v390_v52 = vrot.slane %v5060_v23, 1  ;;  %v393_v28 = vrot.slane %v5062_v7, 1 }
  0x99   : > { %817 = vmatprep.mubr.f32.mxu0 %v4105_v32 }
  0x9a   : > { %1223 = vmatmul.mubr.f32.gmra.mrb[48].mxu1 %v3425_v20  ;;  %v1606_v20 = vld [vmem:[%s4938_s1 + $0x3a8] sm:$0xff]  ;;  %v4183_v46 = vsel %vm329_vm1, %v390_v52, %v391_v24 }
  0x9b   : > { %1227 = vmatprep.mubr.f32.mxu1 %v3928_v4  ;;  %2928 = vmatpush1.bf16.msra.mxu1 %v2927_v30  ;;  %v2933_v51 = vpack.c.bf16 %v1606_v20, %v1605_v36  ;;  %v1611_v30 = vld [vmem:[%s4938_s1 + $0x3d0] sm:$0xff]  ;;  %v1613_v36 = vld [vmem:[%s4938_s1 + $0x3e0] sm:$0xff]  ;;  %v4198_v20 = vsel %vm329_vm1, %v391_v24, %v393_v28 }
  0x9c   : > { %818 = vmatmul.mubr.f32.gmra.mrb[34].mxu0 %v3598_v0  ;;  %2929 = vmatprep.subr.bf16.mxu1 %v5036_v9 }
  0x9d   : > { %822 = vmatprep.mubr.f32.mxu0 %v4121_v29 }
  0x9e   : > { %1228 = vmatmul.mubr.f32.gmra.mrb[50].mxu1 %v3428_v21  ;;  %v1608_v21 = vld [vmem:[%s4938_s1 + $0x3b8] sm:$0xff] }
  0x9f   : > { %1232 = vmatprep.mubr.f32.mxu1 %v3953_v49  ;;  %2931 = vmatpush1.bf16.msra.mxu1 %v2930_v18  ;;  %v2936_v59 = vpack.c.bf16 %v1608_v21, %v1607_v13 }
  0xa0   : > { %823 = vmatmul.mubr.f32.gmra.mrb[36].mxu0 %v3636_v45  ;;  %2932 = vmatprep.subr.bf16.mxu1 %v5036_v9 }
  0xa1   : > { %827 = vmatprep.mubr.f32.mxu0 %v4136_v17 }
  0xa2   : > { %1233 = vmatmul.mubr.f32.gmra.mrb[52].mxu1 %v3459_v39  ;;  %v1610_v39 = vld [vmem:[%s4938_s1 + $0x3c8] sm:$0xff] }
  0xa3   : > { %1237 = vmatprep.mubr.f32.mxu1 %v3973_v43  ;;  %2934 = vmatpush1.bf16.msra.mxu1 %v2933_v51  ;;  %v2939_v26 = vpack.c.bf16 %v1610_v39, %v1609_v15  ;;  %v5064_v51 = vld [vmem:[#allocation32_spill] sm:$0xff]  ;;  %v5065_v15 = vld [vmem:[#allocation35_spill] sm:$0xff] }
  0xa4   : > { %828 = vmatmul.mubr.f32.gmra.mrb[38].mxu0 %v3639_v47  ;;  %2935 = vmatprep.subr.bf16.mxu1 %v5036_v9  ;;  %v396_v13 = vrot.slane %v5064_v51, 1  ;;  %v398_v39 = vrot.slane %v5065_v15, 1  ;;  %v1622_v15 = vld [vmem:[%s4938_s1 + $0x428] sm:$0xff] }
  0xa5   : > { %832 = vmatprep.mubr.f32.mxu0 %v4152_v10 }
  0xa6   : > { %1238 = vmatmul.mubr.f32.gmra.mrb[54].mxu1 %v3462_v40  ;;  %v1612_v40 = vld [vmem:[%s4938_s1 + $0x3d8] sm:$0xff]  ;;  %v4223_v24 = vsel %vm329_vm1, %v396_v13, %v398_v39  ;;  %v5073_v39 = vld [vmem:[#allocation27_spill] sm:$0xff] }
  0xa7   : > { %1242 = vmatprep.mubr.f32.mxu1 %v3998_v44  ;;  %2937 = vmatpush1.bf16.msra.mxu1 %v2936_v59  ;;  %v2942_v18 = vpack.c.bf16 %v1612_v40, %v1611_v30  ;;  %v4214_v59 = vsel %vm329_vm1, %v395_v58, %v396_v13  ;;  %v5067_v30 = vld [vmem:[#allocation37_spill] sm:$0xff] }
  0xa8   : > { %833 = vmatmul.mubr.f32.gmra.mrb[40].mxu0 %v3678_v19  ;;  %2938 = vmatprep.subr.bf16.mxu1 %v5036_v9  ;;  %v401_v40 = vrot.slane %v5067_v30, 1 }
  0xa9   : > { %837 = vmatprep.mubr.f32.mxu0 %v4167_v60 }
  0xaa   : > { %1243 = vmatmul.mubr.f32.gmra.mrb[56].mxu1 %v3493_v53  ;;  %v1614_v53 = vld [vmem:[%s4938_s1 + $0x3e8] sm:$0xff] }
  0xab   : > { %1247 = vmatprep.mubr.f32.mxu1 %v4012_v8  ;;  %2940 = vmatpush1.bf16.msra.mxu1 %v2939_v26  ;;  %v2945_v21 = vpack.c.bf16 %v1614_v53, %v1613_v36  ;;  %v5070_v53 = vld [vmem:[#allocation42_spill] sm:$0xff] }
  0xac   : > { %838 = vmatmul.mubr.f32.gmra.mrb[42].mxu0 %v3681_v3  ;;  %2941 = vmatprep.subr.bf16.mxu1 %v5036_v9 }
  0xad   : > { %842 = vmatprep.mubr.f32.mxu0 %v4183_v46 }
  0xae   : > { %1248 = vmatmul.mubr.f32.gmra.mrb[58].mxu1 %v3496_v54  ;;  %v1616_v54 = vld [vmem:[%s4938_s1 + $0x3f8] sm:$0xff] }
  0xaf   : > { %1252 = vmatprep.mubr.f32.mxu1 %v4028_v37  ;;  %2943 = vmatpush1.bf16.msra.mxu1 %v2942_v18  ;;  %v2948_v52 = vpack.c.bf16 %v1616_v54, %v1615_v55  ;;  %v5069_v18 = vld [vmem:[#allocation41_spill] sm:$0xff] }
  0xb0   : > { %843 = vmatmul.mubr.f32.gmra.mrb[44].mxu0 %v5060_v23  ;;  %2944 = vmatprep.subr.bf16.mxu1 %v5036_v9  ;;  %v405_v36 = vrot.slane %v5069_v18, 1  ;;  %v5071_v55 = vld [vmem:[#allocation45_spill] sm:$0xff] }
  0xb1   : > { %847 = vmatprep.mubr.f32.mxu0 %v4198_v20 }
  0xb2   : > { %1253 = vmatmul.mubr.f32.gmra.mrb[60].mxu1 %v3527_v11  ;;  %v5066_v11 = vld [vmem:[#allocation36_spill] sm:$0xff] }
  0xb3   : > { %1257 = vmatprep.mubr.f32.mxu1 %v4043_v31  ;;  %2946 = vmatpush1.bf16.msra.mxu1 %v2945_v21  ;;  %v400_v26 = vrot.slane %v5066_v11, 1  ;;  %v606_v21 = vrot.slane %v3888_v2, 1 }
  0xb4   : > { %848 = vmatmul.mubr.f32.gmra.mrb[46].mxu0 %v5061_v6  ;;  %2947 = vmatprep.subr.bf16.mxu1 %v5036_v9 }
  0xb5   : > { %852 = vmatprep.mubr.f32.mxu0 %v4214_v59  ;;  %v4232_v9 = vsel %vm329_vm1, %v400_v26, %v401_v40  ;;  %v1623_v26 = vld [vmem:[%s4938_s1 + $0x430] sm:$0xff] }
  0xb6   : > { %1258 = vmatmul.mubr.f32.gmra.mrb[62].mxu1 %v3530_v12  ;;  %v5068_v12 = vld [vmem:[#allocation40_spill] sm:$0xff] }
  0xb7   : > { %1262 = vmatprep.mubr.f32.mxu1 %v4059_v34  ;;  %2949 = vmatpush1.bf16.msra.mxu1 %v2948_v52  ;;  %v403_v7 = vrot.slane %v5068_v12, 1  ;;  %v5074_v52 = vld [vmem:[#allocation5_spill] sm:$0xff]  ;;  %v5075_v12 = vld [vmem:[#allocation6_spill] sm:$0xff] }
  0xb8   : > { %853 = vmatmul.mubr.f32.gmra.mrb[48].mxu0 %v5063_v27 }
  0xb9   : > { %857 = vmatprep.mubr.f32.mxu0 %v4223_v24  ;;  %v4240_v28 = vsel %vm329_vm1, %v401_v40, %v403_v7  ;;  %v1624_v40 = vld [vmem:[%s4938_s1 + $0x438] sm:$0xff]  ;;  %v5076_v7 = vld [vmem:[#allocation7_spill] sm:$0xff] }
  0xba   : > { %1263 = vmatmul.mubr.f32.gmra.mrb[64].mxu1 %v3561_v33  ;;  %v406_v33 = vrot.slane %v5070_v53, 1 }
  0xbb   : > { %1267 = vmatprep.mubr.f32.mxu1 %v4074_v57 }
  0xbc   : > { %858 = vmatmul.mubr.f32.gmra.mrb[50].mxu0 %v5064_v51  ;;  %v4249_v58 = vsel %vm329_vm1, %v405_v36, %v406_v33  ;;  %v1626_v36 = vld [vmem:[%s4938_s1 + $0x448] sm:$0xff] }
  0xbd   : > { %862 = vmatprep.mubr.f32.mxu0 %v4232_v9 }
  0xbe   : > { %1268 = vmatmul.mubr.f32.gmra.mrb[66].mxu1 %v3564_v38  ;;  %v408_v38 = vrot.slane %v3884_v50, 1 }
  0xbf   : > { %1272 = vmatprep.mubr.f32.mxu1 %v4090_v41 }
  0xc0   : > { %863 = vmatmul.mubr.f32.gmra.mrb[52].mxu0 %v5066_v11  ;;  %v4257_v13 = vsel %vm329_vm1, %v406_v33, %v408_v38  ;;  %v5077_v33 = vld [vmem:[#allocation8_spill] sm:$0xff]  ;;  %v5078_v38 = vld [vmem:[#allocation9_spill] sm:$0xff] }
  0xc1   : > { %867 = vmatprep.mubr.f32.mxu0 %v4240_v28 }
  0xc2   : > { %1273 = vmatmul.mubr.f32.gmra.mrb[68].mxu1 %v3595_v62  ;;  %v607_v62 = vrot.slane %v5071_v55, 1 }
  0xc3   : > { %1277 = vmatprep.mubr.f32.mxu1 %v4105_v32 }
  0xc4   : > { %868 = vmatmul.mubr.f32.gmra.mrb[54].mxu0 %v5067_v30  ;;  %v4266_v50 = vsel %vm329_vm1, %v606_v21, %v607_v62  ;;  %v1627_v21 = vld [vmem:[%s4938_s1 + $0x450] sm:$0xff] }
  0xc5   : > { %872 = vmatprep.mubr.f32.mxu0 %v4249_v58 }
  0xc6   : > { %1278 = vmatmul.mubr.f32.gmra.mrb[70].mxu1 %v3598_v0  ;;  %v609_v0 = vrot.slane %v3923_v42, 1  ;;  %v5072_v42 = vld [vmem:[#allocation26_spill] sm:$0xff] }
  0xc7   : > { %1282 = vmatprep.mubr.f32.mxu1 %v4121_v29 }
  0xc8   : > { %873 = vmatmul.mubr.f32.gmra.mrb[56].mxu0 %v5069_v18  ;;  %v4274_v54 = vsel %vm329_vm1, %v607_v62, %v609_v0  ;;  %v5079_v62 = vld [vmem:[#allocation10_spill] sm:$0xff]  ;;  %v5080_v0 = vld [vmem:[#allocation11_spill] sm:$0xff] }
  0xc9   : > { %877 = vmatprep.mubr.f32.mxu0 %v4257_v13 }
  0xca   : > { %1283 = vmatmul.mubr.f32.gmra.mrb[72].mxu1 %v3636_v45  ;;  %v1619_v45 = vld [vmem:[%s4938_s1 + $0x410] sm:$0xff] }
  0xcb   : > { %1287 = vmatprep.mubr.f32.mxu1 %v4136_v17 }
  0xcc   : > { %878 = vmatmul.mubr.f32.gmra.mrb[58].mxu0 %v5070_v53 }
  0xcd   : > { %882 = vmatprep.mubr.f32.mxu0 %v4266_v50 }
  0xce   : > { %1288 = vmatmul.mubr.f32.gmra.mrb[74].mxu1 %v3639_v47  ;;  %v1620_v47 = vld [vmem:[%s4938_s1 + $0x418] sm:$0xff] }
  0xcf   : > { %1292 = vmatprep.mubr.f32.mxu1 %v4152_v10 }
  0xd0   : > { %883 = vmatmul.mubr.f32.gmra.mrb[60].mxu0 %v3888_v2  ;;  %v2954_v2 = vpack.c.bf16 %v1620_v47, %v1619_v45  ;;  %v1629_v45 = vld [vmem:[%s4938_s1 + $0x460] sm:$0xff]  ;;  %v1630_v47 = vld [vmem:[%s4938_s1 + $0x468] sm:$0xff] }
  0xd1   : > { %887 = vmatprep.mubr.f32.mxu0 %v4274_v54 }
  0xd2   : > { %1293 = vmatmul.mubr.f32.gmra.mrb[76].mxu1 %v3678_v19  ;;  %v1621_v19 = vld [vmem:[%s4938_s1 + $0x420] sm:$0xff] }
  0xd3   : > { %1297 = vmatprep.mubr.f32.mxu1 %v4167_v60 }
  0xd4   : > { %888 = vmatmul.mubr.f32.gmra.mrb[62].mxu0 %v5071_v55  ;;  %v1628_v55 = vld [vmem:[%s4938_s1 + $0x458] sm:$0xff] }
  0xd5   : > { %2614 = vmatprep.mubr.f32.mxu0 %v5072_v42  ;;  %v5081_v42 = vld [vmem:[#allocation12_spill] sm:$0xff] }
  0xd6   : > { %1298 = vmatmul.mubr.f32.gmra.mrb[78].mxu1 %v3681_v3  ;;  %v2958_v3 = vpack.c.bf16 %v1622_v15, %v1621_v19  ;;  %v1631_v19 = vld [vmem:[%s4938_s1 + $0x470] sm:$0xff]  ;;  %v1632_v15 = vld [vmem:[%s4938_s1 + $0x478] sm:$0xff] }
  0xd7   : > { %1302 = vmatprep.mubr.f32.mxu1 %v4183_v46 }
  0xd8   : > { %2615 = vmatmul.mubr.f32.vlgmr.msra.gmra.mrb[64].mxu0 %v5073_v39  ;;  %v5083_v39 = vld [vmem:[#allocation14_spill] sm:$0xff] }
  0xd9   : > { %2617 = vmatprep.mubr.f32.mxu0 %v5074_v52  ;;  %2953 = vmatpush3.bf16.msra.mxu0 %v3983_v14  ;;  %v2962_v14 = vpack.c.bf16 %v1624_v40, %v1623_v26  ;;  %v5084_v52 = vld [vmem:[#allocation15_spill] sm:$0xff]  ;;  %v5086_v26 = vld [vmem:[#allocation17_spill] sm:$0xff]  ;;  %v5087_v40 = vld [vmem:[#allocation18_spill] sm:$0xff] }
  0xda   : > { %1303 = vmatmul.mubr.f32.gmra.mrb[80].mxu1 %v5060_v23  ;;  %2955 = vmatprep.subr.bf16.mxu0 %v2954_v2  ;;  %v1625_v23 = vld [vmem:[%s4938_s1 + $0x440] sm:$0xff] }
  0xdb   : > { %1307 = vmatprep.mubr.f32.mxu1 %v4198_v20 }
  0xdc   : > { %2618 = vmatmul.mubr.f32.gmra.mrb[66].mxu0 %v5075_v12  ;;  %v5088_v12 = vld [vmem:[#allocation19_spill] sm:$0xff] }
  0xdd   : > { %2620 = vmatprep.mubr.f32.mxu0 %v5076_v7  ;;  %2957 = vmatpush3.bf16.msra.mxu0 %v2954_v2  ;;  %v5082_v2 = vld [vmem:[#allocation13_spill] sm:$0xff] }
  0xde   : > { %1308 = vmatmul.mubr.f32.gmra.mrb[82].mxu1 %v5061_v6  ;;  %2959 = vmatprep.subr.bf16.mxu0 %v2958_v3  ;;  %v2966_v6 = vpack.c.bf16 %v1626_v36, %v1625_v23  ;;  %v3041_v23 = vld [vmem:[%s3279_s21 + $0x30] sm:$0xff] }
  0xdf   : > { %1312 = vmatprep.mubr.f32.mxu1 %v4214_v59  ;;  %v5092_v36 = vld [vmem:[#allocation23_spill] sm:$0xff] }
  0xe0   : > { %2621 = vmatmul.mubr.f32.gmra.mrb[68].mxu0 %v5077_v33 }
  0xe1   : > { %2623 = vmatprep.mubr.f32.mxu0 %v5078_v38  ;;  %2961 = vmatpush3.bf16.msra.mxu0 %v2958_v3  ;;  %v5085_v3 = vld [vmem:[#allocation16_spill] sm:$0xff] }
  0xe2   : > { %1313 = vmatmul.mubr.f32.gmra.mrb[84].mxu1 %v5063_v27  ;;  %2963 = vmatprep.subr.bf16.mxu0 %v2962_v14  ;;  %v2970_v27 = vpack.c.bf16 %v1628_v55, %v1627_v21  ;;  %v3043_v21 = vld [vmem:[%s3279_s21 + $0x48] sm:$0xff]  ;;  %v5095_v55 = vld [vmem:[#allocation33_spill] sm:$0xff] }
  0xe3   : > { %1317 = vmatprep.mubr.f32.mxu1 %v4223_v24 }
  0xe4   : > { %2624 = vmatmul.mubr.f32.gmra.mrb[70].mxu0 %v5079_v62 }
  0xe5   : > { %2626 = vmatprep.mubr.f32.mxu0 %v5080_v0  ;;  %2965 = vmatpush3.bf16.msra.mxu0 %v2962_v14  ;;  %v5090_v14 = vld [vmem:[#allocation21_spill] sm:$0xff] }
  0xe6   : > { %1318 = vmatmul.mubr.f32.gmra.mrb[86].mxu1 %v5064_v51  ;;  %2967 = vmatprep.subr.bf16.mxu0 %v2966_v6  ;;  %v2974_v51 = vpack.c.bf16 %v1630_v47, %v1629_v45  ;;  %v5097_v45 = vld [vmem:[#allocation38_spill] sm:$0xff]  ;;  %v3045_v47 = vld [vmem:[%s3279_s21 + $0x60] sm:$0xff] }
  0xe7   : > { %1322 = vmatprep.mubr.f32.mxu1 %v4232_v9 }
  0xe8   : > { %2627 = vmatmul.mubr.f32.gmra.mrb[72].mxu0 %v5081_v42 }
  0xe9   : > { %2629 = vmatprep.mubr.f32.mxu0 %v5082_v2  ;;  %2969 = vmatpush3.bf16.msra.mxu0 %v2966_v6  ;;  %v3042_v6 = vld [vmem:[%s3279_s21 + $0x38] sm:$0xff] }
  0xea   : > { %1323 = vmatmul.mubr.f32.gmra.mrb[88].mxu1 %v5066_v11  ;;  %2971 = vmatprep.subr.bf16.mxu0 %v2970_v27  ;;  %v2978_v11 = vpack.c.bf16 %v1632_v15, %v1631_v19  ;;  %v5100_v19 = vld [vmem:[#allocation44_spill] sm:$0xff] }
  0xeb   : > { %1327 = vmatprep.mubr.f32.mxu1 %v4240_v28 }
  0xec   : > { %2630 = vmatmul.mubr.f32.gmra.mrb[74].mxu0 %v5083_v39 }
  0xed   : > { %2632 = vmatprep.mubr.f32.mxu0 %v5084_v52  ;;  %2973 = vmatpush3.bf16.msra.mxu0 %v2970_v27  ;;  %v3044_v27 = vld [vmem:[%s3279_s21 + $0x50] sm:$0xff] }
  0xee   : > { %1328 = vmatmul.mubr.f32.gmra.mrb[90].mxu1 %v5067_v30  ;;  %2975 = vmatprep.subr.bf16.mxu0 %v2974_v51  ;;  %v5089_v30 = vld [vmem:[#allocation20_spill] sm:$0xff] }
  0xef   : > { %1332 = vmatprep.mubr.f32.mxu1 %v4249_v58 }
  0xf0   : > { %2633 = vmatmul.mubr.f32.gmra.mrb[76].mxu0 %v5085_v3 }
  0xf1   : > { %2635 = vmatprep.mubr.f32.mxu0 %v5086_v26  ;;  %2977 = vmatpush3.bf16.msra.mxu0 %v2974_v51  ;;  %v5099_v51 = vld [vmem:[#allocation43_spill] sm:$0xff] }
  0xf2   : > { %1333 = vmatmul.mubr.f32.gmra.mrb[92].mxu1 %v5069_v18  ;;  %2979 = vmatprep.subr.bf16.mxu0 %v2978_v11  ;;  %v5091_v18 = vld [vmem:[#allocation22_spill] sm:$0xff] }
  0xf3   : > { %1337 = vmatprep.mubr.f32.mxu1 %v4257_v13 }
  0xf4   : > { %2636 = vmatmul.mubr.f32.gmra.mrb[78].mxu0 %v5087_v40 }
  0xf5   : > { %2638 = vmatprep.mubr.f32.mxu0 %v5088_v12  ;;  %2981 = vmatpush3.bf16.msra.mxu0 %v2978_v11  ;;  %v3046_v11 = vld [vmem:[%s3279_s21 + $0x68] sm:$0xff] }
  0xf6   : > { %1338 = vmatmul.mubr.f32.gmra.mrb[94].mxu1 %v5070_v53  ;;  %v5093_v53 = vld [vmem:[#allocation28_spill] sm:$0xff] }
  0xf7   : > { %1697 = vmatprep.mubr.f32.mxu1 %v3737_v25  ;;  %v5094_v25 = vld [vmem:[#allocation29_spill] sm:$0xff] }
  0xf8   : > { %2639 = vmatmul.mubr.f32.gmra.mrb[80].mxu0 %v5089_v30 }
  0xf9   : > { %2641 = vmatprep.mubr.f32.mxu0 %v5090_v14 }
  0xfa   : > { %1698 = vmatmul.mubr.f32.vlgmr.msra.gmra.mrb[96].mxu1 %v3041_v23  ;;  %v3047_v23 = vld [vmem:[%s3279_s21 + $0x78] sm:$0xff] }
  0xfb   : > { %1702 = vmatprep.mubr.f32.mxu1 %v3776_v1  ;;  %v5096_v1 = vld [vmem:[#allocation34_spill] sm:$0xff] }
  0xfc   : > { %2642 = vmatmul.mubr.f32.gmra.mrb[82].mxu0 %v5091_v18 }
  0xfd   : > { %2644 = vmatprep.mubr.f32.mxu0 %v5092_v36 }
  0xfe   : > { %1703 = vmatmul.mubr.f32.gmra.mrb[98].mxu1 %v3042_v6 }
  0xff   : > { %1707 = vmatprep.mubr.f32.mxu1 %v3816_v63  ;;  %v5098_v63 = vld [vmem:[#allocation39_spill] sm:$0xff] }
 0x100   : > { %2645 = vmatmul.mubr.f32.gmra.mrb[84].mxu0 %v5093_v53 }
 0x101   : > { %2647 = vmatprep.mubr.f32.mxu0 %v5094_v25 }
 0x102   : > { %1708 = vmatmul.mubr.f32.gmra.mrb[100].mxu1 %v3043_v21  ;;  %v3048_v21 = vld [vmem:[%s3279_s21 + $0x80] sm:$0xff] }
 0x103   : > { %1712 = vmatprep.mubr.f32.mxu1 %v3855_v5 }
 0x104   : > { %2648 = vmatmul.mubr.f32.gmra.mrb[86].mxu0 %v5095_v55 }
 0x105   : > { %2650 = vmatprep.mubr.f32.mxu0 %v5096_v1 }
 0x106   : > { %1713 = vmatmul.mubr.f32.gmra.mrb[102].mxu1 %v3044_v27 }
 0x107   : > { %1717 = vmatprep.mubr.f32.mxu1 %v3895_v22 }
 0x108   : > { %2651 = vmatmul.mubr.f32.gmra.mrb[88].mxu0 %v5097_v45 }
 0x109   : > { %2653 = vmatprep.mubr.f32.mxu0 %v5098_v63 }
 0x10a   : > { %1718 = vmatmul.mubr.f32.gmra.mrb[104].mxu1 %v3045_v47  ;;  %v3049_v47 = vld [vmem:[%s3279_s21 + $0x90] sm:$0xff] }
 0x10b   : > { %1722 = vmatprep.mubr.f32.mxu1 %v3928_v4 }
 0x10c   : > { %2654 = vmatmul.mubr.f32.gmra.mrb[90].mxu0 %v5099_v51 }
 0x10d   : > { %v4381_v5 = vpop.f32.mrb[0].mxu1  ;;  %2656 = vmatprep.mubr.f32.mxu0 %v5100_v19 }
 0x10e   : > { %v959_v15 = vpop.f32.mrb[1].mxu1  ;;  %1723 = vmatmul.mubr.f32.gmra.mrb[106].mxu1 %v3046_v11 }
 0x10f   : > { %1727 = vmatprep.mubr.f32.mxu1 %v3953_v49 }
 0x110   : > { %2657 = vmatmul.mubr.f32.gmra.mrb[92].mxu0 %v3900_v48 }
 0x111   : > { %v4387_v22 = vpop.f32.mrb[2].mxu1  ;;  %2659 = vmatprep.mubr.f32.mxu0 %v3912_v35 }
 0x112   : > { %v4390_v4 = vpop.f32.mrb[3].mxu1  ;;  %1728 = vmatmul.mubr.f32.gmra.mrb[108].mxu1 %v3047_v23 }
 0x113   : > { %1732 = vmatprep.mubr.f32.mxu1 %v3973_v43 }
 0x114   : > { %2660 = vmatmul.mubr.f32.gmra.mrb[94].mxu0 %v3934_v16 }
 0x115   : > { %v4395_v6 = vpop.f32.mrb[4].mxu1  ;;  %2694 = vmatprep.mubr.f32.mxu0 %v5076_v7 }
 0x116   : > { %v4398_v49 = vpop.f32.mrb[5].mxu1  ;;  %1733 = vmatmul.mubr.f32.gmra.mrb[110].mxu1 %v3048_v21 }
 0x117   : > { %1737 = vmatprep.mubr.f32.mxu1 %v3998_v44 }
 0x118   : > { %2695 = vmatmul.mubr.f32.vlgmr.msra.gmra.mrb[96].mxu0 %v5077_v33  ;;  %v3050_v33 = vld [vmem:[%s3279_s21 + $0x98] sm:$0xff] }
 0x119   : > { %v4403_v27 = vpop.f32.mrb[6].mxu1  ;;  %2697 = vmatprep.mubr.f32.mxu0 %v5078_v38 }
 0x11a   : > { %v4406_v43 = vpop.f32.mrb[7].mxu1  ;;  %1738 = vmatmul.mubr.f32.gmra.mrb[112].mxu1 %v3049_v47 }
 0x11b   : > { %1742 = vmatprep.mubr.f32.mxu1 %v4012_v8 }
 0x11c   : > { %2698 = vmatmul.mubr.f32.gmra.mrb[98].mxu0 %v5079_v62  ;;  %v3051_v62 = vld [vmem:[%s3279_s21 + $0xa8] sm:$0xff] }
 0x11d   : > { %v4411_v7 = vpop.f32.mrb[8].mxu1  ;;  %2700 = vmatprep.mubr.f32.mxu0 %v5080_v0 }
 0x11e   : > { %v4414_v44 = vpop.f32.mrb[9].mxu1  ;;  %1743 = vmatmul.mubr.f32.gmra.mrb[114].mxu1 %v3050_v33 }
 0x11f   : > { %1747 = vmatprep.mubr.f32.mxu1 %v4028_v37 }
 0x120   : > { %2701 = vmatmul.mubr.f32.gmra.mrb[100].mxu0 %v5081_v42  ;;  %v3052_v42 = vld [vmem:[%s3279_s21 + $0xb0] sm:$0xff] }
 0x121   : > { %v4419_v38 = vpop.f32.mrb[10].mxu1  ;;  %2703 = vmatprep.mubr.f32.mxu0 %v5082_v2 }
 0x122   : > { %v4422_v8 = vpop.f32.mrb[11].mxu1  ;;  %1748 = vmatmul.mubr.f32.gmra.mrb[116].mxu1 %v3051_v62 }
 0x123   : > { %1752 = vmatprep.mubr.f32.mxu1 %v4043_v31 }
 0x124   : > { %2704 = vmatmul.mubr.f32.gmra.mrb[102].mxu0 %v5083_v39  ;;  %v3053_v39 = vld [vmem:[%s3279_s21 + $0xc0] sm:$0xff] }
 0x125   : > { %v4427_v0 = vpop.f32.mrb[12].mxu1  ;;  %2706 = vmatprep.mubr.f32.mxu0 %v5084_v52 }
 0x126   : > { %v4430_v37 = vpop.f32.mrb[13].mxu1  ;;  %1753 = vmatmul.mubr.f32.gmra.mrb[118].mxu1 %v3052_v42 }
 0x127   : > { %1757 = vmatprep.mubr.f32.mxu1 %v4059_v34 }
 0x128   : > { %2707 = vmatmul.mubr.f32.gmra.mrb[104].mxu0 %v5085_v3 }
 0x129   : > { %v4435_v2 = vpop.f32.mrb[14].mxu1  ;;  %2709 = vmatprep.mubr.f32.mxu0 %v5086_v26  ;;  %v3054_v26 = vld [vmem:[%s3279_s21 + $0xc8] sm:$0xff] }
 0x12a   : > { %v4438_v31 = vpop.f32.mrb[15].mxu1  ;;  %1758 = vmatmul.mubr.f32.gmra.mrb[120].mxu1 %v3053_v39 }
 0x12b   : > { %v734_v11 = vpop.f32.mrb[0].mxu0  ;;  %1762 = vmatprep.mubr.f32.mxu1 %v4074_v57 }
 0x12c   : > { %v4442_v52 = vadd.f32 %v959_v15, %v734_v11  ;;  %2710 = vmatmul.mubr.f32.gmra.mrb[106].mxu0 %v5087_v40  ;;  %v736_v23 = vpop.f32.mrb[1].mxu0 }
 0x12d   : > { %v4445_v34 = vpop.f32.mrb[16].mxu1  ;;  %2712 = vmatprep.mubr.f32.mxu0 %v5088_v12  ;;  %v3055_v12 = vld [vmem:[%s3279_s21 + $0xd8] sm:$0xff] }
 0x12e   : > { %v4448_v3 = vpop.f32.mrb[17].mxu1  ;;  %1763 = vmatmul.mubr.f32.gmra.mrb[122].mxu1 %v3054_v26 }
 0x12f   : > { %v739_v21 = vpop.f32.mrb[2].mxu0  ;;  %1767 = vmatprep.mubr.f32.mxu1 %v4090_v41 }
 0x130   : > { %v4453_v47 = vadd.f32 %v4381_v5, %v739_v21  ;;  %2713 = vmatmul.mubr.f32.gmra.mrb[108].mxu0 %v5089_v30  ;;  %v741_v57 = vpop.f32.mrb[3].mxu0 }
 0x131   : > { %v4456_v40 = vpop.f32.mrb[18].mxu1  ;;  %2715 = vmatprep.mubr.f32.mxu0 %v5090_v14  ;;  %v3056_v14 = vld [vmem:[%s3279_s21 + $0xe0] sm:$0xff] }
 0x132   : > { %v4459_v15 = vpop.f32.mrb[19].mxu1  ;;  %1768 = vmatmul.mubr.f32.gmra.mrb[124].mxu1 %v3055_v12  ;;  %v3060_v12 = vld [vmem:[%s3279_s21 + $0x110] sm:$0xff] }
 0x133   : > { %v744_v33 = vpop.f32.mrb[4].mxu0  ;;  %1772 = vmatprep.mubr.f32.mxu1 %v4105_v32 }
 0x134   : > { %v4464_v41 = vadd.f32 %v4390_v4, %v744_v33  ;;  %2716 = vmatmul.mubr.f32.gmra.mrb[110].mxu0 %v5091_v18  ;;  %v746_v5 = vpop.f32.mrb[5].mxu0 }
 0x135   : > { %v4467_v30 = vpop.f32.mrb[20].mxu1  ;;  %2718 = vmatprep.mubr.f32.mxu0 %v5092_v36  ;;  %v3057_v36 = vld [vmem:[%s3279_s21 + $0xf0] sm:$0xff] }
 0x136   : > { %v4470_v62 = vpop.f32.mrb[21].mxu1  ;;  %1773 = vmatmul.mubr.f32.gmra.mrb[126].mxu1 %v3056_v14 }
 0x137   : > { %v749_v42 = vpop.f32.mrb[6].mxu0  ;;  %1777 = vmatprep.mubr.f32.mxu1 %v4121_v29 }
 0x138   : > { %v4475_v32 = vadd.f32 %v4387_v22, %v749_v42  ;;  %2719 = vmatmul.mubr.f32.gmra.mrb[112].mxu0 %v5093_v53  ;;  %v751_v4 = vpop.f32.mrb[7].mxu0  ;;  %v3061_v42 = vld [vmem:[%s3279_s21 + $0x120] sm:$0xff] }
 0x139   : > { %v4478_v18 = vpop.f32.mrb[22].mxu1  ;;  %2721 = vmatprep.mubr.f32.mxu0 %v5094_v25  ;;  %v3058_v25 = vld [vmem:[%s3279_s21 + $0xf8] sm:$0xff] }
 0x13a   : > { %v4481_v39 = vpop.f32.mrb[23].mxu1  ;;  %1778 = vmatmul.mubr.f32.gmra.mrb[128].mxu1 %v3057_v36  ;;  %v4537_v36 = vld [vmem:[%s3279_s21 + $0x1a8] sm:$0x3] }
 0x13b   : > { %v754_v11 = vpop.f32.mrb[8].mxu0  ;;  %1782 = vmatprep.mubr.f32.mxu1 %v4136_v17 }
 0x13c   : > { %v4486_v29 = vadd.f32 %v4398_v49, %v754_v11  ;;  %v756_v22 = vpop.f32.mrb[9].mxu0  ;;  %2722 = vmatmul.mubr.f32.gmra.mrb[114].mxu0 %v5095_v55 }
 0x13d   : > { %v4489_v53 = vpop.f32.mrb[24].mxu1  ;;  %2724 = vmatprep.mubr.f32.mxu0 %v5096_v1  ;;  %v3059_v1 = vld [vmem:[%s3279_s21 + $0x108] sm:$0xff]  ;;  %v1581_v22 = vrot.slane %v4537_v36, 2 }
 0x13e   : > { %v4492_v23 = vpop.f32.mrb[25].mxu1  ;;  %1783 = vmatmul.mubr.f32.gmra.mrb[130].mxu1 %v3058_v25 }
 0x13f   : > { %v759_v26 = vpop.f32.mrb[10].mxu0  ;;  %1787 = vmatprep.mubr.f32.mxu1 %v4152_v10 }
 0x140   : > { %v4497_v17 = vadd.f32 %v4395_v6, %v759_v26  ;;  %v761_v49 = vpop.f32.mrb[11].mxu0  ;;  %2725 = vmatmul.mubr.f32.gmra.mrb[116].mxu0 %v5097_v45 }
 0x141   : > { %v4500_v21 = vpop.f32.mrb[26].mxu1  ;;  %2727 = vmatprep.mubr.f32.mxu0 %v5098_v63  ;;  %v3062_v49 = vld [vmem:[%s3279_s21 + $0x128] sm:$0xff] }
 0x142   : > { %v4503_v55 = vpop.f32.mrb[27].mxu1  ;;  %1788 = vmatmul.mubr.f32.gmra.mrb[132].mxu1 %v3059_v1 }
 0x143   : > { %v764_v57 = vpop.f32.mrb[12].mxu0  ;;  %1792 = vmatprep.mubr.f32.mxu1 %v4167_v60  ;;  %v4519_v60 = vld [vmem:[%s3279_s21 + $0x198] sm:$0xff] }
 0x144   : > { %v4508_v10 = vadd.f32 %v4406_v43, %v764_v57  ;;  %v766_v6 = vpop.f32.mrb[13].mxu0  ;;  %2728 = vmatmul.mubr.f32.gmra.mrb[118].mxu0 %v5099_v51  ;;  %v4522_v43 = vld [vmem:[%s3279_s21 + $0x1a0] sm:$0xff] }
 0x145   : > { %v4511_v45 = vpop.f32.mrb[28].mxu1  ;;  %2730 = vmatprep.mubr.f32.mxu0 %v5100_v19  ;;  %v1579_v4 = vrot.slane %v4522_v43, 2 }
 0x146   : > { %v4514_v63 = vpop.f32.mrb[29].mxu1  ;;  %1793 = vmatmul.mubr.f32.gmra.mrb[134].mxu1 %v3060_v12  ;;  %v3063_v12 = vld [vmem:[%s3279_s21 + $0x138] sm:$0xff] }
 0x147   : > { %v769_v33 = vpop.f32.mrb[14].mxu0  ;;  %1797 = vmatprep.mubr.f32.mxu1 %v4183_v46  ;;  %v1578_v46 = vrot.slane %v4519_v60, 2 }
 0x148   : > { %v4525_v5 = vadd.f32 %v4403_v27, %v769_v33  ;;  %v771_v51 = vpop.f32.mrb[15].mxu0  ;;  %2731 = vmatmul.mubr.f32.gmra.mrb[120].mxu0 %v3900_v48 }
 0x149   : > { %v4528_v14 = vpop.f32.mrb[30].mxu1  ;;  %2733 = vmatprep.mubr.f32.mxu0 %v3912_v35 }
 0x14a   : > { %v4531_v19 = vpop.f32.mrb[31].mxu1  ;;  %1798 = vmatmul.mubr.f32.gmra.mrb[136].mxu1 %v3061_v42 }
 0x14b   : > { %v774_v27 = vpop.f32.mrb[16].mxu0  ;;  %1802 = vmatprep.mubr.f32.mxu1 %v4198_v20  ;;  %v1580_v20 = vsel %vm442_vm0, %v1578_v46, %v1579_v4  ;;  %v3064_v46 = vld [vmem:[%s3279_s21 + $0x140] sm:$0xff] }
 0x14c   : > { %v4541_v48 = vadd.f32 %v4414_v44, %v774_v27  ;;  %v776_v11 = vpop.f32.mrb[17].mxu0  ;;  %2734 = vmatmul.mubr.f32.gmra.mrb[122].mxu0 %v3934_v16 }
 0x14d   : > { %v1184_v35 = vpop.f32.mrb[32].mxu1  ;;  %2736 = vmatprep.mubr.f32.mxu0 %v3940_v56 }
 0x14e   : > { %v4547_v25 = vadd.f32 %v1184_v35, %v4442_v52  ;;  %v1186_v26 = vpop.f32.mrb[33].mxu1  ;;  %1803 = vmatmul.mubr.f32.gmra.mrb[138].mxu1 %v3062_v49  ;;  %v1582_v52 = vsel %vm442_vm0, %v1579_v4, %v1581_v22  ;;  %v3065_v35 = vld [vmem:[%s3279_s21 + $0x150] sm:$0xff] }
 0x14f   : > { %v779_v1 = vpop.f32.mrb[18].mxu0  ;;  %1807 = vmatprep.mubr.f32.mxu1 %v4214_v59 }
 0x150   : > { %v4553_v44 = vadd.f32 %v4411_v7, %v779_v1  ;;  %v781_v16 = vpop.f32.mrb[19].mxu0  ;;  %2737 = vmatmul.mubr.f32.gmra.mrb[124].mxu0 %v3958_v61 }
 0x151   : > { %v1189_v56 = vpop.f32.mrb[34].mxu1  ;;  %2739 = vmatprep.mubr.f32.mxu0 %v1580_v20  ;;  %v3066_v20 = vld [vmem:[%s3279_s21 + $0x158] sm:$0xff] }
 0x152   : > { %v4558_v57 = vadd.f32 %v1189_v56, %v4453_v47  ;;  %v1191_v6 = vpop.f32.mrb[35].mxu1  ;;  %1808 = vmatmul.mubr.f32.gmra.mrb[140].mxu1 %v3063_v12 }
 0x153   : > { %v784_v33 = vpop.f32.mrb[20].mxu0  ;;  %1812 = vmatprep.mubr.f32.mxu1 %v4223_v24 }
 0x154   : > { %v4563_v59 = vadd.f32 %v4422_v8, %v784_v33  ;;  %v786_v7 = vpop.f32.mrb[21].mxu0  ;;  %2740 = vmatmul.mubr.f32.gmra.mrb[126].mxu0 %v1582_v52  ;;  %v3067_v52 = vld [vmem:[%s3279_s21 + $0x168] sm:$0xff] }
 0x155   : > { %v1194_v61 = vpop.f32.mrb[36].mxu1  ;;  %v3068_v7 = vld [vmem:[%s3279_s21 + $0x170] sm:$0xff] }
 0x156   : > { %v4566_v51 = vadd.f32 %v1194_v61, %v4464_v41  ;;  %v1196_v42 = vpop.f32.mrb[37].mxu1  ;;  %1813 = vmatmul.mubr.f32.gmra.mrb[142].mxu1 %v3064_v46 }
 0x157   : > { %v789_v47 = vpop.f32.mrb[22].mxu0  ;;  %1817 = vmatprep.mubr.f32.mxu1 %v4232_v9 }
 0x158   : > { %v4571_v4 = vadd.f32 %v4419_v38, %v789_v47  ;;  %v791_v24 = vpop.f32.mrb[23].mxu0 }
 0x159   : > { %v1199_v27 = vpop.f32.mrb[38].mxu1  ;;  %v3069_v24 = vld [vmem:[%s3279_s21 + $0x180] sm:$0xff] }
 0x15a   : > { %v4574_v8 = vadd.f32 %v1199_v27, %v4475_v32  ;;  %v1201_v11 = vpop.f32.mrb[39].mxu1  ;;  %1818 = vmatmul.mubr.f32.gmra.mrb[144].mxu1 %v3065_v35  ;;  %v1574_v35 = vrot.slane %v4537_v36, 1 }
 0x15b   : > { %v794_v41 = vpop.f32.mrb[24].mxu0  ;;  %1822 = vmatprep.mubr.f32.mxu1 %v4240_v28 }
 0x15c   : > { %v4579_v22 = vadd.f32 %v4430_v37, %v794_v41  ;;  %v796_v26 = vpop.f32.mrb[25].mxu0 }
 0x15d   : > { %v1204_v9 = vpop.f32.mrb[40].mxu1 }
 0x15e   : > { %v4582_v38 = vadd.f32 %v1204_v9, %v4486_v29  ;;  %v1206_v49 = vpop.f32.mrb[41].mxu1  ;;  %1823 = vmatmul.mubr.f32.gmra.mrb[146].mxu1 %v3066_v20 }
 0x15f   : > { %v799_v32 = vpop.f32.mrb[26].mxu0  ;;  %1827 = vmatprep.mubr.f32.mxu1 %v4249_v58 }
 0x160   : > { %v4587_v1 = vadd.f32 %v4427_v0, %v799_v32  ;;  %v801_v16 = vpop.f32.mrb[27].mxu0 }
 0x161   : > { %v1209_v28 = vpop.f32.mrb[42].mxu1 }
 0x162   : > { %v4590_v37 = vadd.f32 %v1209_v28, %v4497_v17  ;;  %v1211_v56 = vpop.f32.mrb[43].mxu1  ;;  %1828 = vmatmul.mubr.f32.gmra.mrb[148].mxu1 %v3067_v52 }
 0x163   : > { %v804_v29 = vpop.f32.mrb[28].mxu0  ;;  %1832 = vmatprep.mubr.f32.mxu1 %v4257_v13  ;;  %v1571_v13 = vrot.slane %v4519_v60, 1 }
 0x164   : > { %v4595_v6 = vadd.f32 %v4438_v31, %v804_v29  ;;  %v806_v12 = vpop.f32.mrb[29].mxu0  ;;  %v1572_v31 = vrot.slane %v4522_v43, 1 }
 0x165   : > { %v1214_v58 = vpop.f32.mrb[44].mxu1 }
 0x166   : > { %v4598_v0 = vadd.f32 %v1214_v58, %v4508_v10  ;;  %v1216_v33 = vpop.f32.mrb[45].mxu1  ;;  %1833 = vmatmul.mubr.f32.gmra.mrb[150].mxu1 %v3068_v7  ;;  %v1573_v11 = vsel %vm329_vm1, %v1571_v13, %v1572_v31 }
 0x167   : > { %v809_v17 = vpop.f32.mrb[30].mxu0  ;;  %1837 = vmatprep.mubr.f32.mxu1 %v4266_v50 }
 0x168   : > { %v4603_v61 = vadd.f32 %v4435_v2, %v809_v17  ;;  %v811_v42 = vpop.f32.mrb[31].mxu0 }
 0x169   : > { %v1219_v46 = vpop.f32.mrb[46].mxu1 }
 0x16a   : > { %v4608_v47 = vadd.f32 %v1219_v46, %v4525_v5  ;;  %v1221_v10 = vpop.f32.mrb[47].mxu1  ;;  %1838 = vmatmul.mubr.f32.gmra.mrb[152].mxu1 %v3069_v24  ;;  %v3070_v5 = vld [vmem:[%s3279_s21 + $0x188] sm:$0xff]  ;;  %s208_s21 = sand.u32 1, %s3133_s13  }
 0x16b   : > { %v814_v27 = vpop.f32.mrb[32].mxu0  ;;  %1842 = vmatprep.mubr.f32.mxu1 %v4274_v54  ;;  %v1575_v54 = vsel %vm329_vm1, %v1572_v31, %v1574_v35  ;;  %s2349_s4 = sshll.u32 %s208_s21, 8  ;;  %s4891_s11 = scalar_lea.sflag [#allocation3], %s208_s21 }
 0x16c   : > { %v1040_v50 = vadd.f32 %v4448_v3, %v814_v27  ;;  %v816_v2 = vpop.f32.mrb[33].mxu0  ;;  %s4785_s5 = scalar_lea.vmem [#allocation2], %s2349_s4 }
 0x16d   : > { %v1224_v41 = vpop.f32.mrb[48].mxu1  ;;  %s2236_s7 = sshll.u32 %s4785_s5, 4  ;;  %s4886_s7 = int_to_ptr.vmem [resolvable:$true] %s2236_s7 }
 0x16e   : > { %v4616_v26 = vadd.f32 %v1224_v41, %v4541_v48  ;;  %v1226_v9 = vpop.f32.mrb[49].mxu1  ;;  %1843 = vmatmul.mubr.f32.gmra.mrb[154].mxu1 %v3070_v5  ;;  %s3071_s15 = scalar_lea.vmem %s4886_s7, 4096  ;;  %p3078_p1 = scmp.lt.s32.totalorder %s4886_s7, %s3076_s19 }
 0x16f   : > { %v819_v49 = vpop.f32.mrb[34].mxu0  ;;  %1847 = vmatprep.mubr.f32.mxu1 %v1573_v11  ;;  %p3072_p12 = scmp.ne.s32.totalorder %s4886_s7, %s3071_s15  ;;  %p3079_p2 = scmp.lt.s32.totalorder %s3077_s23, %s3071_s15 }
 0x170   : > { %v1045_v20 = vadd.f32 %v4445_v34, %v819_v49  ;;  %v821_v32 = vpop.f32.mrb[35].mxu0 }
 0x171   : > { %v1229_v3 = vpop.f32.mrb[50].mxu1  ;;  %p3073_p13 = pnand %p3072_p12, %p3215_p4  ;;  %p3080_p3 = por %p3079_p2, %p3078_p1 }
 0x172   : > { %v4622_v16 = vadd.f32 %v1229_v3, %v4553_v44  ;;  %v1231_v28 = vpop.f32.mrb[51].mxu1  ;;  %1848 = vmatmul.mubr.f32.gmra.mrb[156].mxu1 %v4519_v60 }
 0x173   : > { %v824_v36 = vpop.f32.mrb[36].mxu0  ;;  %1852 = vmatprep.mubr.f32.mxu1 %v1575_v54  ;;  %p3074_p0 = pneg %p3073_p13 }
 0x174   : > { %v1050_v48 = vadd.f32 %v4459_v15, %v824_v36  ;;  %v826_v56 = vpop.f32.mrb[37].mxu0 }
 0x175   : > { %v1234_v52 = vpop.f32.mrb[52].mxu1  ;;  %p3081_p5 = pnand %p3080_p3, %p3074_p0 }
 0x176   : > { %v4627_v29 = vadd.f32 %v1234_v52, %v4563_v59  ;;  %v1236_v34 = vpop.f32.mrb[53].mxu1  ;;  %1853 = vmatmul.mubr.f32.gmra.mrb[158].mxu1 %v4522_v43 }
 0x177   : > { %v829_v12 = vpop.f32.mrb[38].mxu0 }
 0x178   : > { %v1055_v58 = vadd.f32 %v4456_v40, %v829_v12  ;;  %v831_v44 = vpop.f32.mrb[39].mxu0 }
 0x179   : > { %v1239_v33 = vpop.f32.mrb[54].mxu1 }
 0x17a   : > { %v4632_v7 = vadd.f32 %v1239_v33, %v4571_v4  ;;  %v1241_v60 = vpop.f32.mrb[55].mxu1 }
 0x17b   : > { %v834_v17 = vpop.f32.mrb[40].mxu0 }
 0x17c   : > { %v1060_v15 = vadd.f32 %v4470_v62, %v834_v17  ;;  %v836_v42 = vpop.f32.mrb[41].mxu0 }
 0x17d   : > { %v1244_v13 = vpop.f32.mrb[56].mxu1 }
 0x17e   : > { %v4636_v59 = vadd.f32 %v1244_v13, %v4579_v22  ;;  %v1246_v31 = vpop.f32.mrb[57].mxu1 }
 0x17f   : > { %v839_v46 = vpop.f32.mrb[42].mxu0 }
 0x180   : > { %v1065_v43 = vadd.f32 %v4467_v30, %v839_v46  ;;  %v841_v10 = vpop.f32.mrb[43].mxu0 }
 0x181   : > { %v1249_v40 = vpop.f32.mrb[58].mxu1 }
 0x182   : > { %v4640_v24 = vadd.f32 %v1249_v40, %v4587_v1  ;;  %v1251_v4 = vpop.f32.mrb[59].mxu1 }
 0x183   : > { %v844_v27 = vpop.f32.mrb[44].mxu0 }
 0x184   : > { %v1070_v2 = vadd.f32 %v4481_v39, %v844_v27  ;;  %v846_v11 = vpop.f32.mrb[45].mxu0 }
 0x185   : > { %v1254_v62 = vpop.f32.mrb[60].mxu1 }
 0x186   : > { %v4644_v35 = vadd.f32 %v1254_v62, %v4595_v6  ;;  %v1256_v22 = vpop.f32.mrb[61].mxu1 }
 0x187   : > { %v849_v41 = vpop.f32.mrb[46].mxu0 }
 0x188   : > { %v1075_v9 = vadd.f32 %v4478_v18, %v849_v41  ;;  %v851_v5 = vpop.f32.mrb[47].mxu0 }
 0x189   : > { %v1259_v30 = vpop.f32.mrb[62].mxu1 }
 0x18a   : > { %v4648_v49 = vadd.f32 %v1259_v30, %v4603_v61  ;;  %v1261_v1 = vpop.f32.mrb[63].mxu1 }
 0x18b   : > { %v854_v32 = vpop.f32.mrb[48].mxu0 }
 0x18c   : > { %v1080_v54 = vadd.f32 %v4492_v23, %v854_v32  ;;  %v856_v3 = vpop.f32.mrb[49].mxu0 }
 0x18d   : > { %v1264_v39 = vpop.f32.mrb[64].mxu1 }
 0x18e   : > { %v4651_v28 = vadd.f32 %v1264_v39, %v1040_v50  ;;  %v1266_v36 = vpop.f32.mrb[65].mxu1 }
 0x18f   : > { %v859_v6 = vpop.f32.mrb[50].mxu0 }
 0x190   : > { %v1085_v56 = vadd.f32 %v4489_v53, %v859_v6  ;;  %v861_v52 = vpop.f32.mrb[51].mxu0 }
 0x191   : > { %v1269_v34 = vpop.f32.mrb[66].mxu1 }
 0x192   : > { %v4654_v18 = vadd.f32 %v1269_v34, %v1045_v20  ;;  %v1271_v12 = vpop.f32.mrb[67].mxu1 }
 0x193   : > { %v864_v44 = vpop.f32.mrb[52].mxu0 }
 0x194   : > { %v1090_v61 = vadd.f32 %v4503_v55, %v864_v44  ;;  %v866_v33 = vpop.f32.mrb[53].mxu0 }
 0x195   : > { %v1274_v60 = vpop.f32.mrb[68].mxu1 }
 0x196   : > { %v4657_v17 = vadd.f32 %v1274_v60, %v1050_v48  ;;  %v1276_v23 = vpop.f32.mrb[69].mxu1 }
 0x197   : > { %v869_v42 = vpop.f32.mrb[54].mxu0 }
 0x198   : > { %v1095_v50 = vadd.f32 %v4500_v21, %v869_v42  ;;  %v871_v13 = vpop.f32.mrb[55].mxu0 }
 0x199   : > { %v1279_v31 = vpop.f32.mrb[70].mxu1 }
 0x19a   : > { %v4660_v46 = vadd.f32 %v1279_v31, %v1055_v58  ;;  %v1281_v53 = vpop.f32.mrb[71].mxu1 }
 0x19b   : > { %v874_v10 = vpop.f32.mrb[56].mxu0 }
 0x19c   : > { %v1100_v20 = vadd.f32 %v4514_v63, %v874_v10  ;;  %v876_v40 = vpop.f32.mrb[57].mxu0 }
 0x19d   : > { %v1284_v4 = vpop.f32.mrb[72].mxu1 }
 0x19e   : > { %v4663_v27 = vadd.f32 %v1284_v4, %v1060_v15  ;;  %v1286_v55 = vpop.f32.mrb[73].mxu1 }
 0x19f   : > { %v879_v11 = vpop.f32.mrb[58].mxu0 }
 0x1a0   : > { %v1105_v48 = vadd.f32 %v4511_v45, %v879_v11  ;;  %v881_v62 = vpop.f32.mrb[59].mxu0 }
 0x1a1   : > { %v1289_v22 = vpop.f32.mrb[74].mxu1 }
 0x1a2   : > { %v4666_v41 = vadd.f32 %v1289_v22, %v1065_v43  ;;  %v1291_v21 = vpop.f32.mrb[75].mxu1 }
 0x1a3   : > { %v884_v5 = vpop.f32.mrb[60].mxu0 }
 0x1a4   : > { %v1110_v58 = vadd.f32 %v4531_v19, %v884_v5  ;;  %v886_v30 = vpop.f32.mrb[61].mxu0 }
 0x1a5   : > { %v1294_v1 = vpop.f32.mrb[76].mxu1 }
 0x1a6   : > { %v4669_v32 = vadd.f32 %v1294_v1, %v1070_v2  ;;  %v1296_v63 = vpop.f32.mrb[77].mxu1 }
 0x1a7   : > { %v889_v3 = vpop.f32.mrb[62].mxu0 }
 0x1a8   : > { %v1115_v15 = vadd.f32 %v4528_v14, %v889_v3  ;;  %v891_v39 = vpop.f32.mrb[63].mxu0 }
 0x1a9   : > { %v1299_v36 = vpop.f32.mrb[78].mxu1 }
 0x1aa   : > { %v4672_v6 = vadd.f32 %v1299_v36, %v1075_v9  ;;  %v1301_v45 = vpop.f32.mrb[79].mxu1 }
 0x1ab   : > { %v2616_v52 = vpop.f32.mrb[64].mxu0 }
 0x1ac   : > { %v4675_v43 = vadd.f32 %v2616_v52, %v4558_v57  ;;  %v1409_v34 = vpop.f32.mrb[65].mxu0 }
 0x1ad   : > { %v1304_v12 = vpop.f32.mrb[80].mxu1  ;;  %v4678_v19 = vadd.f32 %v1409_v34, %v4547_v25 }
 0x1ae   : > { %v4680_v2 = vadd.f32 %v1304_v12, %v1080_v54  ;;  %v1306_v44 = vpop.f32.mrb[81].mxu1 }
 0x1af   : > { %v2619_v33 = vpop.f32.mrb[66].mxu0 }
 0x1b0   : > { %v4683_v14 = vadd.f32 %v2619_v33, %v4574_v8  ;;  %v1419_v60 = vpop.f32.mrb[67].mxu0 }
 0x1b1   : > { %v1309_v9 = vpop.f32.mrb[82].mxu1  ;;  %v4686_v23 = vadd.f32 %v1419_v60, %v4566_v51 }
 0x1b2   : > { %v4688_v42 = vadd.f32 %v1309_v9, %v1085_v56  ;;  %v1311_v57 = vpop.f32.mrb[83].mxu1 }
 0x1b3   : > { %v2622_v13 = vpop.f32.mrb[68].mxu0 }
 0x1b4   : > { %v4691_v31 = vadd.f32 %v2622_v13, %v4590_v37  ;;  %v1429_v25 = vpop.f32.mrb[69].mxu0 }
 0x1b5   : > { %v1314_v54 = vpop.f32.mrb[84].mxu1  ;;  %v4694_v53 = vadd.f32 %v1429_v25, %v4582_v38 }
 0x1b6   : > { %v4696_v10 = vadd.f32 %v1314_v54, %v1090_v61  ;;  %v1316_v8 = vpop.f32.mrb[85].mxu1 }
 0x1b7   : > { %v2625_v40 = vpop.f32.mrb[70].mxu0 }
 0x1b8   : > { %v4699_v4 = vadd.f32 %v2625_v40, %v4608_v47  ;;  %v1439_v51 = vpop.f32.mrb[71].mxu0 }
 0x1b9   : > { %v1319_v56 = vpop.f32.mrb[86].mxu1  ;;  %v4702_v55 = vadd.f32 %v1439_v51, %v4598_v0 }
 0x1ba   : > { %v1320_v11 = vadd.f32 %v1319_v56, %v1095_v50  ;;  %v1321_v37 = vpop.f32.mrb[87].mxu1 }
 0x1bb   : > { %v2628_v62 = vpop.f32.mrb[72].mxu0 }
 0x1bc   : > { %v4705_v22 = vadd.f32 %v2628_v62, %v4622_v16  ;;  %v1449_v38 = vpop.f32.mrb[73].mxu0 }
 0x1bd   : > { %v1324_v21 = vpop.f32.mrb[88].mxu1  ;;  %v4708_v61 = vadd.f32 %v1449_v38, %v4616_v26 }
 0x1be   : > { %v1325_v5 = vadd.f32 %v1324_v21, %v1100_v20  ;;  %v1326_v30 = vpop.f32.mrb[89].mxu1 }
 0x1bf   : > { %v2631_v47 = vpop.f32.mrb[74].mxu0 }
 0x1c0   : > { %v4711_v1 = vadd.f32 %v2631_v47, %v4632_v7  ;;  %v1459_v63 = vpop.f32.mrb[75].mxu0 }
 0x1c1   : > { %v1329_v0 = vpop.f32.mrb[90].mxu1  ;;  %v4714_v50 = vadd.f32 %v1459_v63, %v4627_v29 }
 0x1c2   : > { %v1330_v3 = vadd.f32 %v1329_v0, %v1105_v48  ;;  %v1331_v39 = vpop.f32.mrb[91].mxu1 }
 0x1c3   : > { %v2634_v16 = vpop.f32.mrb[76].mxu0 }
 0x1c4   : > { %v4717_v36 = vadd.f32 %v2634_v16, %v4640_v24  ;;  %v1469_v45 = vpop.f32.mrb[77].mxu0 }
 0x1c5   : > { %v1334_v26 = vpop.f32.mrb[92].mxu1  ;;  %v4720_v20 = vadd.f32 %v1469_v45, %v4636_v59 }
 0x1c6   : > { %v1335_v52 = vadd.f32 %v1334_v26, %v1110_v58  ;;  %v1336_v34 = vpop.f32.mrb[93].mxu1 }
 0x1c7   : > { %v2637_v7 = vpop.f32.mrb[78].mxu0 }
 0x1c8   : > { %v4723_v12 = vadd.f32 %v2637_v7, %v4648_v49  ;;  %v1479_v44 = vpop.f32.mrb[79].mxu0 }
 0x1c9   : > { %v1339_v29 = vpop.f32.mrb[94].mxu1  ;;  %v4726_v48 = vadd.f32 %v1479_v44, %v4644_v35 }
 0x1ca   : > { %v1340_v33 = vadd.f32 %v1339_v29, %v1115_v15  ;;  %v1341_v60 = vpop.f32.mrb[95].mxu1 }
 0x1cb   : > { %v2640_v24 = vpop.f32.mrb[80].mxu0 }
 0x1cc   : > { %v4729_v9 = vadd.f32 %v2640_v24, %v4654_v18  ;;  %v1489_v57 = vpop.f32.mrb[81].mxu0 }
 0x1cd   : > { %v4732_v59 = vadd.f32 %v1489_v57, %v4651_v28  ;;  %v1699_v58 = vpop.f32.mrb[96].mxu1 }
 0x1ce   : > { %v1701_v13 = vpop.f32.mrb[97].mxu1 }
 0x1cf   : > { %v2643_v25 = vpop.f32.mrb[82].mxu0 }
 0x1d0   : > { %v4735_v49 = vadd.f32 %v2643_v25, %v4660_v46  ;;  %v1499_v54 = vpop.f32.mrb[83].mxu0 }
 0x1d1   : > { %v4738_v35 = vadd.f32 %v1499_v54, %v4657_v17  ;;  %v1704_v15 = vpop.f32.mrb[98].mxu1 }
 0x1d2   : > { %v1706_v8 = vpop.f32.mrb[99].mxu1 }
 0x1d3   : > { %v2646_v40 = vpop.f32.mrb[84].mxu0 }
 0x1d4   : > { %v4741_v18 = vadd.f32 %v2646_v40, %v4666_v41  ;;  %v1509_v51 = vpop.f32.mrb[85].mxu0 }
 0x1d5   : > { %v4744_v28 = vadd.f32 %v1509_v51, %v4663_v27  ;;  %v1709_v56 = vpop.f32.mrb[100].mxu1 }
 0x1d6   : > { %v1711_v37 = vpop.f32.mrb[101].mxu1 }
 0x1d7   : > { %v2649_v62 = vpop.f32.mrb[86].mxu0 }
 0x1d8   : > { %v4747_v46 = vadd.f32 %v2649_v62, %v4672_v6  ;;  %v1519_v38 = vpop.f32.mrb[87].mxu0 }
 0x1d9   : > { %v4750_v17 = vadd.f32 %v1519_v38, %v4669_v32  ;;  %v1714_v21 = vpop.f32.mrb[102].mxu1 }
 0x1da   : > { %v1716_v30 = vpop.f32.mrb[103].mxu1 }
 0x1db   : > { %v2652_v47 = vpop.f32.mrb[88].mxu0 }
 0x1dc   : > { %v4753_v41 = vadd.f32 %v2652_v47, %v4688_v42  ;;  %v1529_v63 = vpop.f32.mrb[89].mxu0 }
 0x1dd   : > { %v4756_v27 = vadd.f32 %v1529_v63, %v4680_v2  ;;  %v1719_v0 = vpop.f32.mrb[104].mxu1 }
 0x1de   : > { %v1721_v39 = vpop.f32.mrb[105].mxu1 }
 0x1df   : > { %v2655_v16 = vpop.f32.mrb[90].mxu0 }
 0x1e0   : > { %v4758_v45 = vadd.f32 %v2655_v16, %v1320_v11  ;;  %v1539_v6 = vpop.f32.mrb[91].mxu0 }
 0x1e1   : > { %v4761_v32 = vadd.f32 %v1539_v6, %v4696_v10  ;;  %v1724_v26 = vpop.f32.mrb[106].mxu1 }
 0x1e2   : > { %v1726_v34 = vpop.f32.mrb[107].mxu1 }
 0x1e3   : > { %v2658_v7 = vpop.f32.mrb[92].mxu0 }
 0x1e4   : > { %v4763_v44 = vadd.f32 %v2658_v7, %v1330_v3  ;;  %v1549_v42 = vpop.f32.mrb[93].mxu0 }
 0x1e5   : > { %v4765_v29 = vadd.f32 %v1549_v42, %v1325_v5  ;;  %v1729_v2 = vpop.f32.mrb[108].mxu1  ;;  %v4775_v5 = vld [vmem:[%s4939_s2] ss:$0 sm:$0xff] }
 0x1e6   : > { %v1731_v60 = vpop.f32.mrb[109].mxu1 }
 0x1e7   : > { %v2661_v24 = vpop.f32.mrb[94].mxu0 }
 0x1e8   : > { %v4767_v57 = vadd.f32 %v2661_v24, %v1340_v33  ;;  %v1559_v11 = vpop.f32.mrb[95].mxu0 }
 0x1e9   : > { %v4769_v13 = vadd.f32 %v1559_v11, %v1335_v52  ;;  %v1734_v25 = vpop.f32.mrb[110].mxu1 }
 0x1ea   : > { %v1736_v10 = vpop.f32.mrb[111].mxu1 }
 0x1eb   : > { %v2696_v54 = vpop.f32.mrb[96].mxu0 }
 0x1ec   : > { %v1930_v8 = vadd.f32 %v2696_v54, %v1704_v15  ;;  %v1924_v40 = vpop.f32.mrb[97].mxu0 }
 0x1ed   : > { %v1739_v3 = vpop.f32.mrb[112].mxu1  ;;  %v1925_v51 = vadd.f32 %v1924_v40, %v1699_v58 }
 0x1ee   : > { %v2084_v33 = vadd.f32 %v1930_v8, %v4675_v43  ;;  %v1741_v37 = vpop.f32.mrb[113].mxu1 }
 0x1ef   : > { %v2083_v52 = vadd.f32 %v1925_v51, %v4678_v19  ;;  %v2699_v62 = vpop.f32.mrb[98].mxu0 }
 0x1f0   : > { %v2123_v38 = vadd.f32 %v4775_v5, %v2084_v33  ;;  %v1940_v30 = vadd.f32 %v2699_v62, %v1714_v21  ;;  %v1934_v15 = vpop.f32.mrb[99].mxu0 }
 0x1f1   : > { %v2122_v47 = vadd.f32 %v4775_v5, %v2083_v52  ;;  %v1744_v63 = vpop.f32.mrb[114].mxu1  ;;  %v1935_v39 = vadd.f32 %v1934_v15, %v1709_v56 }
 0x1f2   : > { %v2155_v16 = vmax.f32 %v2123_v38, 0.0  ;;  %v2086_v6 = vadd.f32 %v1940_v30, %v4683_v14  ;;  %v1746_v58 = vpop.f32.mrb[115].mxu1 }
 0x1f3   : > { %v2154_v34 = vmax.f32 %v2122_v47, 0.0  ;;  %v2085_v7 = vadd.f32 %v1935_v39, %v4686_v23  ;;  %v2702_v43 = vpop.f32.mrb[100].mxu0 }
 0x1f4   : > { %2187 = vst [vmem:[%s4785_s5 + $0x8] sm:$0xff] %v2155_v16  ;;  %v2125_v19 = vadd.f32 %v4775_v5, %v2086_v6  ;;  %v1950_v21 = vadd.f32 %v2702_v43, %v1724_v26  ;;  %v1944_v42 = vpop.f32.mrb[101].mxu0 }
 0x1f5   : > { %2186 = vst [vmem:[%s4785_s5] sm:$0xff] %v2154_v34  ;;  %v2124_v56 = vadd.f32 %v4775_v5, %v2085_v7  ;;  %v1749_v14 = vpop.f32.mrb[116].mxu1  ;;  %v1945_v60 = vadd.f32 %v1944_v42, %v1719_v0 }
 0x1f6   : > { %v2157_v24 = vmax.f32 %v2125_v19, 0.0  ;;  %v2088_v23 = vadd.f32 %v1950_v21, %v4691_v31  ;;  %v1751_v11 = vpop.f32.mrb[117].mxu1 }
 0x1f7   : > { %v2156_v10 = vmax.f32 %v2124_v56, 0.0  ;;  %v2087_v54 = vadd.f32 %v1945_v60, %v4694_v53  ;;  %v2705_v8 = vpop.f32.mrb[102].mxu0 }
 0x1f8   : > { %2189 = vst [vmem:[%s4785_s5 + $0x18] sm:$0xff] %v2157_v24  ;;  %v2127_v40 = vadd.f32 %v4775_v5, %v2088_v23  ;;  %v1960_v26 = vadd.f32 %v2705_v8, %v1734_v25  ;;  %v1954_v51 = vpop.f32.mrb[103].mxu0 }
 0x1f9   : > { %2188 = vst [vmem:[%s4785_s5 + $0x10] sm:$0xff] %v2156_v10  ;;  %v2126_v33 = vadd.f32 %v4775_v5, %v2087_v54  ;;  %v1754_v37 = vpop.f32.mrb[118].mxu1  ;;  %v1955_v0 = vadd.f32 %v1954_v51, %v1729_v2 }
 0x1fa   : > { %v2159_v52 = vmax.f32 %v2127_v40, 0.0  ;;  %v2090_v31 = vadd.f32 %v1960_v26, %v4699_v4  ;;  %v1756_v62 = vpop.f32.mrb[119].mxu1 }
 0x1fb   : > { %v2158_v38 = vmax.f32 %v2126_v33, 0.0  ;;  %v2089_v53 = vadd.f32 %v1955_v0, %v4702_v55  ;;  %v2708_v30 = vpop.f32.mrb[104].mxu0 }
 0x1fc   : > { %2191 = vst [vmem:[%s4785_s5 + $0x28] sm:$0xff] %v2159_v52  ;;  %v2129_v15 = vadd.f32 %v4775_v5, %v2090_v31  ;;  %v1970_v25 = vadd.f32 %v2708_v30, %v1744_v63  ;;  %v1964_v47 = vpop.f32.mrb[105].mxu0 }
 0x1fd   : > { %2190 = vst [vmem:[%s4785_s5 + $0x20] sm:$0xff] %v2158_v38  ;;  %v2128_v39 = vadd.f32 %v4775_v5, %v2089_v53  ;;  %v1759_v16 = vpop.f32.mrb[120].mxu1  ;;  %v1965_v2 = vadd.f32 %v1964_v47, %v1739_v3 }
 0x1fe   : > { %v2161_v6 = vmax.f32 %v2129_v15, 0.0  ;;  %v2092_v4 = vadd.f32 %v1970_v25, %v4705_v22  ;;  %v1761_v58 = vpop.f32.mrb[121].mxu1 }
 0x1ff   : > { %v2160_v34 = vmax.f32 %v2128_v39, 0.0  ;;  %v2091_v55 = vadd.f32 %v1965_v2, %v4708_v61  ;;  %v2711_v7 = vpop.f32.mrb[106].mxu0 }
 0x200   : > { %2193 = vst [vmem:[%s4785_s5 + $0x38] sm:$0xff] %v2161_v6  ;;  %v2131_v43 = vadd.f32 %v4775_v5, %v2092_v4  ;;  %v1980_v63 = vadd.f32 %v2711_v7, %v1754_v37  ;;  %v1974_v19 = vpop.f32.mrb[107].mxu0 }
 0x201   : > { %2192 = vst [vmem:[%s4785_s5 + $0x30] sm:$0xff] %v2160_v34  ;;  %v2130_v21 = vadd.f32 %v4775_v5, %v2091_v55  ;;  %v1764_v42 = vpop.f32.mrb[122].mxu1  ;;  %v1975_v3 = vadd.f32 %v1974_v19, %v1749_v14 }
 0x202   : > { %v2163_v56 = vmax.f32 %v2131_v43, 0.0  ;;  %v2094_v22 = vadd.f32 %v1980_v63, %v4711_v1  ;;  %v1766_v60 = vpop.f32.mrb[123].mxu1 }
 0x203   : > { %v2162_v24 = vmax.f32 %v2130_v21, 0.0  ;;  %v2093_v61 = vadd.f32 %v1975_v3, %v4714_v50  ;;  %v2714_v23 = vpop.f32.mrb[108].mxu0 }
 0x204   : > { %2195 = vst [vmem:[%s4785_s5 + $0x48] sm:$0xff] %v2163_v56  ;;  %v2133_v11 = vadd.f32 %v4775_v5, %v2094_v22  ;;  %v1990_v10 = vadd.f32 %v2714_v23, %v1764_v42  ;;  %v1984_v54 = vpop.f32.mrb[109].mxu0 }
 0x205   : > { %2194 = vst [vmem:[%s4785_s5 + $0x40] sm:$0xff] %v2162_v24  ;;  %v2132_v8 = vadd.f32 %v4775_v5, %v2093_v61  ;;  %v1769_v40 = vpop.f32.mrb[124].mxu1  ;;  %v1985_v14 = vadd.f32 %v1984_v54, %v1759_v16 }
 0x206   : > { %v2165_v26 = vmax.f32 %v2133_v11, 0.0  ;;  %v2096_v1 = vadd.f32 %v1990_v10, %v4717_v36  ;;  %v1771_v51 = vpop.f32.mrb[125].mxu1 }
 0x207   : > { %v2164_v33 = vmax.f32 %v2132_v8, 0.0  ;;  %v2095_v50 = vadd.f32 %v1985_v14, %v4720_v20  ;;  %v2717_v37 = vpop.f32.mrb[110].mxu0 }
 0x208   : > { %2197 = vst [vmem:[%s4785_s5 + $0x58] sm:$0xff] %v2165_v26  ;;  %v2135_v0 = vadd.f32 %v4775_v5, %v2096_v1  ;;  %v1994_v52 = vpop.f32.mrb[111].mxu0 }
 0x209   : > { %2196 = vst [vmem:[%s4785_s5 + $0x50] sm:$0xff] %v2164_v33  ;;  %v2134_v31 = vadd.f32 %v4775_v5, %v2095_v50  ;;  %v1774_v62 = vpop.f32.mrb[126].mxu1  ;;  %v1995_v38 = vadd.f32 %v1994_v52, %v1769_v40 }
 0x20a   : > { %v2167_v53 = vmax.f32 %v2135_v0, 0.0  ;;  %v2000_v30 = vadd.f32 %v2717_v37, %v1774_v62  ;;  %v1776_v15 = vpop.f32.mrb[127].mxu1 }
 0x20b   : > { %v2166_v36 = vmax.f32 %v2134_v31, 0.0  ;;  %v2097_v25 = vadd.f32 %v1995_v38, %v4726_v48  ;;  %v2720_v47 = vpop.f32.mrb[112].mxu0 }
 0x20c   : > { %2199 = vst [vmem:[%s4785_s5 + $0x68] sm:$0xff] %v2167_v53  ;;  %v2098_v20 = vadd.f32 %v2000_v30, %v4723_v12  ;;  %v2004_v39 = vpop.f32.mrb[113].mxu0 }
 0x20d   : > { %2198 = vst [vmem:[%s4785_s5 + $0x60] sm:$0xff] %v2166_v36  ;;  %v2136_v16 = vadd.f32 %v4775_v5, %v2097_v25  ;;  %v1779_v2 = vpop.f32.mrb[128].mxu1 }
 0x20e   : > { %v2137_v6 = vadd.f32 %v4775_v5, %v2098_v20  ;;  %v2005_v4 = vadd.f32 %v2004_v39, %v1779_v2  ;;  %v1781_v58 = vpop.f32.mrb[129].mxu1 }
 0x20f   : > { %v2168_v34 = vmax.f32 %v2136_v16, 0.0  ;;  %v2723_v55 = vpop.f32.mrb[114].mxu0 }
 0x210   : > { %v2169_v7 = vmax.f32 %v2137_v6, 0.0  ;;  %v2099_v48 = vadd.f32 %v2005_v4, %v4732_v59  ;;  %v2014_v43 = vpop.f32.mrb[115].mxu0 }
 0x211   : > { %2200 = vst [vmem:[%s4785_s5 + $0x70] sm:$0xff] %v2168_v34  ;;  %v1784_v63 = vpop.f32.mrb[130].mxu1 }
 0x212   : > { %2201 = vst [vmem:[%s4785_s5 + $0x78] sm:$0xff] %v2169_v7  ;;  %v2138_v12 = vadd.f32 %v4775_v5, %v2099_v48  ;;  %v2010_v19 = vadd.f32 %v2720_v47, %v1784_v63  ;;  %v1786_v21 = vpop.f32.mrb[131].mxu1 }
 0x213   : > { %v2726_v42 = vpop.f32.mrb[116].mxu0 }
 0x214   : > { %v2170_v3 = vmax.f32 %v2138_v12, 0.0  ;;  %v2100_v56 = vadd.f32 %v2010_v19, %v4729_v9  ;;  %v2024_v22 = vpop.f32.mrb[117].mxu0 }
 0x215   : > { %v1789_v60 = vpop.f32.mrb[132].mxu1 }
 0x216   : > { %2202 = vst [vmem:[%s4785_s5 + $0x80] sm:$0xff] %v2170_v3  ;;  %v2139_v24 = vadd.f32 %v4775_v5, %v2100_v56  ;;  %v2015_v61 = vadd.f32 %v2014_v43, %v1789_v60  ;;  %v1791_v59 = vpop.f32.mrb[133].mxu1 }
 0x217   : > { %v2729_v23 = vpop.f32.mrb[118].mxu0 }
 0x218   : > { %v2171_v11 = vmax.f32 %v2139_v24, 0.0  ;;  %v2101_v10 = vadd.f32 %v2015_v61, %v4738_v35  ;;  %v2034_v54 = vpop.f32.mrb[119].mxu0 }
 0x219   : > { %v1794_v8 = vpop.f32.mrb[134].mxu1 }
 0x21a   : > { %2203 = vst [vmem:[%s4785_s5 + $0x88] sm:$0xff] %v2171_v11  ;;  %v2140_v40 = vadd.f32 %v4775_v5, %v2101_v10  ;;  %v2020_v14 = vadd.f32 %v2723_v55, %v1794_v8  ;;  %v1796_v9 = vpop.f32.mrb[135].mxu1 }
 0x21b   : > { %v2732_v26 = vpop.f32.mrb[120].mxu0 }
 0x21c   : > { %v2172_v1 = vmax.f32 %v2140_v40, 0.0  ;;  %v2102_v51 = vadd.f32 %v2020_v14, %v4735_v49  ;;  %v2044_v33 = vpop.f32.mrb[121].mxu0 }
 0x21d   : > { %v1799_v50 = vpop.f32.mrb[136].mxu1 }
 0x21e   : > { %2204 = vst [vmem:[%s4785_s5 + $0x90] sm:$0xff] %v2172_v1  ;;  %v2141_v37 = vadd.f32 %v4775_v5, %v2102_v51  ;;  %v2025_v0 = vadd.f32 %v2024_v22, %v1799_v50  ;;  %v1801_v35 = vpop.f32.mrb[137].mxu1 }
 0x21f   : > { %v2735_v52 = vpop.f32.mrb[122].mxu0 }
 0x220   : > { %v2173_v31 = vmax.f32 %v2141_v37, 0.0  ;;  %v2103_v62 = vadd.f32 %v2025_v0, %v4744_v28  ;;  %v2054_v38 = vpop.f32.mrb[123].mxu0 }
 0x221   : > { %v1804_v53 = vpop.f32.mrb[138].mxu1 }
 0x222   : > { %2205 = vst [vmem:[%s4785_s5 + $0x98] sm:$0xff] %v2173_v31  ;;  %v2142_v30 = vadd.f32 %v4775_v5, %v2103_v62  ;;  %v2030_v15 = vadd.f32 %v2726_v42, %v1804_v53  ;;  %v1806_v49 = vpop.f32.mrb[139].mxu1 }
 0x223   : > { %v2738_v36 = vpop.f32.mrb[124].mxu0 }
 0x224   : > { %v2174_v25 = vmax.f32 %v2142_v30, 0.0  ;;  %v2104_v47 = vadd.f32 %v2030_v15, %v4741_v18  ;;  %v2064_v20 = vpop.f32.mrb[125].mxu0 }
 0x225   : > { %v1809_v39 = vpop.f32.mrb[140].mxu1 }
 0x226   : > { %2206 = vst [vmem:[%s4785_s5 + $0xa0] sm:$0xff] %v2174_v25  ;;  %v2143_v16 = vadd.f32 %v4775_v5, %v2104_v47  ;;  %v2035_v2 = vadd.f32 %v2034_v54, %v1809_v39  ;;  %v1811_v28 = vpop.f32.mrb[141].mxu1 }
 0x227   : > { %v4846_v6 = vpop.f32.mrb[126].mxu0 }
 0x228   : > { %v2175_v4 = vmax.f32 %v2143_v16, 0.0  ;;  %v2105_v58 = vadd.f32 %v2035_v2, %v4750_v17  ;;  %v2074_v34 = vpop.f32.mrb[127].mxu0 }
 0x229   : > { %v1814_v55 = vpop.f32.mrb[142].mxu1 }
 0x22a   : > { %2207 = vst [vmem:[%s4785_s5 + $0xa8] sm:$0xff] %v2175_v4  ;;  %v2144_v7 = vadd.f32 %v4775_v5, %v2105_v58  ;;  %v2040_v18 = vadd.f32 %v2729_v23, %v1814_v55  ;;  %v1816_v48 = vpop.f32.mrb[143].mxu1 }
 0x22c   : > { %v2176_v43 = vmax.f32 %v2144_v7, 0.0  ;;  %v2106_v63 = vadd.f32 %v2040_v18, %v4747_v46 }
 0x22d   : > { %v1819_v12 = vpop.f32.mrb[144].mxu1 }
 0x22e   : > { %2208 = vst [vmem:[%s4785_s5 + $0xb0] sm:$0xff] %v2176_v43  ;;  %v2145_v19 = vadd.f32 %v4775_v5, %v2106_v63  ;;  %v2045_v21 = vadd.f32 %v2044_v33, %v1819_v12  ;;  %v1821_v42 = vpop.f32.mrb[145].mxu1 }
 0x230   : > { %v2177_v3 = vmax.f32 %v2145_v19, 0.0  ;;  %v2107_v17 = vadd.f32 %v2045_v21, %v4756_v27 }
 0x231   : > { %v1824_v56 = vpop.f32.mrb[146].mxu1 }
 0x232   : > { %2209 = vst [vmem:[%s4785_s5 + $0xb8] sm:$0xff] %v2177_v3  ;;  %v2146_v22 = vadd.f32 %v4775_v5, %v2107_v17  ;;  %v2050_v60 = vadd.f32 %v2732_v26, %v1824_v56  ;;  %v1826_v24 = vpop.f32.mrb[147].mxu1 }
 0x234   : > { %v2178_v61 = vmax.f32 %v2146_v22, 0.0  ;;  %v2108_v46 = vadd.f32 %v2050_v60, %v4753_v41 }
 0x235   : > { %v1829_v59 = vpop.f32.mrb[148].mxu1 }
 0x236   : > { %2210 = vst [vmem:[%s4785_s5 + $0xc0] sm:$0xff] %v2178_v61  ;;  %v2147_v23 = vadd.f32 %v4775_v5, %v2108_v46  ;;  %v2055_v11 = vadd.f32 %v2054_v38, %v1829_v59  ;;  %v1831_v10 = vpop.f32.mrb[149].mxu1 }
 0x238   : > { %v2179_v54 = vmax.f32 %v2147_v23, 0.0  ;;  %v2109_v27 = vadd.f32 %v2055_v11, %v4761_v32 }
 0x239   : > { %v1834_v8 = vpop.f32.mrb[150].mxu1 }
 0x23a   : > { %2211 = vst [vmem:[%s4785_s5 + $0xc8] sm:$0xff] %v2179_v54  ;;  %v2148_v40 = vadd.f32 %v4775_v5, %v2109_v27  ;;  %v2060_v14 = vadd.f32 %v2735_v52, %v1834_v8  ;;  %v1836_v9 = vpop.f32.mrb[151].mxu1 }
 0x23c   : > { %v2180_v26 = vmax.f32 %v2148_v40, 0.0  ;;  %v2110_v41 = vadd.f32 %v2060_v14, %v4758_v45 }
 0x23d   : > { %v1839_v1 = vpop.f32.mrb[152].mxu1 }
 0x23e   : > { %2212 = vst [vmem:[%s4785_s5 + $0xd0] sm:$0xff] %v2180_v26  ;;  %v2149_v51 = vadd.f32 %v4775_v5, %v2110_v41  ;;  %v2065_v33 = vadd.f32 %v2064_v20, %v1839_v1  ;;  %v1841_v50 = vpop.f32.mrb[153].mxu1 }
 0x240   : > { %v2181_v37 = vmax.f32 %v2149_v51, 0.0  ;;  %v2111_v32 = vadd.f32 %v2065_v33, %v4765_v29 }
 0x241   : > { %v1844_v0 = vpop.f32.mrb[154].mxu1 }
 0x242   : > { %2213 = vst [vmem:[%s4785_s5 + $0xd8] sm:$0xff] %v2181_v37  ;;  %v2150_v35 = vadd.f32 %v4775_v5, %v2111_v32  ;;  %v2070_v52 = vadd.f32 %v2738_v36, %v1844_v0  ;;  %v1846_v31 = vpop.f32.mrb[155].mxu1 }
 0x244   : > { %v2182_v62 = vmax.f32 %v2150_v35, 0.0  ;;  %v2112_v45 = vadd.f32 %v2070_v52, %v4763_v44 }
 0x245   : > { %v1849_v38 = vpop.f32.mrb[156].mxu1 }
 0x246   : > { %2214 = vst [vmem:[%s4785_s5 + $0xe0] sm:$0xff] %v2182_v62  ;;  %v2151_v53 = vadd.f32 %v4775_v5, %v2112_v45  ;;  %v2075_v30 = vadd.f32 %v2074_v34, %v1849_v38  ;;  %v1851_v15 = vpop.f32.mrb[157].mxu1 }
 0x248   : > { %v2183_v29 = vmax.f32 %v2151_v53, 0.0  ;;  %v2113_v49 = vadd.f32 %v2075_v30, %v4769_v13 }
 0x249   : > { %v1854_v25 = vpop.f32.mrb[158].mxu1 }
 0x24a   : > { %2215 = vst [vmem:[%s4785_s5 + $0xe8] sm:$0xff] %v2183_v29  ;;  %v2152_v36 = vadd.f32 %v4775_v5, %v2113_v49  ;;  %v2080_v44 = vadd.f32 %v4846_v6, %v1854_v25  ;;  %v1856_v47 = vpop.f32.mrb[159].mxu1 }
 0x24c   : > { %v2184_v20 = vmax.f32 %v2152_v36, 0.0  ;;  %v2114_v39 = vadd.f32 %v2080_v44, %v4767_v57 }
 0x24e   : > { %2216 = vst [vmem:[%s4785_s5 + $0xf0] sm:$0xff] %v2184_v20  ;;  %v2153_v16 = vadd.f32 %v4775_v5, %v2114_v39 }
 0x250   : > { %v2185_v13 = vmax.f32 %v2153_v16, 0.0 }
 0x252   : > { %2217 = vst [vmem:[%s4785_s5 + $0xf8] sm:$0xff] %v2185_v13 }
 0x253   : > { %3084 = shalt.err (!%p3081_p5)
}
 0x254   : > { %s3085_s26 = scalar_lea.hbm %s4884_s10, 4096  ;;  %s3089_s21 = scalar_lea.hbm %s4940_s3, 8192 }
 0x255   : > { %p3086_p6 = scmp.ne.s32.totalorder %s4884_s10, %s3085_s26  ;;  %p3090_p10 = scmp.lt.u32.totalorder %s4884_s10, %s4940_s3 }
 0x256   : > { %p3091_p11 = scmp.lt.u32.totalorder %s3089_s21, %s3085_s26  ;;  %p3093_p13 = scmp.lt.u32.totalorder %s3085_s26, %s4884_s10 }
 0x257   : > { %p3087_p7 = pnand %p3086_p6, %p3215_p4 }
 0x258   : > { %p3092_p12 = por %p3091_p11, %p3090_p10 }
 0x259   : > { %p3088_p9 = pneg %p3087_p7 }
 0x25a   : > { %p3094_p0 = por %p3093_p13, %p3092_p12 }
 0x25c   : > { %p3095_p1 = pnand %p3094_p0, %p3088_p9 }
 0x25e   : > { %3098 = shalt.err (!%p3095_p1)
}
 0x25f   : > { %s3153_s4 = smov 128   ;;  %s3154_s5 = smov 8  }
 0x260   : > { %2983 = dma.vmem_to_hbm [thread:$0]  (%p3215_p4), %s4886_s7, 4096, %s4884_s10, %s4891_s11, %s3153_s4, %s3153_s4, %s3154_s5  }
 0x261 PF: > { %p2989_p2 = scmp.ge.s32.totalorder %s3149_s17, 2  ;;  %s2251_s6 = sand.u32 1, %s3129_s12  }
 0x262   : > { %s2252_s8 = scalar_lea.sflag [#allocation3], %s2251_s6 }
 0x263   : > { %p2986_p3 = pnand %p2989_p2, %p3222_p8 }
 0x265   : > { %3124 = dma.done.wait (!%p2986_p3), %s2252_s8, 4096  }
 0x266   : > { %3126 = vsyncadd (!%p2986_p3), %s2252_s8, 4294963200  ;;  %s16_s17 = sadd.s32 1, %s3149_s17   ;;  %s5101_s12 = smov %s3133_s13 }
 0x267   : > { %p13_p5 = scmp.ge.s32.totalorder %s16_s17, 4   ;;  %s5102_s13 = smov %s3137_s14 }
 0x268   : > { %s5103_s14 = smov %s3228_s25  ;;  %s5104_s15 = smov %s3145_s16 }
 0x269   : > { %s5105_s16 = smov %s5107_s20  ;;  %15 = sbr.rel (!%p13_p5) target bundleno = 4 (0x4), region = 74 }
 0x270   :  { %2257 = vsyncpa [#allocation3], 1 }
 0x271   :  { %2259 = vsyncpa [#allocation3 + $0x1], 1 }

</bundles_post_ra>
